<compile_context>
chip_gen: v7x
topology: tpu7x:2x2x1
jax: 0.10.0
libtpu: 0.0.40
codegen_flags: <defaults>
</compile_context>

<pallas_src>
import numpy as np
import jax
import jax.numpy as jnp
from jax import lax
from jax.experimental import pallas as pl
from jax.experimental.pallas import tpu as pltpu

EPS = 1e-5          # nn.InstanceNorm2d default eps
LRELU_SLOPE = 0.2   # nn.LeakyReLU(0.2)


def _round_up(v, m):
    return ((v + m - 1) // m) * m


# --------------------------------------------------------------------------
# Host-side (numpy) lowering of each layer to a dense linear operator acting
# on channel-major flattened activations: flat index = c*H*W + h*W + w.
# --------------------------------------------------------------------------

def _conv_dense_operator(w, b, hi, wi, stride, pad, pad_mode):
    """kxk conv (stride/pad, zero or reflect padding) as a dense matrix.

    Returns A (Cin*Hi*Wi, Cout*Ho*Wo), flat bias (1, Cout*Ho*Wo), Ho, Wo.
    """
    cout, cin, kh, kw = w.shape
    ho = (hi + 2 * pad - kh) // stride + 1
    wo = (wi + 2 * pad - kw) // stride + 1
    a6 = np.zeros((cin, hi, wi, cout, ho, wo), np.float32)
    wt = np.transpose(np.asarray(w, np.float32), (1, 0, 2, 3))  # (Cin,Cout,kh,kw)
    for oy in range(ho):
        for dy in range(kh):
            iy = oy * stride + dy - pad
            if pad_mode == 'reflect':
                iy = -iy if iy < 0 else (2 * hi - 2 - iy if iy >= hi else iy)
            elif iy < 0 or iy >= hi:
                continue
            for ox in range(wo):
                for dx in range(kw):
                    ix = ox * stride + dx - pad
                    if pad_mode == 'reflect':
                        ix = -ix if ix < 0 else (2 * wi - 2 - ix if ix >= wi else ix)
                    elif ix < 0 or ix >= wi:
                        continue
                    a6[:, iy, ix, :, oy, ox] += wt[:, :, dy, dx]
    a = a6.reshape(cin * hi * wi, cout * ho * wo)
    bvec = np.repeat(np.asarray(b, np.float32), ho * wo)[None, :]
    return a, bvec, ho, wo


def _avgpool_dense_operator(c, hi, wi):
    """AvgPool2d(3, stride=2, padding=1, count_include_pad=False) as a matrix."""
    ho = (hi + 2 - 3) // 2 + 1
    wo = (wi + 2 - 3) // 2 + 1
    blk = np.zeros((hi * wi, ho * wo), np.float32)
    for oy in range(ho):
        rows = [r for r in range(2 * oy - 1, 2 * oy + 2) if 0 <= r < hi]
        for ox in range(wo):
            cols = [q for q in range(2 * ox - 1, 2 * ox + 2) if 0 <= q < wi]
            inv = 1.0 / (len(rows) * len(cols))
            for r in rows:
                for q in cols:
                    blk[r * wi + q, oy * wo + ox] = inv
    return np.kron(np.eye(c, dtype=np.float32), blk), ho, wo


def _segment_matrix(c, hw):
    """(C, C*HW) 0/1 matrix: row c is 1 on channel c's contiguous HW segment."""
    return np.kron(np.eye(c, dtype=np.float32), np.ones((1, hw), np.float32))


def _rs_padded_operator(w_rs, hf, wf, off, out_pad):
    """Shared dis_rs 1x1 conv as a (Clast*Hf*Wf, out_pad) matrix whose active
    columns are [off, off+Hf*Wf) — lane-dense packed output per scale."""
    col = np.asarray(w_rs, np.float32)[0, :, 0, 0].reshape(-1, 1)
    base = np.kron(col, np.eye(hf * wf, dtype=np.float32))
    out = np.zeros((base.shape[0], out_pad), np.float32)
    out[:, off:off + hf * wf] = base
    return out


# --------------------------------------------------------------------------
# Pallas forward
# --------------------------------------------------------------------------

def msdiscriminator_forward(x, conv_ws, conv_bs, rs_w, rs_b, *,
                            num_scale, n_layer, pad_mode):
    """x: (N, Cin, H, W) f32. Returns list of per-scale outputs (N, 1, Hs, Ws)."""
    n, cin, h, w = x.shape
    d0 = cin * h * w

    # ---- pass A: spatial bookkeeping (output sizes / packed-lane offsets) ---
    sizes = []
    sh, sw = h, w
    for s in range(num_scale):
        ah, aw = sh, sw
        for _ in range(n_layer):
            ah = (ah + 2 - 4) // 2 + 1
            aw = (aw + 2 - 4) // 2 + 1
        sizes.append((ah, aw))
        if s < num_scale - 1:
            sh = (sh + 2 - 3) // 2 + 1
            sw = (sw + 2 - 3) // 2 + 1
    offs, tot = [], 0
    for (ah, aw) in sizes:
        offs.append(tot)
        tot += ah * aw
    out_pad = max(128, _round_up(tot, 128))      # lane-dense packed output width

    # ---- pass B: lower every layer to a dense operator ----------------------
    ops = []
    pool_chain = None                            # cumulative AvgPool operator
    sh, sw = h, w
    for s in range(num_scale):
        ah, aw = sh, sw
        for l in range(n_layer):
            a, bvec, ah, aw = _conv_dense_operator(
                np.asarray(conv_ws[s][l]), np.asarray(conv_bs[s][l]),
                ah, aw, stride=2, pad=1, pad_mode=pad_mode)
            if l == 0 and pool_chain is not None:
                a = pool_chain @ a               # fold AvgPool chain into conv
            cout = int(conv_ws[s][l].shape[0])
            seg = _segment_matrix(cout, ah * aw)
            ops += [jnp.asarray(a, dtype=jnp.bfloat16),              # MXU operand
                    jnp.asarray(bvec, dtype=jnp.float32),
                    jnp.asarray(seg, dtype=jnp.float32),             # (C, D)
                    jnp.asarray(np.ascontiguousarray(seg.T),
                                dtype=jnp.float32)]                  # (D, C)
        ops.append(jnp.asarray(
            _rs_padded_operator(np.asarray(rs_w), ah, aw, offs[s], out_pad),
            dtype=jnp.bfloat16))
        if s < num_scale - 1:
            p, sh, sw = _avgpool_dense_operator(cin, sh, sw)
            pool_chain = p if pool_chain is None else pool_chain @ p
    n_ops = len(ops)
    op_bytes = sum(int(np.prod(o.shape)) * o.dtype.itemsize for o in ops)
    assert op_bytes < (24 << 20), (
        "dense-operator lowering too large for VMEM; use an im2col path")

    # ---- batch tiling: images go in the MXU M dimension ---------------------
    tm = min(128, _round_up(n, 8))
    if n >= 16:                       # keep >=2 grid steps for v7x's two cores
        tm = min(tm, _round_up((n + 1) // 2, 8))
    n_pad = _round_up(n, tm)
    grid = n_pad // tm

    x_flat = x.reshape(n, d0).astype(jnp.float32)      # channel-major flatten
    if n_pad > n:
        x_flat = jnp.pad(x_flat, ((0, n_pad - n), (0, 0)))
    brs = jnp.full((1, out_pad), rs_b[0], dtype=jnp.float32)

    # ---- kernel --------------------------------------------------------------
    def kernel(*refs):
        x_ref, brs_ref = refs[0], refs[1]
        op_refs = refs[2:2 + n_ops]
        out_ref = refs[2 + n_ops]
        it = iter(op_refs)

        x_bf = x_ref[...].astype(jnp.bfloat16)          # (TM, Cin*H*W)
        acc = None                                      # packed (TM, out_pad)
        for s in range(num_scale):                      # fully unrolled
            h_bf = x_bf                                 # pool folded into conv A
            for _ in range(n_layer):
                a_ref, b_ref, seg_ref, segT_ref = (next(it), next(it),
                                                   next(it), next(it))
                # conv4x4/s2/p1 (+bias): ONE bf16 MXU matmul, f32 accumulation
                z = jnp.dot(h_bf, a_ref[...],
                            preferred_element_type=jnp.float32) + b_ref[...]
                # InstanceNorm2d (two-pass, f32) + LeakyReLU(0.2)
                c_ch, d_out = seg_ref.shape
                inv_hw = 1.0 / float(d_out // c_ch)
                seg, segT = seg_ref[...], segT_ref[...]
                mean = jnp.dot(z, segT,
                               preferred_element_type=jnp.float32) * inv_hw
                cen = z - jnp.dot(mean, seg, preferred_element_type=jnp.float32)
                var = jnp.dot(cen * cen, segT,
                              preferred_element_type=jnp.float32) * inv_hw
                rstd = lax.rsqrt(var + EPS)             # (TM, C) on the EUP
                hf = cen * jnp.dot(rstd, seg, preferred_element_type=jnp.float32)
                hf = jnp.where(hf > 0, hf, LRELU_SLOPE * hf)
                h_bf = hf.astype(jnp.bfloat16)          # MXU operand only
            # shared dis_rs 1x1 conv, column-embedded into the packed output
            r_ref = next(it)
            part = jnp.dot(h_bf, r_ref[...], preferred_element_type=jnp.float32)
            acc = part if acc is None else acc + part
        out_ref[...] = acc + brs_ref[...]               # one 128-lane-dense store

    # ---- pallas_call ----------------------------------------------------------
    in_specs = ([pl.BlockSpec((tm, d0), lambda i: (i, 0)),
                 pl.BlockSpec((1, out_pad), lambda i: (0, 0))]
                + [pl.BlockSpec(op.shape, lambda i: (0, 0)) for op in ops])
    out_specs = pl.BlockSpec((tm, out_pad), lambda i: (i, 0))

    packed = pl.pallas_call(
        kernel,
        out_shape=jax.ShapeDtypeStruct((n_pad, out_pad), jnp.float32),
        grid_spec=pltpu.PrefetchScalarGridSpec(
            num_scalar_prefetch=0,
            grid=(grid,),
            in_specs=in_specs,
            out_specs=out_specs),
        compiler_params=pltpu.CompilerParams(
            dimension_semantics=("parallel",),
            vmem_limit_bytes=64 * 1024 * 1024),
    )(x_flat, brs, *ops)

    outs = []
    for (ah, aw), off in zip(sizes, offs):
        outs.append(packed[:n, off:off + ah * aw].reshape(n, 1, ah, aw))
    return outs


# --------------------------------------------------------------------------
# Plain-JAX reference of the PyTorch module (for the correctness check)
# --------------------------------------------------------------------------

def reference_forward(x, conv_ws, conv_bs, rs_w, rs_b, *,
                      num_scale, n_layer, pad_mode):
    dn = ('NCHW', 'OIHW', 'NCHW')
    outs = []
    cur = x.astype(jnp.float32)
    for s in range(num_scale):
        hh = cur
        for l in range(n_layer):
            mode = 'reflect' if pad_mode == 'reflect' else 'constant'
            hp = jnp.pad(hh, ((0, 0), (0, 0), (1, 1), (1, 1)), mode=mode)
            hh = lax.conv_general_dilated(hp, conv_ws[s][l], (2, 2), 'VALID',
                                          dimension_numbers=dn,
                                          precision=lax.Precision.HIGHEST)
            hh = hh + conv_bs[s][l][None, :, None, None]
            m = jnp.mean(hh, axis=(2, 3), keepdims=True)
            v = jnp.mean((hh - m) ** 2, axis=(2, 3), keepdims=True)
            hh = (hh - m) / jnp.sqrt(v + EPS)
            hh = jnp.where(hh > 0, hh, LRELU_SLOPE * hh)
        o = lax.conv_general_dilated(hh, rs_w, (1, 1), 'VALID',
                                     dimension_numbers=dn,
                                     precision=lax.Precision.HIGHEST)
        outs.append(o + rs_b[None, :, None, None])
        if s < num_scale - 1:
            window, strides = (1, 1, 3, 3), (1, 1, 2, 2)
            padcfg = ((0, 0), (0, 0), (1, 1), (1, 1))
            sums = lax.reduce_window(cur, 0.0, lax.add, window, strides, padcfg)
            cnts = lax.reduce_window(jnp.ones_like(cur), 0.0, lax.add,
                                     window, strides, padcfg)
            cur = sums / cnts          # count_include_pad=False
    return outs


# --------------------------------------------------------------------------
# main
# --------------------------------------------------------------------------

if __name__ == "__main__":
    N, C_IN, H, W = 2, 3, 16, 16
    params = dict(num_features=8, num_scale=2, n_layer=2,
                  padding_mode='reflect', norm='in', act='lrelu')
    NUM_SCALE = params['num_scale']
    N_LAYER = params['n_layer']
    NUM_FEATURES = params['num_features']

    key = jax.random.PRNGKey(0)
    conv_ws, conv_bs = [], []
    for s in range(NUM_SCALE):
        ws, bs = [], []
        ci, co = C_IN, NUM_FEATURES
        for l in range(N_LAYER):
            key, kw_, kb_ = jax.random.split(key, 3)
            ws.append(jax.random.normal(kw_, (co, ci, 4, 4), jnp.float32)
                      * (1.0 / np.sqrt(ci * 16)))
            bs.append(jax.random.normal(kb_, (co,), jnp.float32) * 0.1)
            ci, co = co, co * 2
        conv_ws.append(ws)
        conv_bs.append(bs)
    c_last = NUM_FEATURES * 2 ** (N_LAYER - 1)
    key, kw_, kb_, kx = jax.random.split(key, 4)
    rs_w = jax.random.normal(kw_, (1, c_last, 1, 1), jnp.float32) * (1.0 / np.sqrt(c_last))
    rs_b = jax.random.normal(kb_, (1,), jnp.float32) * 0.1
    x = jax.random.normal(kx, (N, C_IN, H, W), jnp.float32)

    outs = msdiscriminator_forward(x, conv_ws, conv_bs, rs_w, rs_b,
                                   num_scale=NUM_SCALE, n_layer=N_LAYER,
                                   pad_mode=params['padding_mode'])
    outs = jax.block_until_ready(outs)

    refs = jax.block_until_ready(
        reference_forward(x, conv_ws, conv_bs, rs_w, rs_b,
                          num_scale=NUM_SCALE, n_layer=N_LAYER,
                          pad_mode=params['padding_mode']))

    assert len(outs) == len(refs)
    # Kernel runs native single-pass bf16 MXU matmuls (f32 accumulation) vs the
    # f32 HIGHEST-precision reference, so tolerance is set accordingly.
    for o, r in zip(outs, refs):
        assert o.shape == r.shape, (o.shape, r.shape)
        np.testing.assert_allclose(np.asarray(o), np.asarray(r),
                                   atol=2e-2, rtol=2e-2)
    print("KERNEL_OK")
</pallas_src>

<mosaic_0001>
module attributes {stable_mosaic.version = 11 : i64} {
  func.func @kernel(%arg0: i32, %arg1: memref<8x768xf32, #tpu.memory_space<vmem>>, %arg2: memref<1x128xf32, #tpu.memory_space<vmem>>, %arg3: memref<768x512xbf16, #tpu.memory_space<vmem>>, %arg4: memref<1x512xf32, #tpu.memory_space<vmem>>, %arg5: memref<8x512xf32, #tpu.memory_space<vmem>>, %arg6: memref<512x8xf32, #tpu.memory_space<vmem>>, %arg7: memref<512x256xbf16, #tpu.memory_space<vmem>>, %arg8: memref<1x256xf32, #tpu.memory_space<vmem>>, %arg9: memref<16x256xf32, #tpu.memory_space<vmem>>, %arg10: memref<256x16xf32, #tpu.memory_space<vmem>>, %arg11: memref<256x128xbf16, #tpu.memory_space<vmem>>, %arg12: memref<768x128xbf16, #tpu.memory_space<vmem>>, %arg13: memref<1x128xf32, #tpu.memory_space<vmem>>, %arg14: memref<8x128xf32, #tpu.memory_space<vmem>>, %arg15: memref<128x8xf32, #tpu.memory_space<vmem>>, %arg16: memref<128x64xbf16, #tpu.memory_space<vmem>>, %arg17: memref<1x64xf32, #tpu.memory_space<vmem>>, %arg18: memref<16x64xf32, #tpu.memory_space<vmem>>, %arg19: memref<64x16xf32, #tpu.memory_space<vmem>>, %arg20: memref<64x128xbf16, #tpu.memory_space<vmem>>, %arg21: memref<8x128xf32, #tpu.memory_space<vmem>>) attributes {dimension_semantics = [#tpu.dimension_semantics<parallel>], iteration_bounds = array<i64: 1>, scalar_prefetch = 0 : i64, scratch_operands = 0 : i64, tpu.core_type = #tpu.core_type<tc>, window_params = [{transform_indices = @transform_0, window_bounds = array<i64: 8, 768>}, {pipeline_mode = #tpu.pipeline_mode<synchronous>, transform_indices = @transform_1, window_bounds = array<i64: 1, 128>}, {pipeline_mode = #tpu.pipeline_mode<synchronous>, transform_indices = @transform_2, window_bounds = array<i64: 768, 512>}, {pipeline_mode = #tpu.pipeline_mode<synchronous>, transform_indices = @transform_3, window_bounds = array<i64: 1, 512>}, {pipeline_mode = #tpu.pipeline_mode<synchronous>, transform_indices = @transform_4, window_bounds = array<i64: 8, 512>}, {pipeline_mode = #tpu.pipeline_mode<synchronous>, transform_indices = @transform_5, window_bounds = array<i64: 512, 8>}, {pipeline_mode = #tpu.pipeline_mode<synchronous>, transform_indices = @transform_6, window_bounds = array<i64: 512, 256>}, {pipeline_mode = #tpu.pipeline_mode<synchronous>, transform_indices = @transform_7, window_bounds = array<i64: 1, 256>}, {pipeline_mode = #tpu.pipeline_mode<synchronous>, transform_indices = @transform_8, window_bounds = array<i64: 16, 256>}, {pipeline_mode = #tpu.pipeline_mode<synchronous>, transform_indices = @transform_9, window_bounds = array<i64: 256, 16>}, {pipeline_mode = #tpu.pipeline_mode<synchronous>, transform_indices = @transform_10, window_bounds = array<i64: 256, 128>}, {pipeline_mode = #tpu.pipeline_mode<synchronous>, transform_indices = @transform_11, window_bounds = array<i64: 768, 128>}, {pipeline_mode = #tpu.pipeline_mode<synchronous>, transform_indices = @transform_12, window_bounds = array<i64: 1, 128>}, {pipeline_mode = #tpu.pipeline_mode<synchronous>, transform_indices = @transform_13, window_bounds = array<i64: 8, 128>}, {pipeline_mode = #tpu.pipeline_mode<synchronous>, transform_indices = @transform_14, window_bounds = array<i64: 128, 8>}, {pipeline_mode = #tpu.pipeline_mode<synchronous>, transform_indices = @transform_15, window_bounds = array<i64: 128, 64>}, {pipeline_mode = #tpu.pipeline_mode<synchronous>, transform_indices = @transform_16, window_bounds = array<i64: 1, 64>}, {pipeline_mode = #tpu.pipeline_mode<synchronous>, transform_indices = @transform_17, window_bounds = array<i64: 16, 64>}, {pipeline_mode = #tpu.pipeline_mode<synchronous>, transform_indices = @transform_18, window_bounds = array<i64: 64, 16>}, {pipeline_mode = #tpu.pipeline_mode<synchronous>, transform_indices = @transform_19, window_bounds = array<i64: 64, 128>}, {transform_indices = @transform_20, window_bounds = array<i64: 8, 128>}]} {
    %c0 = arith.constant 0 : index
    %c0_0 = arith.constant 0 : index
    %0 = vector.load %arg1[%c0, %c0_0] : memref<8x768xf32, #tpu.memory_space<vmem>>, vector<8x768xf32>
    %1 = arith.truncf %0 : vector<8x768xf32> to vector<8x768xbf16>
    %c0_1 = arith.constant 0 : index
    %c0_2 = arith.constant 0 : index
    %2 = vector.load %arg3[%c0_1, %c0_2] : memref<768x512xbf16, #tpu.memory_space<vmem>>, vector<768x512xbf16>
    %cst = arith.constant dense<0.000000e+00> : vector<8x512xf32>
    %3 = tpu.matmul %1, %2, %cst {dimension_numbers = #tpu.dot_dimension_numbers<[1], [0], [0], [1], [0, 0, 1, 1], [], []>} : vector<8x768xbf16>, vector<768x512xbf16>, vector<8x512xf32> -> vector<8x512xf32>
    %c0_3 = arith.constant 0 : index
    %c0_4 = arith.constant 0 : index
    %4 = vector.load %arg4[%c0_3, %c0_4] : memref<1x512xf32, #tpu.memory_space<vmem>>, vector<1x512xf32>
    %5 = vector.broadcast %4 : vector<1x512xf32> to vector<8x512xf32>
    %6 = arith.addf %3, %5 : vector<8x512xf32>
    %c0_5 = arith.constant 0 : index
    %c0_6 = arith.constant 0 : index
    %7 = vector.load %arg5[%c0_5, %c0_6] : memref<8x512xf32, #tpu.memory_space<vmem>>, vector<8x512xf32>
    %c0_7 = arith.constant 0 : index
    %c0_8 = arith.constant 0 : index
    %8 = vector.load %arg6[%c0_7, %c0_8] : memref<512x8xf32, #tpu.memory_space<vmem>>, vector<512x8xf32>
    %cst_9 = arith.constant dense<0.000000e+00> : vector<8x8xf32>
    %9 = tpu.matmul %6, %8, %cst_9 {dimension_numbers = #tpu.dot_dimension_numbers<[1], [0], [0], [1], [0, 0, 1, 1], [], []>} : vector<8x512xf32>, vector<512x8xf32>, vector<8x8xf32> -> vector<8x8xf32>
    %cst_10 = arith.constant 1.562500e-02 : f32
    %10 = vector.broadcast %cst_10 : f32 to vector<8x8xf32>
    %11 = arith.mulf %9, %10 : vector<8x8xf32>
    %cst_11 = arith.constant dense<0.000000e+00> : vector<8x512xf32>
    %12 = tpu.matmul %11, %7, %cst_11 {dimension_numbers = #tpu.dot_dimension_numbers<[1], [0], [0], [1], [0, 0, 1, 1], [], []>} : vector<8x8xf32>, vector<8x512xf32>, vector<8x512xf32> -> vector<8x512xf32>
    %13 = arith.subf %6, %12 : vector<8x512xf32>
    %14 = arith.mulf %13, %13 : vector<8x512xf32>
    %cst_12 = arith.constant dense<0.000000e+00> : vector<8x8xf32>
    %15 = tpu.matmul %14, %8, %cst_12 {dimension_numbers = #tpu.dot_dimension_numbers<[1], [0], [0], [1], [0, 0, 1, 1], [], []>} : vector<8x512xf32>, vector<512x8xf32>, vector<8x8xf32> -> vector<8x8xf32>
    %cst_13 = arith.constant 1.562500e-02 : f32
    %16 = vector.broadcast %cst_13 : f32 to vector<8x8xf32>
    %17 = arith.mulf %15, %16 : vector<8x8xf32>
    %cst_14 = arith.constant 9.99999974E-6 : f32
    %18 = vector.broadcast %cst_14 : f32 to vector<8x8xf32>
    %19 = arith.addf %17, %18 : vector<8x8xf32>
    %20 = math.rsqrt %19 : vector<8x8xf32>
    %cst_15 = arith.constant dense<0.000000e+00> : vector<8x512xf32>
    %21 = tpu.matmul %20, %7, %cst_15 {dimension_numbers = #tpu.dot_dimension_numbers<[1], [0], [0], [1], [0, 0, 1, 1], [], []>} : vector<8x8xf32>, vector<8x512xf32>, vector<8x512xf32> -> vector<8x512xf32>
    %22 = arith.mulf %13, %21 : vector<8x512xf32>
    %cst_16 = arith.constant 0.000000e+00 : f32
    %23 = vector.broadcast %cst_16 : f32 to vector<8x512xf32>
    %24 = arith.cmpf ogt, %22, %23 : vector<8x512xf32>
    %cst_17 = arith.constant 2.000000e-01 : f32
    %25 = vector.broadcast %cst_17 : f32 to vector<8x512xf32>
    %26 = arith.mulf %25, %22 : vector<8x512xf32>
    %27 = arith.select %24, %22, %26 : vector<8x512xi1>, vector<8x512xf32>
    %28 = arith.truncf %27 : vector<8x512xf32> to vector<8x512xbf16>
    %c0_18 = arith.constant 0 : index
    %c0_19 = arith.constant 0 : index
    %29 = vector.load %arg7[%c0_18, %c0_19] : memref<512x256xbf16, #tpu.memory_space<vmem>>, vector<512x256xbf16>
    %cst_20 = arith.constant dense<0.000000e+00> : vector<8x256xf32>
    %30 = tpu.matmul %28, %29, %cst_20 {dimension_numbers = #tpu.dot_dimension_numbers<[1], [0], [0], [1], [0, 0, 1, 1], [], []>} : vector<8x512xbf16>, vector<512x256xbf16>, vector<8x256xf32> -> vector<8x256xf32>
    %c0_21 = arith.constant 0 : index
    %c0_22 = arith.constant 0 : index
    %31 = vector.load %arg8[%c0_21, %c0_22] : memref<1x256xf32, #tpu.memory_space<vmem>>, vector<1x256xf32>
    %32 = vector.broadcast %31 : vector<1x256xf32> to vector<8x256xf32>
    %33 = arith.addf %30, %32 : vector<8x256xf32>
    %c0_23 = arith.constant 0 : index
    %c0_24 = arith.constant 0 : index
    %34 = vector.load %arg9[%c0_23, %c0_24] : memref<16x256xf32, #tpu.memory_space<vmem>>, vector<16x256xf32>
    %c0_25 = arith.constant 0 : index
    %c0_26 = arith.constant 0 : index
    %35 = vector.load %arg10[%c0_25, %c0_26] : memref<256x16xf32, #tpu.memory_space<vmem>>, vector<256x16xf32>
    %cst_27 = arith.constant dense<0.000000e+00> : vector<8x16xf32>
    %36 = tpu.matmul %33, %35, %cst_27 {dimension_numbers = #tpu.dot_dimension_numbers<[1], [0], [0], [1], [0, 0, 1, 1], [], []>} : vector<8x256xf32>, vector<256x16xf32>, vector<8x16xf32> -> vector<8x16xf32>
    %cst_28 = arith.constant 6.250000e-02 : f32
    %37 = vector.broadcast %cst_28 : f32 to vector<8x16xf32>
    %38 = arith.mulf %36, %37 : vector<8x16xf32>
    %cst_29 = arith.constant dense<0.000000e+00> : vector<8x256xf32>
    %39 = tpu.matmul %38, %34, %cst_29 {dimension_numbers = #tpu.dot_dimension_numbers<[1], [0], [0], [1], [0, 0, 1, 1], [], []>} : vector<8x16xf32>, vector<16x256xf32>, vector<8x256xf32> -> vector<8x256xf32>
    %40 = arith.subf %33, %39 : vector<8x256xf32>
    %41 = arith.mulf %40, %40 : vector<8x256xf32>
    %cst_30 = arith.constant dense<0.000000e+00> : vector<8x16xf32>
    %42 = tpu.matmul %41, %35, %cst_30 {dimension_numbers = #tpu.dot_dimension_numbers<[1], [0], [0], [1], [0, 0, 1, 1], [], []>} : vector<8x256xf32>, vector<256x16xf32>, vector<8x16xf32> -> vector<8x16xf32>
    %cst_31 = arith.constant 6.250000e-02 : f32
    %43 = vector.broadcast %cst_31 : f32 to vector<8x16xf32>
    %44 = arith.mulf %42, %43 : vector<8x16xf32>
    %cst_32 = arith.constant 9.99999974E-6 : f32
    %45 = vector.broadcast %cst_32 : f32 to vector<8x16xf32>
    %46 = arith.addf %44, %45 : vector<8x16xf32>
    %47 = math.rsqrt %46 : vector<8x16xf32>
    %cst_33 = arith.constant dense<0.000000e+00> : vector<8x256xf32>
    %48 = tpu.matmul %47, %34, %cst_33 {dimension_numbers = #tpu.dot_dimension_numbers<[1], [0], [0], [1], [0, 0, 1, 1], [], []>} : vector<8x16xf32>, vector<16x256xf32>, vector<8x256xf32> -> vector<8x256xf32>
    %49 = arith.mulf %40, %48 : vector<8x256xf32>
    %cst_34 = arith.constant 0.000000e+00 : f32
    %50 = vector.broadcast %cst_34 : f32 to vector<8x256xf32>
    %51 = arith.cmpf ogt, %49, %50 : vector<8x256xf32>
    %cst_35 = arith.constant 2.000000e-01 : f32
    %52 = vector.broadcast %cst_35 : f32 to vector<8x256xf32>
    %53 = arith.mulf %52, %49 : vector<8x256xf32>
    %54 = arith.select %51, %49, %53 : vector<8x256xi1>, vector<8x256xf32>
    %55 = arith.truncf %54 : vector<8x256xf32> to vector<8x256xbf16>
    %c0_36 = arith.constant 0 : index
    %c0_37 = arith.constant 0 : index
    %56 = vector.load %arg11[%c0_36, %c0_37] : memref<256x128xbf16, #tpu.memory_space<vmem>>, vector<256x128xbf16>
    %cst_38 = arith.constant dense<0.000000e+00> : vector<8x128xf32>
    %57 = tpu.matmul %55, %56, %cst_38 {dimension_numbers = #tpu.dot_dimension_numbers<[1], [0], [0], [1], [0, 0, 1, 1], [], []>} : vector<8x256xbf16>, vector<256x128xbf16>, vector<8x128xf32> -> vector<8x128xf32>
    %c0_39 = arith.constant 0 : index
    %c0_40 = arith.constant 0 : index
    %58 = vector.load %arg12[%c0_39, %c0_40] : memref<768x128xbf16, #tpu.memory_space<vmem>>, vector<768x128xbf16>
    %cst_41 = arith.constant dense<0.000000e+00> : vector<8x128xf32>
    %59 = tpu.matmul %1, %58, %cst_41 {dimension_numbers = #tpu.dot_dimension_numbers<[1], [0], [0], [1], [0, 0, 1, 1], [], []>} : vector<8x768xbf16>, vector<768x128xbf16>, vector<8x128xf32> -> vector<8x128xf32>
    %c0_42 = arith.constant 0 : index
    %c0_43 = arith.constant 0 : index
    %60 = vector.load %arg13[%c0_42, %c0_43] : memref<1x128xf32, #tpu.memory_space<vmem>>, vector<1x128xf32>
    %61 = vector.broadcast %60 : vector<1x128xf32> to vector<8x128xf32>
    %62 = arith.addf %59, %61 : vector<8x128xf32>
    %c0_44 = arith.constant 0 : index
    %c0_45 = arith.constant 0 : index
    %63 = vector.load %arg14[%c0_44, %c0_45] : memref<8x128xf32, #tpu.memory_space<vmem>>, vector<8x128xf32>
    %c0_46 = arith.constant 0 : index
    %c0_47 = arith.constant 0 : index
    %64 = vector.load %arg15[%c0_46, %c0_47] : memref<128x8xf32, #tpu.memory_space<vmem>>, vector<128x8xf32>
    %cst_48 = arith.constant dense<0.000000e+00> : vector<8x8xf32>
    %65 = tpu.matmul %62, %64, %cst_48 {dimension_numbers = #tpu.dot_dimension_numbers<[1], [0], [0], [1], [0, 0, 1, 1], [], []>} : vector<8x128xf32>, vector<128x8xf32>, vector<8x8xf32> -> vector<8x8xf32>
    %cst_49 = arith.constant 6.250000e-02 : f32
    %66 = vector.broadcast %cst_49 : f32 to vector<8x8xf32>
    %67 = arith.mulf %65, %66 : vector<8x8xf32>
    %cst_50 = arith.constant dense<0.000000e+00> : vector<8x128xf32>
    %68 = tpu.matmul %67, %63, %cst_50 {dimension_numbers = #tpu.dot_dimension_numbers<[1], [0], [0], [1], [0, 0, 1, 1], [], []>} : vector<8x8xf32>, vector<8x128xf32>, vector<8x128xf32> -> vector<8x128xf32>
    %69 = arith.subf %62, %68 : vector<8x128xf32>
    %70 = arith.mulf %69, %69 : vector<8x128xf32>
    %cst_51 = arith.constant dense<0.000000e+00> : vector<8x8xf32>
    %71 = tpu.matmul %70, %64, %cst_51 {dimension_numbers = #tpu.dot_dimension_numbers<[1], [0], [0], [1], [0, 0, 1, 1], [], []>} : vector<8x128xf32>, vector<128x8xf32>, vector<8x8xf32> -> vector<8x8xf32>
    %cst_52 = arith.constant 6.250000e-02 : f32
    %72 = vector.broadcast %cst_52 : f32 to vector<8x8xf32>
    %73 = arith.mulf %71, %72 : vector<8x8xf32>
    %cst_53 = arith.constant 9.99999974E-6 : f32
    %74 = vector.broadcast %cst_53 : f32 to vector<8x8xf32>
    %75 = arith.addf %73, %74 : vector<8x8xf32>
    %76 = math.rsqrt %75 : vector<8x8xf32>
    %cst_54 = arith.constant dense<0.000000e+00> : vector<8x128xf32>
    %77 = tpu.matmul %76, %63, %cst_54 {dimension_numbers = #tpu.dot_dimension_numbers<[1], [0], [0], [1], [0, 0, 1, 1], [], []>} : vector<8x8xf32>, vector<8x128xf32>, vector<8x128xf32> -> vector<8x128xf32>
    %78 = arith.mulf %69, %77 : vector<8x128xf32>
    %cst_55 = arith.constant 0.000000e+00 : f32
    %79 = vector.broadcast %cst_55 : f32 to vector<8x128xf32>
    %80 = arith.cmpf ogt, %78, %79 : vector<8x128xf32>
    %cst_56 = arith.constant 2.000000e-01 : f32
    %81 = vector.broadcast %cst_56 : f32 to vector<8x128xf32>
    %82 = arith.mulf %81, %78 : vector<8x128xf32>
    %83 = arith.select %80, %78, %82 : vector<8x128xi1>, vector<8x128xf32>
    %84 = arith.truncf %83 : vector<8x128xf32> to vector<8x128xbf16>
    %c0_57 = arith.constant 0 : index
    %c0_58 = arith.constant 0 : index
    %85 = vector.load %arg16[%c0_57, %c0_58] : memref<128x64xbf16, #tpu.memory_space<vmem>>, vector<128x64xbf16>
    %cst_59 = arith.constant dense<0.000000e+00> : vector<8x64xf32>
    %86 = tpu.matmul %84, %85, %cst_59 {dimension_numbers = #tpu.dot_dimension_numbers<[1], [0], [0], [1], [0, 0, 1, 1], [], []>} : vector<8x128xbf16>, vector<128x64xbf16>, vector<8x64xf32> -> vector<8x64xf32>
    %c0_60 = arith.constant 0 : index
    %c0_61 = arith.constant 0 : index
    %87 = vector.load %arg17[%c0_60, %c0_61] : memref<1x64xf32, #tpu.memory_space<vmem>>, vector<1x64xf32>
    %88 = vector.broadcast %87 : vector<1x64xf32> to vector<8x64xf32>
    %89 = arith.addf %86, %88 : vector<8x64xf32>
    %c0_62 = arith.constant 0 : index
    %c0_63 = arith.constant 0 : index
    %90 = vector.load %arg18[%c0_62, %c0_63] : memref<16x64xf32, #tpu.memory_space<vmem>>, vector<16x64xf32>
    %c0_64 = arith.constant 0 : index
    %c0_65 = arith.constant 0 : index
    %91 = vector.load %arg19[%c0_64, %c0_65] : memref<64x16xf32, #tpu.memory_space<vmem>>, vector<64x16xf32>
    %cst_66 = arith.constant dense<0.000000e+00> : vector<8x16xf32>
    %92 = tpu.matmul %89, %91, %cst_66 {dimension_numbers = #tpu.dot_dimension_numbers<[1], [0], [0], [1], [0, 0, 1, 1], [], []>} : vector<8x64xf32>, vector<64x16xf32>, vector<8x16xf32> -> vector<8x16xf32>
    %cst_67 = arith.constant 2.500000e-01 : f32
    %93 = vector.broadcast %cst_67 : f32 to vector<8x16xf32>
    %94 = arith.mulf %92, %93 : vector<8x16xf32>
    %cst_68 = arith.constant dense<0.000000e+00> : vector<8x64xf32>
    %95 = tpu.matmul %94, %90, %cst_68 {dimension_numbers = #tpu.dot_dimension_numbers<[1], [0], [0], [1], [0, 0, 1, 1], [], []>} : vector<8x16xf32>, vector<16x64xf32>, vector<8x64xf32> -> vector<8x64xf32>
    %96 = arith.subf %89, %95 : vector<8x64xf32>
    %97 = arith.mulf %96, %96 : vector<8x64xf32>
    %cst_69 = arith.constant dense<0.000000e+00> : vector<8x16xf32>
    %98 = tpu.matmul %97, %91, %cst_69 {dimension_numbers = #tpu.dot_dimension_numbers<[1], [0], [0], [1], [0, 0, 1, 1], [], []>} : vector<8x64xf32>, vector<64x16xf32>, vector<8x16xf32> -> vector<8x16xf32>
    %cst_70 = arith.constant 2.500000e-01 : f32
    %99 = vector.broadcast %cst_70 : f32 to vector<8x16xf32>
    %100 = arith.mulf %98, %99 : vector<8x16xf32>
    %cst_71 = arith.constant 9.99999974E-6 : f32
    %101 = vector.broadcast %cst_71 : f32 to vector<8x16xf32>
    %102 = arith.addf %100, %101 : vector<8x16xf32>
    %103 = math.rsqrt %102 : vector<8x16xf32>
    %cst_72 = arith.constant dense<0.000000e+00> : vector<8x64xf32>
    %104 = tpu.matmul %103, %90, %cst_72 {dimension_numbers = #tpu.dot_dimension_numbers<[1], [0], [0], [1], [0, 0, 1, 1], [], []>} : vector<8x16xf32>, vector<16x64xf32>, vector<8x64xf32> -> vector<8x64xf32>
    %105 = arith.mulf %96, %104 : vector<8x64xf32>
    %cst_73 = arith.constant 0.000000e+00 : f32
    %106 = vector.broadcast %cst_73 : f32 to vector<8x64xf32>
    %107 = arith.cmpf ogt, %105, %106 : vector<8x64xf32>
    %cst_74 = arith.constant 2.000000e-01 : f32
    %108 = vector.broadcast %cst_74 : f32 to vector<8x64xf32>
    %109 = arith.mulf %108, %105 : vector<8x64xf32>
    %110 = arith.select %107, %105, %109 : vector<8x64xi1>, vector<8x64xf32>
    %111 = arith.truncf %110 : vector<8x64xf32> to vector<8x64xbf16>
    %c0_75 = arith.constant 0 : index
    %c0_76 = arith.constant 0 : index
    %112 = vector.load %arg20[%c0_75, %c0_76] : memref<64x128xbf16, #tpu.memory_space<vmem>>, vector<64x128xbf16>
    %cst_77 = arith.constant dense<0.000000e+00> : vector<8x128xf32>
    %113 = tpu.matmul %111, %112, %cst_77 {dimension_numbers = #tpu.dot_dimension_numbers<[1], [0], [0], [1], [0, 0, 1, 1], [], []>} : vector<8x64xbf16>, vector<64x128xbf16>, vector<8x128xf32> -> vector<8x128xf32>
    %114 = arith.addf %57, %113 : vector<8x128xf32>
    %c0_78 = arith.constant 0 : index
    %c0_79 = arith.constant 0 : index
    %115 = vector.load %arg2[%c0_78, %c0_79] : memref<1x128xf32, #tpu.memory_space<vmem>>, vector<1x128xf32>
    %116 = vector.broadcast %115 : vector<1x128xf32> to vector<8x128xf32>
    %117 = arith.addf %114, %116 : vector<8x128xf32>
    %c0_80 = arith.constant 0 : index
    %c0_81 = arith.constant 0 : index
    %118 = vector.load %arg21[%c0_80, %c0_81] : memref<8x128xf32, #tpu.memory_space<vmem>>, vector<8x128xf32>
    tpu.vector_store %arg21[%c0_80, %c0_81], %117 {strides = array<i32>} : memref<8x128xf32, #tpu.memory_space<vmem>>, vector<8x128xf32>,
    return
  }
  func.func @transform_0(%arg0: i32) -> (i32, i32) {
    %c0_i32 = arith.constant 0 : i32
    %c0_i32_0 = arith.constant 0 : i32
    return %arg0, %c0_i32 : i32, i32
  }
  func.func @transform_1(%arg0: i32) -> (i32, i32) {
    %c0_i32 = arith.constant 0 : i32
    %c0_i32_0 = arith.constant 0 : i32
    %c0_i32_1 = arith.constant 0 : i32
    return %c0_i32, %c0_i32_0 : i32, i32
  }
  func.func @transform_2(%arg0: i32) -> (i32, i32) {
    %c0_i32 = arith.constant 0 : i32
    %c0_i32_0 = arith.constant 0 : i32
    %c0_i32_1 = arith.constant 0 : i32
    return %c0_i32, %c0_i32_0 : i32, i32
  }
  func.func @transform_3(%arg0: i32) -> (i32, i32) {
    %c0_i32 = arith.constant 0 : i32
    %c0_i32_0 = arith.constant 0 : i32
    %c0_i32_1 = arith.constant 0 : i32
    return %c0_i32, %c0_i32_0 : i32, i32
  }
  func.func @transform_4(%arg0: i32) -> (i32, i32) {
    %c0_i32 = arith.constant 0 : i32
    %c0_i32_0 = arith.constant 0 : i32
    %c0_i32_1 = arith.constant 0 : i32
    return %c0_i32, %c0_i32_0 : i32, i32
  }
  func.func @transform_5(%arg0: i32) -> (i32, i32) {
    %c0_i32 = arith.constant 0 : i32
    %c0_i32_0 = arith.constant 0 : i32
    %c0_i32_1 = arith.constant 0 : i32
    return %c0_i32, %c0_i32_0 : i32, i32
  }
  func.func @transform_6(%arg0: i32) -> (i32, i32) {
    %c0_i32 = arith.constant 0 : i32
    %c0_i32_0 = arith.constant 0 : i32
    %c0_i32_1 = arith.constant 0 : i32
    return %c0_i32, %c0_i32_0 : i32, i32
  }
  func.func @transform_7(%arg0: i32) -> (i32, i32) {
    %c0_i32 = arith.constant 0 : i32
    %c0_i32_0 = arith.constant 0 : i32
    %c0_i32_1 = arith.constant 0 : i32
    return %c0_i32, %c0_i32_0 : i32, i32
  }
  func.func @transform_8(%arg0: i32) -> (i32, i32) {
    %c0_i32 = arith.constant 0 : i32
    %c0_i32_0 = arith.constant 0 : i32
    %c0_i32_1 = arith.constant 0 : i32
    return %c0_i32, %c0_i32_0 : i32, i32
  }
  func.func @transform_9(%arg0: i32) -> (i32, i32) {
    %c0_i32 = arith.constant 0 : i32
    %c0_i32_0 = arith.constant 0 : i32
    %c0_i32_1 = arith.constant 0 : i32
    return %c0_i32, %c0_i32_0 : i32, i32
  }
  func.func @transform_10(%arg0: i32) -> (i32, i32) {
    %c0_i32 = arith.constant 0 : i32
    %c0_i32_0 = arith.constant 0 : i32
    %c0_i32_1 = arith.constant 0 : i32
    return %c0_i32, %c0_i32_0 : i32, i32
  }
  func.func @transform_11(%arg0: i32) -> (i32, i32) {
    %c0_i32 = arith.constant 0 : i32
    %c0_i32_0 = arith.constant 0 : i32
    %c0_i32_1 = arith.constant 0 : i32
    return %c0_i32, %c0_i32_0 : i32, i32
  }
  func.func @transform_12(%arg0: i32) -> (i32, i32) {
    %c0_i32 = arith.constant 0 : i32
    %c0_i32_0 = arith.constant 0 : i32
    %c0_i32_1 = arith.constant 0 : i32
    return %c0_i32, %c0_i32_0 : i32, i32
  }
  func.func @transform_13(%arg0: i32) -> (i32, i32) {
    %c0_i32 = arith.constant 0 : i32
    %c0_i32_0 = arith.constant 0 : i32
    %c0_i32_1 = arith.constant 0 : i32
    return %c0_i32, %c0_i32_0 : i32, i32
  }
  func.func @transform_14(%arg0: i32) -> (i32, i32) {
    %c0_i32 = arith.constant 0 : i32
    %c0_i32_0 = arith.constant 0 : i32
    %c0_i32_1 = arith.constant 0 : i32
    return %c0_i32, %c0_i32_0 : i32, i32
  }
  func.func @transform_15(%arg0: i32) -> (i32, i32) {
    %c0_i32 = arith.constant 0 : i32
    %c0_i32_0 = arith.constant 0 : i32
    %c0_i32_1 = arith.constant 0 : i32
    return %c0_i32, %c0_i32_0 : i32, i32
  }
  func.func @transform_16(%arg0: i32) -> (i32, i32) {
    %c0_i32 = arith.constant 0 : i32
    %c0_i32_0 = arith.constant 0 : i32
    %c0_i32_1 = arith.constant 0 : i32
    return %c0_i32, %c0_i32_0 : i32, i32
  }
  func.func @transform_17(%arg0: i32) -> (i32, i32) {
    %c0_i32 = arith.constant 0 : i32
    %c0_i32_0 = arith.constant 0 : i32
    %c0_i32_1 = arith.constant 0 : i32
    return %c0_i32, %c0_i32_0 : i32, i32
  }
  func.func @transform_18(%arg0: i32) -> (i32, i32) {
    %c0_i32 = arith.constant 0 : i32
    %c0_i32_0 = arith.constant 0 : i32
    %c0_i32_1 = arith.constant 0 : i32
    return %c0_i32, %c0_i32_0 : i32, i32
  }
  func.func @transform_19(%arg0: i32) -> (i32, i32) {
    %c0_i32 = arith.constant 0 : i32
    %c0_i32_0 = arith.constant 0 : i32
    %c0_i32_1 = arith.constant 0 : i32
    return %c0_i32, %c0_i32_0 : i32, i32
  }
  func.func @transform_20(%arg0: i32) -> (i32, i32) {
    %c0_i32 = arith.constant 0 : i32
    %c0_i32_0 = arith.constant 0 : i32
    return %arg0, %c0_i32 : i32, i32
  }
}

</mosaic_0001>

<bundles_post_ra>
// kernel: tpu_custom_call.1
= control target key start
LH: loop header
LB: loop body
LE: loop exit
PB: predicated region body
PF: predicated region fallthrough
CT: control target
= control target key end

     0   :  { %s7741_s0 = inlined_call_operand.hbm [shape: f32[8,768], index: 0, kind: input, shape index: {}]   ;;  %s7742_s1 = inlined_call_operand.hbm [shape: f32[1,128], index: 1, kind: input, shape index: {}]   ;;  %s7743_s2 = inlined_call_operand.hbm [shape: bf16[768,512], index: 2, kind: input, shape index: {}]   ;;  %s7744_s3 = inlined_call_operand.hbm [shape: f32[1,512], index: 3, kind: input, shape index: {}]   ;;  %s7745_s4 = inlined_call_operand.hbm [shape: f32[8,512], index: 4, kind: input, shape index: {}]   ;;  %s7746_s5 = inlined_call_operand.hbm [shape: f32[512,8], index: 5, kind: input, shape index: {}]   ;;  %s7747_s6 = inlined_call_operand.hbm [shape: bf16[512,256], index: 6, kind: input, shape index: {}]   ;;  %s7748_s7 = inlined_call_operand.hbm [shape: f32[1,256], index: 7, kind: input, shape index: {}]   ;;  %s7749_s8 = inlined_call_operand.hbm [shape: f32[16,256], index: 8, kind: input, shape index: {}]   ;;  %s7750_s9 = inlined_call_operand.hbm [shape: f32[256,16], index: 9, kind: input, shape index: {}]   ;;  %s7751_s10 = inlined_call_operand.hbm [shape: bf16[256,128], index: 10, kind: input, shape index: {}]   ;;  %s7752_s11 = inlined_call_operand.hbm [shape: bf16[768,128], index: 11, kind: input, shape index: {}]   ;;  %s7753_s12 = inlined_call_operand.hbm [shape: f32[1,128], index: 12, kind: input, shape index: {}]   ;;  %s7754_s13 = inlined_call_operand.hbm [shape: f32[8,128], index: 13, kind: input, shape index: {}]   ;;  %s7755_s14 = inlined_call_operand.hbm [shape: f32[128,8], index: 14, kind: input, shape index: {}]   ;;  %s7756_s15 = inlined_call_operand.hbm [shape: bf16[128,64], index: 15, kind: input, shape index: {}]   ;;  %s7757_s16 = inlined_call_operand.hbm [shape: f32[1,64], index: 16, kind: input, shape index: {}]   ;;  %s7758_s17 = inlined_call_operand.hbm [shape: f32[16,64], index: 17, kind: input, shape index: {}]   ;;  %s7759_s18 = inlined_call_operand.hbm [shape: f32[64,16], index: 18, kind: input, shape index: {}]   ;;  %s7760_s19 = inlined_call_operand.hbm [shape: bf16[64,128], index: 19, kind: input, shape index: {}]   ;;  %s7761_s20 = inlined_call_operand.hbm [shape: f32[8,128], index: 20, kind: output, shape index: {}]  }
   0x1   :  { %7768 = sst [smem:[#allocation47_spill]] %s7741_s0 }
   0x2   :  { %7769 = sst [smem:[#allocation48_spill]] %s7742_s1 }
   0x3   :  { %7770 = sst [smem:[#allocation49_spill]] %s7743_s2 }
   0x4   :  { %7771 = sst [smem:[#allocation50_spill]] %s7744_s3 }
   0x5   :  { %7772 = sst [smem:[#allocation51_spill]] %s7745_s4 }
   0x6   :  { %7773 = sst [smem:[#allocation52_spill]] %s7761_s20 }
   0x7   :  { %25 = vsyncpa [#allocation3], 0 }
   0x8   :  { %26 = vsyncpa [#allocation6], 0 }
   0x9   :  { %27 = vsyncpa [#allocation9], 0 }
   0xa   :  { %28 = vsyncpa [#allocation12], 0 }
   0xb   :  { %29 = vsyncpa [#allocation15], 0 }
   0xc   :  { %30 = vsyncpa [#allocation18], 0 }
   0xd   :  { %31 = vsyncpa [#allocation21], 0 }
   0xe   :  { %32 = vsyncpa [#allocation24], 0 }
   0xf   :  { %33 = vsyncpa [#allocation27], 0 }
  0x10   :  { %34 = vsyncpa [#allocation30], 0 }
  0x11   :  { %35 = vsyncpa [#allocation33], 0 }
  0x12   :  { %36 = vsyncpa [#allocation4], 0  ;;  %s6947_s1 = smov [#allocation5]   ;;  %s6948_s23 = smov [#allocation8]  }
  0x13   :  { %s53_s22 = sshll.u32 %s6947_s1, 4  ;;  %s75_s24 = sshll.u32 %s6948_s23, 4  ;;  %s54_s22 = int_to_ptr.vmem [resolvable:$true] %s53_s22  ;;  %s76_s24 = int_to_ptr.vmem [resolvable:$true] %s75_s24 }
  0x14   :  { %s7774_s3 = sld [smem:[#allocation48_spill]] }
  0x1a   :  { %s6461_s26 = scalar_lea.hbm %s7774_s3, 16 }
  0x1b   :  { %p6462_p0 = scmp.ne.s32.totalorder %s7774_s3, %s6461_s26  ;;  %p6465_p1 = scmp.lt.u32.totalorder %s6461_s26, %s7774_s3 }
  0x1d   :  { %p6467_p2 = pnand %p6465_p1, %p6462_p0 }
  0x1f   :  { %6470 = shalt.err (!%p6467_p2)
}
  0x20   :  { %s6471_s30 = scalar_lea.vmem %s54_s22, 16  ;;  %s6475_s0 = scalar_lea.vmem %s54_s22, 32 }
  0x21   :  { %p6472_p3 = scmp.ne.s32.totalorder %s54_s22, %s6471_s30  ;;  %p6476_p4 = scmp.lt.s32.totalorder %s54_s22, %s54_s22 }
  0x22   :  { %p6477_p5 = scmp.lt.s32.totalorder %s6475_s0, %s6471_s30 }
  0x24   :  { %p6478_p6 = por %p6477_p5, %p6476_p4 }
  0x26   :  { %p6479_p7 = pnand %p6478_p6, %p6472_p3 }
  0x28   :  { %6482 = shalt.err (!%p6479_p7)
}
  0x29   :  { %56 = dma.hbm_to_vmem [thread:$0]  %s7774_s3, 16, %s54_s22, [#allocation6]  }
  0x2a   :  { %s7775_s25 = sld [smem:[#allocation50_spill]] }
  0x30   :  { %s6483_s27 = scalar_lea.hbm %s7775_s25, 64 }
  0x31   :  { %p6484_p8 = scmp.ne.s32.totalorder %s7775_s25, %s6483_s27  ;;  %p6487_p9 = scmp.lt.u32.totalorder %s6483_s27, %s7775_s25 }
  0x33   :  { %p6489_p10 = pnand %p6487_p9, %p6484_p8 }
  0x35   :  { %6492 = shalt.err (!%p6489_p10)
}
  0x36   :  { %s6493_s30 = scalar_lea.vmem %s76_s24, 64  ;;  %p6498_p12 = scmp.lt.s32.totalorder %s76_s24, %s76_s24 }
  0x37   :  { %p6494_p11 = scmp.ne.s32.totalorder %s76_s24, %s6493_s30  ;;  %p6499_p13 = scmp.lt.s32.totalorder %s6493_s30, %s6493_s30 }
  0x39   :  { %p6500_p0 = por %p6499_p13, %p6498_p12 }
  0x3b   :  { %p6501_p1 = pnand %p6500_p0, %p6494_p11 }
  0x3d   :  { %6504 = shalt.err (!%p6501_p1)
}
  0x3e   :  { %78 = dma.hbm_to_vmem [thread:$0]  %s7775_s25, 64, %s76_s24, [#allocation9]  }
  0x3f   :  { %s6949_s0 = smov [#allocation11]   ;;  %s6505_s2 = scalar_lea.hbm %s7746_s5, 8192 }
  0x40   :  { %s94_s21 = sshll.u32 %s6949_s0, 4  ;;  %p6506_p2 = scmp.ne.s32.totalorder %s7746_s5, %s6505_s2  ;;  %s95_s21 = int_to_ptr.vmem [resolvable:$true] %s94_s21 }
  0x41   :  { %p6509_p3 = scmp.lt.u32.totalorder %s6505_s2, %s7746_s5 }
  0x43   :  { %p6511_p4 = pnand %p6509_p3, %p6506_p2 }
  0x45   :  { %6514 = shalt.err (!%p6511_p4)
}
  0x46   :  { %s6515_s29 = scalar_lea.vmem %s95_s21, 8192  ;;  %p6520_p6 = scmp.lt.s32.totalorder %s95_s21, %s95_s21 }
  0x47   :  { %p6516_p5 = scmp.ne.s32.totalorder %s95_s21, %s6515_s29  ;;  %p6521_p7 = scmp.lt.s32.totalorder %s6515_s29, %s6515_s29 }
  0x49   :  { %p6522_p8 = por %p6521_p7, %p6520_p6 }
  0x4b   :  { %p6523_p9 = pnand %p6522_p8, %p6516_p5 }
  0x4d   :  { %6526 = shalt.err (!%p6523_p9)
}
  0x4e   :  { %s6950_s24 = smov 128   ;;  %s6951_s25 = smov 8  }
  0x4f   :  { %100 = dma.hbm_to_vmem [thread:$0]  %s7746_s5, 8192, %s95_s21, [#allocation12], %s6950_s24, %s6950_s24, %s6951_s25  }
  0x50   :  { %s6952_s3 = smov [#allocation14]   ;;  %s6953_s1 = smov [#allocation17]  }
  0x51   :  { %s119_s0 = sshll.u32 %s6952_s3, 4  ;;  %s140_s23 = sshll.u32 %s6953_s1, 4  ;;  %s120_s0 = int_to_ptr.vmem [resolvable:$true] %s119_s0  ;;  %s141_s23 = int_to_ptr.vmem [resolvable:$true] %s140_s23 }
  0x52   :  { %s6527_s28 = scalar_lea.hbm %s7748_s7, 32 }
  0x53   :  { %p6528_p10 = scmp.ne.s32.totalorder %s7748_s7, %s6527_s28  ;;  %p6531_p11 = scmp.lt.u32.totalorder %s6527_s28, %s7748_s7 }
  0x55   :  { %p6533_p12 = pnand %p6531_p11, %p6528_p10 }
  0x57   :  { %6536 = shalt.err (!%p6533_p12)
}
  0x58   :  { %s6537_s5 = scalar_lea.vmem %s120_s0, 32  ;;  %p6542_p0 = scmp.lt.s32.totalorder %s120_s0, %s120_s0 }
  0x59   :  { %p6538_p13 = scmp.ne.s32.totalorder %s120_s0, %s6537_s5  ;;  %p6543_p1 = scmp.lt.s32.totalorder %s6537_s5, %s6537_s5 }
  0x5b   :  { %p6544_p2 = por %p6543_p1, %p6542_p0 }
  0x5d   :  { %p6545_p3 = pnand %p6544_p2, %p6538_p13 }
  0x5f   :  { %6548 = shalt.err (!%p6545_p3)
}
  0x60   :  { %122 = dma.hbm_to_vmem [thread:$0]  %s7748_s7, 32, %s120_s0, [#allocation15]  }
  0x61   :  { %s6549_s1 = scalar_lea.hbm %s7750_s9, 4096 }
  0x62   :  { %p6550_p4 = scmp.ne.s32.totalorder %s7750_s9, %s6549_s1  ;;  %p6553_p5 = scmp.lt.u32.totalorder %s6549_s1, %s7750_s9 }
  0x64   :  { %p6555_p6 = pnand %p6553_p5, %p6550_p4 }
  0x66   :  { %6558 = shalt.err (!%p6555_p6)
}
  0x67   :  { %s6559_s26 = scalar_lea.vmem %s141_s23, 4096  ;;  %p6564_p8 = scmp.lt.s32.totalorder %s141_s23, %s141_s23 }
  0x68   :  { %p6560_p7 = scmp.ne.s32.totalorder %s141_s23, %s6559_s26  ;;  %p6565_p9 = scmp.lt.s32.totalorder %s6559_s26, %s6559_s26 }
  0x6a   :  { %p6566_p10 = por %p6565_p9, %p6564_p8 }
  0x6c   :  { %p6567_p11 = pnand %p6566_p10, %p6560_p7 }
  0x6e   :  { %6570 = shalt.err (!%p6567_p11)
}
  0x6f   :  { %146 = dma.hbm_to_vmem [thread:$0]  %s7750_s9, 4096, %s141_s23, [#allocation18], %s6950_s24, %s6950_s24, %s6951_s25  }
  0x70   :  { %s6954_s4 = smov [#allocation20]   ;;  %s6955_s5 = smov [#allocation23]  }
  0x71   :  { %s164_s29 = sshll.u32 %s6954_s4, 4  ;;  %s187_s21 = sshll.u32 %s6955_s5, 4  ;;  %s165_s29 = int_to_ptr.vmem [resolvable:$true] %s164_s29  ;;  %s188_s21 = int_to_ptr.vmem [resolvable:$true] %s187_s21 }
  0x72   :  { %s6571_s3 = scalar_lea.hbm %s7752_s11, 6144 }
  0x73   :  { %p6572_p12 = scmp.ne.s32.totalorder %s7752_s11, %s6571_s3  ;;  %p6575_p13 = scmp.lt.u32.totalorder %s6571_s3, %s7752_s11 }
  0x75   :  { %p6577_p0 = pnand %p6575_p13, %p6572_p12 }
  0x77   :  { %6580 = shalt.err (!%p6577_p0)
}
  0x78   :  { %s6581_s9 = scalar_lea.vmem %s165_s29, 6144  ;;  %p6586_p2 = scmp.lt.s32.totalorder %s165_s29, %s165_s29 }
  0x79   :  { %p6582_p1 = scmp.ne.s32.totalorder %s165_s29, %s6581_s9  ;;  %p6587_p3 = scmp.lt.s32.totalorder %s6581_s9, %s6581_s9 }
  0x7b   :  { %p6588_p4 = por %p6587_p3, %p6586_p2 }
  0x7d   :  { %p6589_p5 = pnand %p6588_p4, %p6582_p1 }
  0x7f   :  { %6592 = shalt.err (!%p6589_p5)
}
  0x80   :  { %s6956_s23 = smov 64   ;;  %s6957_s28 = smov 4  }
  0x81   :  { %170 = dma.hbm_to_vmem [thread:$0]  %s7752_s11, 6144, %s165_s29, [#allocation21], %s6956_s23, %s6956_s23, %s6957_s28  }
  0x82   :  { %s6593_s5 = scalar_lea.hbm %s7754_s13, 128 }
  0x83   :  { %p6594_p6 = scmp.ne.s32.totalorder %s7754_s13, %s6593_s5  ;;  %p6597_p7 = scmp.lt.u32.totalorder %s6593_s5, %s7754_s13 }
  0x85   :  { %p6599_p8 = pnand %p6597_p7, %p6594_p6 }
  0x87   :  { %6602 = shalt.err (!%p6599_p8)
}
  0x88   :  { %s6603_s20 = scalar_lea.vmem %s188_s21, 128  ;;  %p6608_p10 = scmp.lt.s32.totalorder %s188_s21, %s188_s21 }
  0x89   :  { %p6604_p9 = scmp.ne.s32.totalorder %s188_s21, %s6603_s20  ;;  %p6609_p11 = scmp.lt.s32.totalorder %s6603_s20, %s6603_s20 }
  0x8b   :  { %p6610_p12 = por %p6609_p11, %p6608_p10 }
  0x8d   :  { %p6611_p13 = pnand %p6610_p12, %p6604_p9 }
  0x8f   :  { %6614 = shalt.err (!%p6611_p13)
}
  0x90   :  { %190 = dma.hbm_to_vmem [thread:$0]  %s7754_s13, 128, %s188_s21, [#allocation24]  }
  0x91   :  { %s6958_s2 = smov [#allocation26]   ;;  %s6959_s9 = smov [#allocation29]  }
  0x92   :  { %s208_s27 = sshll.u32 %s6958_s2, 4  ;;  %s230_s26 = sshll.u32 %s6959_s9, 4  ;;  %s209_s27 = int_to_ptr.vmem [resolvable:$true] %s208_s27  ;;  %s231_s26 = int_to_ptr.vmem [resolvable:$true] %s230_s26 }
  0x93   :  { %s6615_s4 = scalar_lea.hbm %s7756_s15, 1024 }
  0x94   :  { %p6616_p0 = scmp.ne.s32.totalorder %s7756_s15, %s6615_s4  ;;  %p6619_p1 = scmp.lt.u32.totalorder %s6615_s4, %s7756_s15 }
  0x96   :  { %p6621_p2 = pnand %p6619_p1, %p6616_p0 }
  0x98   :  { %6624 = shalt.err (!%p6621_p2)
}
  0x99   :  { %s6625_s13 = scalar_lea.vmem %s209_s27, 1024  ;;  %p6630_p4 = scmp.lt.s32.totalorder %s209_s27, %s209_s27 }
  0x9a   :  { %p6626_p3 = scmp.ne.s32.totalorder %s209_s27, %s6625_s13  ;;  %p6631_p5 = scmp.lt.s32.totalorder %s6625_s13, %s6625_s13 }
  0x9c   :  { %p6632_p6 = por %p6631_p5, %p6630_p4 }
  0x9e   :  { %p6633_p7 = pnand %p6632_p6, %p6626_p3 }
  0xa0   :  { %6636 = shalt.err (!%p6633_p7)
}
  0xa1   :  { %214 = dma.hbm_to_vmem [thread:$0]  %s7756_s15, 1024, %s209_s27, [#allocation27], %s6956_s23, %s6956_s23, %s6957_s28  }
  0xa2   :  { %s6637_s29 = scalar_lea.hbm %s7758_s17, 256 }
  0xa3   :  { %p6638_p8 = scmp.ne.s32.totalorder %s7758_s17, %s6637_s29  ;;  %p6641_p9 = scmp.lt.u32.totalorder %s6637_s29, %s7758_s17 }
  0xa5   :  { %p6643_p10 = pnand %p6641_p9, %p6638_p8 }
  0xa7   :  { %6646 = shalt.err (!%p6643_p10)
}
  0xa8   :  { %s6647_s4 = scalar_lea.vmem %s231_s26, 256  ;;  %p6652_p12 = scmp.lt.s32.totalorder %s231_s26, %s231_s26 }
  0xa9   :  { %p6648_p11 = scmp.ne.s32.totalorder %s231_s26, %s6647_s4  ;;  %p6653_p13 = scmp.lt.s32.totalorder %s6647_s4, %s6647_s4 }
  0xab   :  { %p6654_p0 = por %p6653_p13, %p6652_p12 }
  0xad   :  { %p6655_p1 = pnand %p6654_p0, %p6648_p11 }
  0xaf   :  { %6658 = shalt.err (!%p6655_p1)
}
  0xb0   :  { %236 = dma.hbm_to_vmem [thread:$0]  %s7758_s17, 256, %s231_s26, [#allocation30], %s6950_s24, %s6950_s24, %s6951_s25  }
  0xb1   :  { %s6960_s5 = smov [#allocation2]   ;;  %s6961_s22 = smov [#allocation7]  }
  0xb2   :  { %s43_s30 = sshll.u32 %s6960_s5, 4  ;;  %s62_s3 = sshll.u32 %s6961_s22, 4  ;;  %s44_s30 = int_to_ptr.vmem [resolvable:$true] %s43_s30  ;;  %s63_s3 = int_to_ptr.vmem [resolvable:$true] %s62_s3 }
  0xb3   :  { %s7776_s1 = sld [smem:[#allocation47_spill]] }
  0xb9   :  { %s6659_s20 = scalar_lea.hbm %s7776_s1, 768 }
  0xba   :  { %p6660_p2 = scmp.ne.s32.totalorder %s7776_s1, %s6659_s20  ;;  %p6663_p3 = scmp.lt.u32.totalorder %s6659_s20, %s7776_s1 }
  0xbc   :  { %p6665_p4 = pnand %p6663_p3, %p6660_p2 }
  0xbe   :  { %6668 = shalt.err (!%p6665_p4)
}
  0xbf   :  { %s6669_s17 = scalar_lea.vmem %s44_s30, 768  ;;  %p6674_p6 = scmp.lt.s32.totalorder %s44_s30, %s44_s30 }
  0xc0   :  { %p6670_p5 = scmp.ne.s32.totalorder %s44_s30, %s6669_s17  ;;  %p6675_p7 = scmp.lt.s32.totalorder %s6669_s17, %s6669_s17 }
  0xc2   :  { %p6676_p8 = por %p6675_p7, %p6674_p6 }
  0xc4   :  { %p6677_p9 = pnand %p6676_p8, %p6670_p5 }
  0xc6   :  { %6680 = shalt.err (!%p6677_p9)
}
  0xc7   :  { %46 = dma.hbm_to_vmem [thread:$0]  %s7776_s1, 768, %s44_s30, [#allocation3]  }
  0xc8   :  { %s7777_s15 = sld [smem:[#allocation49_spill]] }
  0xce   :  { %s6681_s27 = scalar_lea.hbm %s7777_s15, 24576 }
  0xcf   :  { %p6682_p10 = scmp.ne.s32.totalorder %s7777_s15, %s6681_s27  ;;  %p6685_p11 = scmp.lt.u32.totalorder %s6681_s27, %s7777_s15 }
  0xd1   :  { %p6687_p12 = pnand %p6685_p11, %p6682_p10 }
  0xd3   :  { %6690 = shalt.err (!%p6687_p12)
}
  0xd4   :  { %s6691_s20 = scalar_lea.vmem %s63_s3, 24576  ;;  %p6696_p0 = scmp.lt.s32.totalorder %s63_s3, %s63_s3 }
  0xd5   :  { %p6692_p13 = scmp.ne.s32.totalorder %s63_s3, %s6691_s20  ;;  %p6697_p1 = scmp.lt.s32.totalorder %s6691_s20, %s6691_s20 }
  0xd7   :  { %p6698_p2 = por %p6697_p1, %p6696_p0 }
  0xd9   :  { %p6699_p3 = pnand %p6698_p2, %p6692_p13 }
  0xdb   :  { %6702 = shalt.err (!%p6699_p3)
}
  0xdc   :  { %s6962_s30 = smov 256   ;;  %s6963_s1 = smov 16  }
  0xdd   :  { %68 = dma.hbm_to_vmem [thread:$0]  %s7777_s15, 24576, %s63_s3, [#allocation6], %s6962_s30, %s6962_s30, %s6963_s1  }
  0xde   :  { %s6964_s2 = smov [#allocation10]   ;;  %s6965_s17 = smov [#allocation13]  }
  0xdf   :  { %s85_s9 = sshll.u32 %s6964_s2, 4  ;;  %s106_s26 = sshll.u32 %s6965_s17, 4  ;;  %s86_s9 = int_to_ptr.vmem [resolvable:$true] %s85_s9  ;;  %s107_s26 = int_to_ptr.vmem [resolvable:$true] %s106_s26 }
  0xe0   :  { %s7778_s4 = sld [smem:[#allocation51_spill]] }
  0xe6   :  { %s6703_s27 = scalar_lea.hbm %s7778_s4, 512 }
  0xe7   :  { %p6704_p4 = scmp.ne.s32.totalorder %s7778_s4, %s6703_s27  ;;  %p6707_p5 = scmp.lt.u32.totalorder %s6703_s27, %s7778_s4 }
  0xe9   :  { %p6709_p6 = pnand %p6707_p5, %p6704_p4 }
  0xeb   :  { %6712 = shalt.err (!%p6709_p6)
}
  0xec   :  { %s6713_s3 = scalar_lea.vmem %s86_s9, 512  ;;  %p6718_p8 = scmp.lt.s32.totalorder %s86_s9, %s86_s9 }
  0xed   :  { %p6714_p7 = scmp.ne.s32.totalorder %s86_s9, %s6713_s3  ;;  %p6719_p9 = scmp.lt.s32.totalorder %s6713_s3, %s6713_s3 }
  0xef   :  { %p6720_p10 = por %p6719_p9, %p6718_p8 }
  0xf1   :  { %p6721_p11 = pnand %p6720_p10, %p6714_p7 }
  0xf3   :  { %6724 = shalt.err (!%p6721_p11)
}
  0xf4   :  { %88 = dma.hbm_to_vmem [thread:$0]  %s7778_s4, 512, %s86_s9, [#allocation9]  }
  0xf5   :  { %s6725_s2 = scalar_lea.hbm %s7747_s6, 8192 }
  0xf6   :  { %p6726_p12 = scmp.ne.s32.totalorder %s7747_s6, %s6725_s2  ;;  %p6729_p13 = scmp.lt.u32.totalorder %s6725_s2, %s7747_s6 }
  0xf8   :  { %p6731_p0 = pnand %p6729_p13, %p6726_p12 }
  0xfa   :  { %6734 = shalt.err (!%p6731_p0)
}
  0xfb   :  { %s6735_s5 = scalar_lea.vmem %s107_s26, 8192  ;;  %p6740_p2 = scmp.lt.s32.totalorder %s107_s26, %s107_s26 }
  0xfc   :  { %p6736_p1 = scmp.ne.s32.totalorder %s107_s26, %s6735_s5  ;;  %p6741_p3 = scmp.lt.s32.totalorder %s6735_s5, %s6735_s5 }
  0xfe   :  { %p6742_p4 = por %p6741_p3, %p6740_p2 }
 0x100   :  { %p6743_p5 = pnand %p6742_p4, %p6736_p1 }
 0x102   :  { %6746 = shalt.err (!%p6743_p5)
}
 0x103   :  { %112 = dma.hbm_to_vmem [thread:$0]  %s7747_s6, 8192, %s107_s26, [#allocation12], %s6950_s24, %s6950_s24, %s6951_s25  }
 0x104   :  { %s6966_s22 = smov [#allocation16]   ;;  %s6967_s21 = smov [#allocation19]  }
 0x105   :  { %s128_s13 = sshll.u32 %s6966_s22, 4  ;;  %s152_s3 = sshll.u32 %s6967_s21, 4  ;;  %s129_s13 = int_to_ptr.vmem [resolvable:$true] %s128_s13  ;;  %s153_s3 = int_to_ptr.vmem [resolvable:$true] %s152_s3 }
 0x106   :  { %s6747_s11 = scalar_lea.hbm %s7749_s8, 512 }
 0x107   :  { %p6748_p6 = scmp.ne.s32.totalorder %s7749_s8, %s6747_s11  ;;  %p6751_p7 = scmp.lt.u32.totalorder %s6747_s11, %s7749_s8 }
 0x109   :  { %p6753_p8 = pnand %p6751_p7, %p6748_p6 }
 0x10b   :  { %6756 = shalt.err (!%p6753_p8)
}
 0x10c   :  { %s6757_s6 = scalar_lea.vmem %s129_s13, 512  ;;  %p6762_p10 = scmp.lt.s32.totalorder %s129_s13, %s129_s13 }
 0x10d   :  { %p6758_p9 = scmp.ne.s32.totalorder %s129_s13, %s6757_s6  ;;  %p6763_p11 = scmp.lt.s32.totalorder %s6757_s6, %s6757_s6 }
 0x10f   :  { %p6764_p12 = por %p6763_p11, %p6762_p10 }
 0x111   :  { %p6765_p13 = pnand %p6764_p12, %p6758_p9 }
 0x113   :  { %6768 = shalt.err (!%p6765_p13)
}
 0x114   :  { %134 = dma.hbm_to_vmem [thread:$0]  %s7749_s8, 512, %s129_s13, [#allocation15], %s6962_s30, %s6962_s30, %s6963_s1  }
 0x115   :  { %s6769_s9 = scalar_lea.hbm %s7751_s10, 2048 }
 0x116   :  { %p6770_p0 = scmp.ne.s32.totalorder %s7751_s10, %s6769_s9  ;;  %p6773_p1 = scmp.lt.u32.totalorder %s6769_s9, %s7751_s10 }
 0x118   :  { %p6775_p2 = pnand %p6773_p1, %p6770_p0 }
 0x11a   :  { %6778 = shalt.err (!%p6775_p2)
}
 0x11b   :  { %s6779_s20 = scalar_lea.vmem %s153_s3, 2048  ;;  %p6784_p4 = scmp.lt.s32.totalorder %s153_s3, %s153_s3 }
 0x11c   :  { %p6780_p3 = scmp.ne.s32.totalorder %s153_s3, %s6779_s20  ;;  %p6785_p5 = scmp.lt.s32.totalorder %s6779_s20, %s6779_s20 }
 0x11e   :  { %p6786_p6 = por %p6785_p5, %p6784_p4 }
 0x120   :  { %p6787_p7 = pnand %p6786_p6, %p6780_p3 }
 0x122   :  { %6790 = shalt.err (!%p6787_p7)
}
 0x123   :  { %158 = dma.hbm_to_vmem [thread:$0]  %s7751_s10, 2048, %s153_s3, [#allocation18], %s6956_s23, %s6956_s23, %s6957_s28  }
 0x124   :  { %s6968_s1 = smov [#allocation22]   ;;  %s6969_s11 = smov [#allocation25]  }
 0x125   :  { %s177_s13 = sshll.u32 %s6968_s1, 4  ;;  %s196_s29 = sshll.u32 %s6969_s11, 4  ;;  %s178_s13 = int_to_ptr.vmem [resolvable:$true] %s177_s13  ;;  %s197_s29 = int_to_ptr.vmem [resolvable:$true] %s196_s29 }
 0x126   :  { %s6791_s7 = scalar_lea.hbm %s7753_s12, 16 }
 0x127   :  { %p6792_p8 = scmp.ne.s32.totalorder %s7753_s12, %s6791_s7  ;;  %p6795_p9 = scmp.lt.u32.totalorder %s6791_s7, %s7753_s12 }
 0x129   :  { %p6797_p10 = pnand %p6795_p9, %p6792_p8 }
 0x12b   :  { %6800 = shalt.err (!%p6797_p10)
}
 0x12c   :  { %s6801_s10 = scalar_lea.vmem %s178_s13, 16  ;;  %s6805_s3 = scalar_lea.vmem %s178_s13, 32 }
 0x12d   :  { %p6802_p11 = scmp.ne.s32.totalorder %s178_s13, %s6801_s10  ;;  %p6806_p12 = scmp.lt.s32.totalorder %s178_s13, %s178_s13 }
 0x12e   :  { %p6807_p13 = scmp.lt.s32.totalorder %s6805_s3, %s6801_s10 }
 0x130   :  { %p6808_p0 = por %p6807_p13, %p6806_p12 }
 0x132   :  { %p6809_p1 = pnand %p6808_p0, %p6802_p11 }
 0x134   :  { %6812 = shalt.err (!%p6809_p1)
}
 0x135   :  { %180 = dma.hbm_to_vmem [thread:$0]  %s7753_s12, 16, %s178_s13, [#allocation21]  }
 0x136   :  { %s6813_s21 = scalar_lea.hbm %s7755_s14, 2048 }
 0x137   :  { %p6814_p2 = scmp.ne.s32.totalorder %s7755_s14, %s6813_s21  ;;  %p6817_p3 = scmp.lt.u32.totalorder %s6813_s21, %s7755_s14 }
 0x139   :  { %p6819_p4 = pnand %p6817_p3, %p6814_p2 }
 0x13b   :  { %6822 = shalt.err (!%p6819_p4)
}
 0x13c   :  { %s6823_s1 = scalar_lea.vmem %s197_s29, 2048  ;;  %p6828_p6 = scmp.lt.s32.totalorder %s197_s29, %s197_s29 }
 0x13d   :  { %p6824_p5 = scmp.ne.s32.totalorder %s197_s29, %s6823_s1  ;;  %p6829_p7 = scmp.lt.s32.totalorder %s6823_s1, %s6823_s1 }
 0x13f   :  { %p6830_p8 = por %p6829_p7, %p6828_p6 }
 0x141   :  { %p6831_p9 = pnand %p6830_p8, %p6824_p5 }
 0x143   :  { %6834 = shalt.err (!%p6831_p9)
}
 0x144   :  { %202 = dma.hbm_to_vmem [thread:$0]  %s7755_s14, 2048, %s197_s29, [#allocation24], %s6950_s24, %s6950_s24, %s6951_s25  }
 0x145   :  { %s6970_s11 = smov [#allocation28]   ;;  %s6971_s17 = smov [#allocation31]  }
 0x146   :  { %s221_s2 = sshll.u32 %s6970_s11, 4  ;;  %s242_s7 = sshll.u32 %s6971_s17, 4  ;;  %s222_s2 = int_to_ptr.vmem [resolvable:$true] %s221_s2  ;;  %s243_s7 = int_to_ptr.vmem [resolvable:$true] %s242_s7 }
 0x147   :  { %s6835_s0 = scalar_lea.hbm %s7757_s16, 16 }
 0x148   :  { %p6836_p10 = scmp.ne.s32.totalorder %s7757_s16, %s6835_s0  ;;  %p6839_p11 = scmp.lt.u32.totalorder %s6835_s0, %s7757_s16 }
 0x14a   :  { %p6841_p12 = pnand %p6839_p11, %p6836_p10 }
 0x14c   :  { %6844 = shalt.err (!%p6841_p12)
}
 0x14d   :  { %s6845_s14 = scalar_lea.vmem %s222_s2, 16  ;;  %s6849_s29 = scalar_lea.vmem %s222_s2, 32 }
 0x14e   :  { %p6846_p13 = scmp.ne.s32.totalorder %s222_s2, %s6845_s14  ;;  %p6850_p0 = scmp.lt.s32.totalorder %s222_s2, %s222_s2 }
 0x14f   :  { %p6851_p1 = scmp.lt.s32.totalorder %s6849_s29, %s6845_s14 }
 0x151   :  { %p6852_p2 = por %p6851_p1, %p6850_p0 }
 0x153   :  { %p6853_p3 = pnand %p6852_p2, %p6846_p13 }
 0x155   :  { %6856 = shalt.err (!%p6853_p3)
}
 0x156   :  { %224 = dma.hbm_to_vmem [thread:$0]  %s7757_s16, 16, %s222_s2, [#allocation27]  }
 0x157   :  { %s6857_s15 = scalar_lea.hbm %s7759_s18, 1024 }
 0x158   :  { %p6858_p4 = scmp.ne.s32.totalorder %s7759_s18, %s6857_s15  ;;  %p6861_p5 = scmp.lt.u32.totalorder %s6857_s15, %s7759_s18 }
 0x15a   :  { %p6863_p6 = pnand %p6861_p5, %p6858_p4 }
 0x15c   :  { %6866 = shalt.err (!%p6863_p6)
}
 0x15d   :  { %s6867_s12 = scalar_lea.vmem %s243_s7, 1024  ;;  %p6872_p8 = scmp.lt.s32.totalorder %s243_s7, %s243_s7 }
 0x15e   :  { %p6868_p7 = scmp.ne.s32.totalorder %s243_s7, %s6867_s12  ;;  %p6873_p9 = scmp.lt.s32.totalorder %s6867_s12, %s6867_s12 }
 0x160   :  { %p6874_p10 = por %p6873_p9, %p6872_p8 }
 0x162   :  { %p6875_p11 = pnand %p6874_p10, %p6868_p7 }
 0x164   :  { %6878 = shalt.err (!%p6875_p11)
}
 0x165   :  { %248 = dma.hbm_to_vmem [thread:$0]  %s7759_s18, 1024, %s243_s7, [#allocation30], %s6950_s24, %s6950_s24, %s6951_s25  }
 0x166   :  { %s6972_s11 = smov [#allocation32]   ;;  %s6879_s26 = scalar_lea.hbm %s7760_s19, 512 }
 0x167   :  { %s254_s2 = sshll.u32 %s6972_s11, 4  ;;  %p6880_p12 = scmp.ne.s32.totalorder %s7760_s19, %s6879_s26  ;;  %s255_s2 = int_to_ptr.vmem [resolvable:$true] %s254_s2 }
 0x168   :  { %p6883_p13 = scmp.lt.u32.totalorder %s6879_s26, %s7760_s19 }
 0x16a   :  { %p6885_p0 = pnand %p6883_p13, %p6880_p12 }
 0x16c   :  { %6888 = shalt.err (!%p6885_p0)
}
 0x16d   :  { %s6889_s5 = scalar_lea.vmem %s255_s2, 512  ;;  %p6894_p2 = scmp.lt.s32.totalorder %s255_s2, %s255_s2 }
 0x16e   :  { %p6890_p1 = scmp.ne.s32.totalorder %s255_s2, %s6889_s5  ;;  %p6895_p3 = scmp.lt.s32.totalorder %s6889_s5, %s6889_s5 }
 0x170   :  { %p6896_p4 = por %p6895_p3, %p6894_p2 }
 0x172   :  { %p6897_p5 = pnand %p6896_p4, %p6890_p1 }
 0x174   :  { %6900 = shalt.err (!%p6897_p5)
}
 0x175   :  { %260 = dma.hbm_to_vmem [thread:$0]  %s7760_s19, 512, %s255_s2, [#allocation33], %s6956_s23, %s6956_s23, %s6957_s28  }
 0x176   :  { %6923 = dma.done.wait [#allocation3], 768  }
 0x177   :  { %6924 = vsyncadd [#allocation3], 4294966528 }
 0x178   :  { %6925 = dma.done.wait [#allocation6], 24592  }
 0x179   :  { %6926 = vsyncadd [#allocation6], 4294942704 }
 0x17a   :  { %6927 = dma.done.wait [#allocation9], 576  }
 0x17b   :  { %6928 = vsyncadd [#allocation9], 4294966720 }
 0x17c   :  { %6929 = dma.done.wait [#allocation12], 16384  }
 0x17d   :  { %6930 = vsyncadd [#allocation12], 4294950912 }
 0x17e   :  { %6931 = dma.done.wait [#allocation15], 544  }
 0x17f   :  { %6932 = vsyncadd [#allocation15], 4294966752 }
 0x180   :  { %6933 = dma.done.wait [#allocation18], 6144  }
 0x181   :  { %6934 = vsyncadd [#allocation18], 4294961152 }
 0x182   :  { %6935 = dma.done.wait [#allocation21], 6160  }
 0x183   :  { %6936 = vsyncadd [#allocation21], 4294961136 }
 0x184   :  { %6937 = dma.done.wait [#allocation24], 2176  }
 0x185   :  { %6938 = vsyncadd [#allocation24], 4294965120 }
 0x186   :  { %6939 = dma.done.wait [#allocation27], 1040  }
 0x187   :  { %6940 = vsyncadd [#allocation27], 4294966256 }
 0x188   :  { %6941 = dma.done.wait [#allocation30], 1280  }
 0x189   :  { %6942 = vsyncadd [#allocation30], 4294966016 }
 0x18a   :  { %6943 = dma.done.wait [#allocation33], 512  }
 0x18b   :  { %6944 = vsyncadd [#allocation33], 4294966784  ;;  %v5993_v0 = vld [vmem:[#allocation7 + $0x4] ss:$16 sps:$4 sm:$0xff]   ;;  %v5995_v1 = vld [vmem:[#allocation7 + $0xc] ss:$16 sps:$4 sm:$0xff]  }
 0x18c   :  { %1508 = vmatprep.subr.bf16.mxu0 %v5993_v0  ;;  %v5997_v2 = vld [vmem:[#allocation7] ss:$16 sps:$4 sm:$0xff]   ;;  %v5998_v3 = vld [vmem:[#allocation7 + $0x8] ss:$16 sps:$4 sm:$0xff]   ;;  %1631 = vmatprep.subr.bf16.mxu1 %v5995_v1  ;;  %v5999_v4 = vld [vmem:[#allocation7 + $0x24] ss:$16 sps:$4 sm:$0xff]  }
 0x18d   :  { %1509 = vmatpush1.bf16.msra.mxu0 %v5997_v2  ;;  %1632 = vmatpush1.bf16.msra.mxu1 %v5998_v3  ;;  %v6001_v5 = vld [vmem:[#allocation7 + $0x2c] ss:$16 sps:$4 sm:$0xff]   ;;  %v6003_v6 = vld [vmem:[#allocation7 + $0x20] ss:$16 sps:$4 sm:$0xff]   ;;  %v6004_v7 = vld [vmem:[#allocation7 + $0x28] ss:$16 sps:$4 sm:$0xff]  }
 0x18e   :  { %1510 = vmatprep.subr.bf16.mxu0 %v5999_v4  ;;  %1633 = vmatprep.subr.bf16.mxu1 %v6001_v5  ;;  %v6005_v8 = vld [vmem:[#allocation7 + $0x44] ss:$16 sps:$4 sm:$0xff]   ;;  %v6007_v9 = vld [vmem:[#allocation7 + $0x4c] ss:$16 sps:$4 sm:$0xff]   ;;  %v6009_v10 = vld [vmem:[#allocation7 + $0x40] ss:$16 sps:$4 sm:$0xff]  }
 0x18f   :  { %v6010_v11 = vld [vmem:[#allocation7 + $0x48] ss:$16 sps:$4 sm:$0xff]   ;;  %v6011_v12 = vld [vmem:[#allocation7 + $0x64] ss:$16 sps:$4 sm:$0xff]   ;;  %v6013_v13 = vld [vmem:[#allocation7 + $0x6c] ss:$16 sps:$4 sm:$0xff]  }
 0x190   :  { %v6015_v14 = vld [vmem:[#allocation7 + $0x60] ss:$16 sps:$4 sm:$0xff]   ;;  %v6016_v15 = vld [vmem:[#allocation7 + $0x68] ss:$16 sps:$4 sm:$0xff]   ;;  %v6017_v16 = vld [vmem:[#allocation7 + $0x84] ss:$16 sps:$4 sm:$0xff]  }
 0x191   :  { %1511 = vmatpush1.bf16.msra.mxu0 %v6003_v6  ;;  %1634 = vmatpush1.bf16.msra.mxu1 %v6004_v7  ;;  %v6019_v17 = vld [vmem:[#allocation7 + $0x8c] ss:$16 sps:$4 sm:$0xff]   ;;  %v6021_v18 = vld [vmem:[#allocation7 + $0x80] ss:$16 sps:$4 sm:$0xff]   ;;  %v6022_v19 = vld [vmem:[#allocation7 + $0x88] ss:$16 sps:$4 sm:$0xff]  }
 0x192   :  { %1512 = vmatprep.subr.bf16.mxu0 %v6005_v8  ;;  %1635 = vmatprep.subr.bf16.mxu1 %v6007_v9  ;;  %v6023_v20 = vld [vmem:[#allocation7 + $0xa4] ss:$16 sps:$4 sm:$0xff]   ;;  %v6025_v21 = vld [vmem:[#allocation7 + $0xac] ss:$16 sps:$4 sm:$0xff]   ;;  %v6027_v22 = vld [vmem:[#allocation7 + $0xa0] ss:$16 sps:$4 sm:$0xff]  }
 0x193   :  { %v6028_v23 = vld [vmem:[#allocation7 + $0xa8] ss:$16 sps:$4 sm:$0xff]   ;;  %v6029_v24 = vld [vmem:[#allocation7 + $0xc4] ss:$16 sps:$4 sm:$0xff]   ;;  %v6031_v25 = vld [vmem:[#allocation7 + $0xcc] ss:$16 sps:$4 sm:$0xff]  }
 0x194   :  { %v6033_v26 = vld [vmem:[#allocation7 + $0xc0] ss:$16 sps:$4 sm:$0xff]   ;;  %v6034_v27 = vld [vmem:[#allocation7 + $0xc8] ss:$16 sps:$4 sm:$0xff]   ;;  %v6035_v28 = vld [vmem:[#allocation7 + $0xe4] ss:$16 sps:$4 sm:$0xff]  }
 0x195   :  { %1513 = vmatpush1.bf16.msra.mxu0 %v6009_v10  ;;  %1636 = vmatpush1.bf16.msra.mxu1 %v6010_v11  ;;  %v6037_v29 = vld [vmem:[#allocation7 + $0xec] ss:$16 sps:$4 sm:$0xff]   ;;  %v6039_v30 = vld [vmem:[#allocation7 + $0xe0] ss:$16 sps:$4 sm:$0xff]   ;;  %v6040_v31 = vld [vmem:[#allocation7 + $0xe8] ss:$16 sps:$4 sm:$0xff]  }
 0x196   :  { %1514 = vmatprep.subr.bf16.mxu0 %v6011_v12  ;;  %1637 = vmatprep.subr.bf16.mxu1 %v6013_v13  ;;  %v6041_v32 = vld [vmem:[#allocation7 + $0x104] ss:$16 sps:$4 sm:$0xff]   ;;  %v6043_v33 = vld [vmem:[#allocation7 + $0x10c] ss:$16 sps:$4 sm:$0xff]   ;;  %v6045_v34 = vld [vmem:[#allocation7 + $0x100] ss:$16 sps:$4 sm:$0xff]  }
 0x197   :  { %v6046_v35 = vld [vmem:[#allocation7 + $0x108] ss:$16 sps:$4 sm:$0xff]   ;;  %v6047_v36 = vld [vmem:[#allocation7 + $0x124] ss:$16 sps:$4 sm:$0xff]   ;;  %v6049_v37 = vld [vmem:[#allocation7 + $0x12c] ss:$16 sps:$4 sm:$0xff]  }
 0x198   :  { %v6051_v38 = vld [vmem:[#allocation7 + $0x120] ss:$16 sps:$4 sm:$0xff]   ;;  %v6052_v39 = vld [vmem:[#allocation7 + $0x128] ss:$16 sps:$4 sm:$0xff]   ;;  %v6053_v40 = vld [vmem:[#allocation7 + $0x144] ss:$16 sps:$4 sm:$0xff]  }
 0x199   :  { %1515 = vmatpush1.bf16.msra.mxu0 %v6015_v14  ;;  %1638 = vmatpush1.bf16.msra.mxu1 %v6016_v15  ;;  %v6055_v41 = vld [vmem:[#allocation7 + $0x14c] ss:$16 sps:$4 sm:$0xff]   ;;  %v6057_v42 = vld [vmem:[#allocation7 + $0x140] ss:$16 sps:$4 sm:$0xff]   ;;  %v6058_v43 = vld [vmem:[#allocation7 + $0x148] ss:$16 sps:$4 sm:$0xff]  }
 0x19a   :  { %1516 = vmatprep.subr.bf16.mxu0 %v6017_v16  ;;  %1639 = vmatprep.subr.bf16.mxu1 %v6019_v17  ;;  %v6059_v44 = vld [vmem:[#allocation7 + $0x164] ss:$16 sps:$4 sm:$0xff]   ;;  %v6061_v45 = vld [vmem:[#allocation7 + $0x16c] ss:$16 sps:$4 sm:$0xff]   ;;  %v6063_v47 = vld [vmem:[#allocation7 + $0x160] ss:$16 sps:$4 sm:$0xff]  }
 0x19b   :  { %v323_v46 = vld [vmem:[#allocation2 + $0x8] sm:$0xff]  ;;  %v6069_v52 = vld [vmem:[#allocation7 + $0x180] ss:$16 sps:$4 sm:$0xff]   ;;  %vm1963_vm0 = vcmask 64512   ;;  %vm3010_vm5 = vcmask 130048   ;;  %vm6975_vm6 = vmmov 0  }
 0x19c   :  { %v7358_v48 = vpack.c.bf16 %v323_v46, %v323_v46  ;;  %v6064_v49 = vld [vmem:[#allocation7 + $0x168] ss:$16 sps:$4 sm:$0xff]   ;;  %v6065_v50 = vld [vmem:[#allocation7 + $0x184] ss:$16 sps:$4 sm:$0xff]   ;;  %v6067_v51 = vld [vmem:[#allocation7 + $0x18c] ss:$16 sps:$4 sm:$0xff]  }
 0x19d   :  { %1517 = vmatpush1.bf16.msra.mxu0 %v6021_v18  ;;  %1640 = vmatpush1.bf16.msra.mxu1 %v6022_v19  ;;  %v6070_v53 = vld [vmem:[#allocation7 + $0x188] ss:$16 sps:$4 sm:$0xff]   ;;  %v6071_v54 = vld [vmem:[#allocation7 + $0x1a4] ss:$16 sps:$4 sm:$0xff]   ;;  %v6073_v55 = vld [vmem:[#allocation7 + $0x1ac] ss:$16 sps:$4 sm:$0xff]  }
 0x19e   :  { %1518 = vmatprep.subr.bf16.mxu0 %v6023_v20  ;;  %1641 = vmatprep.subr.bf16.mxu1 %v6025_v21  ;;  %v6075_v56 = vld [vmem:[#allocation7 + $0x1a0] ss:$16 sps:$4 sm:$0xff]   ;;  %v6076_v57 = vld [vmem:[#allocation7 + $0x1a8] ss:$16 sps:$4 sm:$0xff]   ;;  %v6077_v58 = vld [vmem:[#allocation7 + $0x1c4] ss:$16 sps:$4 sm:$0xff]  }
 0x19f   :  { %1540 = vmatprep.mubr.bf16.mxu0 %v7358_v48  ;;  %1663 = vmatprep.mubr.bf16.mxu1 %v7358_v48  ;;  %v6079_v59 = vld [vmem:[#allocation7 + $0x1cc] ss:$16 sps:$4 sm:$0xff]   ;;  %v6081_v60 = vld [vmem:[#allocation7 + $0x1c0] ss:$16 sps:$4 sm:$0xff]   ;;  %v6082_v61 = vld [vmem:[#allocation7 + $0x1c8] ss:$16 sps:$4 sm:$0xff]  }
 0x1a0   :  { %v6083_v62 = vld [vmem:[#allocation7 + $0x1e4] ss:$16 sps:$4 sm:$0xff]   ;;  %v6085_v63 = vld [vmem:[#allocation7 + $0x1ec] ss:$16 sps:$4 sm:$0xff]   ;;  %v6087_v0 = vld [vmem:[#allocation7 + $0x1e0] ss:$16 sps:$4 sm:$0xff]  }
 0x1a1   :  { %1519 = vmatpush1.bf16.msra.mxu0 %v6027_v22  ;;  %1642 = vmatpush1.bf16.msra.mxu1 %v6028_v23  ;;  %v6088_v1 = vld [vmem:[#allocation7 + $0x1e8] ss:$16 sps:$4 sm:$0xff]   ;;  %v322_v2 = vld [vmem:[#allocation2] sm:$0xff]  ;;  %vm4224_vm8 = vcmask 523264   ;;  %s6976_s19 = smov [#allocation34]  }
 0x1a2   :  { %1520 = vmatprep.subr.bf16.mxu0 %v6029_v24  ;;  %1643 = vmatprep.subr.bf16.mxu1 %v6031_v25  ;;  %v6091_v3 = vld [vmem:[#allocation7 + $0x204] ss:$16 sps:$4 sm:$0xff]   ;;  %v6094_v4 = vld [vmem:[#allocation7 + $0x20c] ss:$16 sps:$4 sm:$0xff]   ;;  %v7362_v5 = vpack.c.bf16 %v322_v2, %v322_v2  ;;  %v6089_v6 = vld [vmem:[#allocation7 + $0x200] ss:$16 sps:$4 sm:$0xff]  }
 0x1a3   :  { %v6092_v7 = vld [vmem:[#allocation7 + $0x208] ss:$16 sps:$4 sm:$0xff]   ;;  %v6097_v8 = vld [vmem:[#allocation7 + $0x224] ss:$16 sps:$4 sm:$0xff]   ;;  %v6100_v9 = vld [vmem:[#allocation7 + $0x22c] ss:$16 sps:$4 sm:$0xff]  }
 0x1a4   :  { %v6095_v10 = vld [vmem:[#allocation7 + $0x220] ss:$16 sps:$4 sm:$0xff]   ;;  %v6098_v11 = vld [vmem:[#allocation7 + $0x228] ss:$16 sps:$4 sm:$0xff]   ;;  %v6103_v12 = vld [vmem:[#allocation7 + $0x244] ss:$16 sps:$4 sm:$0xff]  }
 0x1a5   :  { %1521 = vmatpush1.bf16.msra.mxu0 %v6033_v26  ;;  %1644 = vmatpush1.bf16.msra.mxu1 %v6034_v27  ;;  %v6106_v13 = vld [vmem:[#allocation7 + $0x24c] ss:$16 sps:$4 sm:$0xff]   ;;  %v6101_v14 = vld [vmem:[#allocation7 + $0x240] ss:$16 sps:$4 sm:$0xff]   ;;  %v6104_v15 = vld [vmem:[#allocation7 + $0x248] ss:$16 sps:$4 sm:$0xff]  }
 0x1a6   :  { %1522 = vmatprep.subr.bf16.mxu0 %v6035_v28  ;;  %1645 = vmatprep.subr.bf16.mxu1 %v6037_v29  ;;  %v6109_v16 = vld [vmem:[#allocation7 + $0x264] ss:$16 sps:$4 sm:$0xff]   ;;  %v6112_v17 = vld [vmem:[#allocation7 + $0x26c] ss:$16 sps:$4 sm:$0xff]   ;;  %v6107_v18 = vld [vmem:[#allocation7 + $0x260] ss:$16 sps:$4 sm:$0xff]  }
 0x1a7   :  { %v6110_v19 = vld [vmem:[#allocation7 + $0x268] ss:$16 sps:$4 sm:$0xff]   ;;  %v6115_v20 = vld [vmem:[#allocation7 + $0x284] ss:$16 sps:$4 sm:$0xff]   ;;  %v6118_v21 = vld [vmem:[#allocation7 + $0x28c] ss:$16 sps:$4 sm:$0xff]  }
 0x1a8   :  { %v6113_v22 = vld [vmem:[#allocation7 + $0x280] ss:$16 sps:$4 sm:$0xff]   ;;  %v6116_v23 = vld [vmem:[#allocation7 + $0x288] ss:$16 sps:$4 sm:$0xff]   ;;  %v6121_v24 = vld [vmem:[#allocation7 + $0x2a4] ss:$16 sps:$4 sm:$0xff]  }
 0x1a9   :  { %1523 = vmatpush1.bf16.msra.mxu0 %v6039_v30  ;;  %1646 = vmatpush1.bf16.msra.mxu1 %v6040_v31  ;;  %v6124_v25 = vld [vmem:[#allocation7 + $0x2ac] ss:$16 sps:$4 sm:$0xff]   ;;  %v6119_v26 = vld [vmem:[#allocation7 + $0x2a0] ss:$16 sps:$4 sm:$0xff]   ;;  %v6122_v27 = vld [vmem:[#allocation7 + $0x2a8] ss:$16 sps:$4 sm:$0xff]  }
 0x1aa   :  { %1524 = vmatprep.subr.bf16.mxu0 %v6041_v32  ;;  %1647 = vmatprep.subr.bf16.mxu1 %v6043_v33  ;;  %v6127_v28 = vld [vmem:[#allocation7 + $0x2c4] ss:$16 sps:$4 sm:$0xff]   ;;  %v6130_v29 = vld [vmem:[#allocation7 + $0x2cc] ss:$16 sps:$4 sm:$0xff]   ;;  %v6125_v31 = vld [vmem:[#allocation7 + $0x2c0] ss:$16 sps:$4 sm:$0xff]  }
 0x1ab   :  { %v325_v30 = vld [vmem:[#allocation2 + $0x18] sm:$0xff]  ;;  %s4754_s25 = sshll.u32 %s6976_s19, 4  ;;  %s4755_s25 = int_to_ptr.vmem [resolvable:$true] %s4754_s25 }
 0x1ac   :  { %v7366_v32 = vpack.c.bf16 %v325_v30, %v325_v30  ;;  %v6128_v33 = vld [vmem:[#allocation7 + $0x2c8] ss:$16 sps:$4 sm:$0xff]   ;;  %v6151_v46 = vld [vmem:[#allocation7 + $0x344] ss:$16 sps:$4 sm:$0xff]   ;;  %v6209_v30 = vld [vmem:[#allocation7 + $0x480] ss:$16 sps:$4 sm:$0xff]   ;;  %p6906_p7 = scmp.lt.s32.totalorder %s4755_s25, %s4755_s25 }
 0x1ad   :  { %1525 = vmatpush1.bf16.msra.mxu0 %v6045_v34  ;;  %1648 = vmatpush1.bf16.msra.mxu1 %v6046_v35  ;;  %v6133_v34 = vld [vmem:[#allocation7 + $0x2e4] ss:$16 sps:$4 sm:$0xff]   ;;  %v6136_v35 = vld [vmem:[#allocation7 + $0x2ec] ss:$16 sps:$4 sm:$0xff]   ;;  %v6176_v2 = vld [vmem:[#allocation7 + $0x3c8] ss:$16 sps:$4 sm:$0xff]  }
 0x1ae   :  { %1526 = vmatprep.subr.bf16.mxu0 %v6047_v36  ;;  %1649 = vmatprep.subr.bf16.mxu1 %v6049_v37  ;;  %v6131_v36 = vld [vmem:[#allocation7 + $0x2e0] ss:$16 sps:$4 sm:$0xff]   ;;  %v6134_v37 = vld [vmem:[#allocation7 + $0x2e8] ss:$16 sps:$4 sm:$0xff]   ;;  %s6901_s23 = scalar_lea.vmem %s4755_s25, 128 }
 0x1af   :  { %p6902_p6 = scmp.ne.s32.totalorder %s4755_s25, %s6901_s23  ;;  %p6907_p8 = scmp.lt.s32.totalorder %s6901_s23, %s6901_s23 }
 0x1b1   :  { %1527 = vmatpush1.bf16.msra.mxu0 %v6051_v38  ;;  %1650 = vmatpush1.bf16.msra.mxu1 %v6052_v39  ;;  %v6139_v38 = vld [vmem:[#allocation7 + $0x304] ss:$16 sps:$4 sm:$0xff]   ;;  %v6142_v39 = vld [vmem:[#allocation7 + $0x30c] ss:$16 sps:$4 sm:$0xff]   ;;  %p6908_p9 = por %p6907_p8, %p6906_p7 }
 0x1b2   :  { %1528 = vmatprep.subr.bf16.mxu0 %v6053_v40  ;;  %1651 = vmatprep.subr.bf16.mxu1 %v6055_v41  ;;  %v6137_v40 = vld [vmem:[#allocation7 + $0x300] ss:$16 sps:$4 sm:$0xff]   ;;  %v6140_v41 = vld [vmem:[#allocation7 + $0x308] ss:$16 sps:$4 sm:$0xff]  }
 0x1b3   :  { %p6909_p10 = pnand %p6908_p9, %p6902_p6 }
 0x1b5   :  { %1529 = vmatpush1.bf16.msra.mxu0 %v6057_v42  ;;  %1652 = vmatpush1.bf16.msra.mxu1 %v6058_v43  ;;  %v6145_v42 = vld [vmem:[#allocation7 + $0x324] ss:$16 sps:$4 sm:$0xff]   ;;  %v6148_v43 = vld [vmem:[#allocation7 + $0x32c] ss:$16 sps:$4 sm:$0xff]  }
 0x1b6   :  { %1530 = vmatprep.subr.bf16.mxu0 %v6059_v44  ;;  %1653 = vmatprep.subr.bf16.mxu1 %v6061_v45  ;;  %v6143_v44 = vld [vmem:[#allocation7 + $0x320] ss:$16 sps:$4 sm:$0xff]   ;;  %v6146_v45 = vld [vmem:[#allocation7 + $0x328] ss:$16 sps:$4 sm:$0xff]  }
 0x1b9   :  { %1531 = vmatpush1.bf16.msra.mxu0 %v6063_v47  ;;  %1654 = vmatpush1.bf16.msra.mxu1 %v6064_v49  ;;  %v6154_v47 = vld [vmem:[#allocation7 + $0x34c] ss:$16 sps:$4 sm:$0xff]   ;;  %v6149_v49 = vld [vmem:[#allocation7 + $0x340] ss:$16 sps:$4 sm:$0xff]  }
 0x1ba   :  { %1532 = vmatprep.subr.bf16.mxu0 %v6065_v50  ;;  %1655 = vmatprep.subr.bf16.mxu1 %v6067_v51  ;;  %v6152_v50 = vld [vmem:[#allocation7 + $0x348] ss:$16 sps:$4 sm:$0xff]   ;;  %v6157_v51 = vld [vmem:[#allocation7 + $0x364] ss:$16 sps:$4 sm:$0xff]  }
 0x1bd   :  { %1533 = vmatpush1.bf16.msra.mxu0 %v6069_v52  ;;  %1656 = vmatpush1.bf16.msra.mxu1 %v6070_v53  ;;  %v6160_v52 = vld [vmem:[#allocation7 + $0x36c] ss:$16 sps:$4 sm:$0xff]   ;;  %v6155_v53 = vld [vmem:[#allocation7 + $0x360] ss:$16 sps:$4 sm:$0xff]  }
 0x1be   :  { %1534 = vmatprep.subr.bf16.mxu0 %v6071_v54  ;;  %1657 = vmatprep.subr.bf16.mxu1 %v6073_v55  ;;  %v6158_v54 = vld [vmem:[#allocation7 + $0x368] ss:$16 sps:$4 sm:$0xff]   ;;  %v6163_v55 = vld [vmem:[#allocation7 + $0x384] ss:$16 sps:$4 sm:$0xff]  }
 0x1c1   :  { %1535 = vmatpush1.bf16.msra.mxu0 %v6075_v56  ;;  %1658 = vmatpush1.bf16.msra.mxu1 %v6076_v57  ;;  %v6166_v56 = vld [vmem:[#allocation7 + $0x38c] ss:$16 sps:$4 sm:$0xff]   ;;  %v6161_v57 = vld [vmem:[#allocation7 + $0x380] ss:$16 sps:$4 sm:$0xff]  }
 0x1c2   :  { %1536 = vmatprep.subr.bf16.mxu0 %v6077_v58  ;;  %1659 = vmatprep.subr.bf16.mxu1 %v6079_v59  ;;  %v6164_v58 = vld [vmem:[#allocation7 + $0x388] ss:$16 sps:$4 sm:$0xff]   ;;  %v6169_v59 = vld [vmem:[#allocation7 + $0x3a4] ss:$16 sps:$4 sm:$0xff]  }
 0x1c5   :  { %1537 = vmatpush1.bf16.msra.mxu0 %v6081_v60  ;;  %1660 = vmatpush1.bf16.msra.mxu1 %v6082_v61  ;;  %v6172_v60 = vld [vmem:[#allocation7 + $0x3ac] ss:$16 sps:$4 sm:$0xff]   ;;  %v6167_v61 = vld [vmem:[#allocation7 + $0x3a0] ss:$16 sps:$4 sm:$0xff]  }
 0x1c6   :  { %1538 = vmatprep.subr.bf16.mxu0 %v6083_v62  ;;  %1661 = vmatprep.subr.bf16.mxu1 %v6085_v63  ;;  %v6170_v62 = vld [vmem:[#allocation7 + $0x3a8] ss:$16 sps:$4 sm:$0xff]   ;;  %v6175_v63 = vld [vmem:[#allocation7 + $0x3c4] ss:$16 sps:$4 sm:$0xff]  }
 0x1c9   :  { %1539 = vmatpush1.bf16.msra.mxu0 %v6087_v0  ;;  %1662 = vmatpush1.bf16.msra.mxu1 %v6088_v1  ;;  %v6178_v0 = vld [vmem:[#allocation7 + $0x3cc] ss:$16 sps:$4 sm:$0xff]   ;;  %v6173_v1 = vld [vmem:[#allocation7 + $0x3c0] ss:$16 sps:$4 sm:$0xff]  }
 0x1ca   :  { %1549 = vmatprep.subr.bf16.mxu0 %v6091_v3  ;;  %1672 = vmatprep.subr.bf16.mxu1 %v6094_v4  ;;  %v6181_v3 = vld [vmem:[#allocation7 + $0x3e4] ss:$16 sps:$4 sm:$0xff]   ;;  %v6184_v4 = vld [vmem:[#allocation7 + $0x3ec] ss:$16 sps:$4 sm:$0xff]  }
 0x1cc   :  { %1541 = vmatmul.mubr.bf16.vlgmr.msra.gmra.mrb[0].mxu0 %v7362_v5  ;;  %1664 = vmatmul.mubr.bf16.vlgmr.msra.gmra.mrb[0].mxu1 %v7362_v5 }
 0x1cd   :  { %1550 = vmatpush1.bf16.msra.mxu0 %v6089_v6  ;;  %1673 = vmatpush1.bf16.msra.mxu1 %v6092_v7  ;;  %v6179_v6 = vld [vmem:[#allocation7 + $0x3e0] ss:$16 sps:$4 sm:$0xff]   ;;  %v6182_v7 = vld [vmem:[#allocation7 + $0x3e8] ss:$16 sps:$4 sm:$0xff]  }
 0x1ce   :  { %1551 = vmatprep.subr.bf16.mxu0 %v6097_v8  ;;  %1674 = vmatprep.subr.bf16.mxu1 %v6100_v9  ;;  %v6187_v8 = vld [vmem:[#allocation7 + $0x404] ss:$16 sps:$4 sm:$0xff]  }
 0x1cf   :  { %1581 = vmatprep.mubr.bf16.mxu0 %v7366_v32  ;;  %1704 = vmatprep.mubr.bf16.mxu1 %v7366_v32  ;;  %v324_v9 = vld [vmem:[#allocation2 + $0x10] sm:$0xff] }
 0x1d1   :  { %1552 = vmatpush1.bf16.msra.mxu0 %v6095_v10  ;;  %1675 = vmatpush1.bf16.msra.mxu1 %v6098_v11  ;;  %v6190_v10 = vld [vmem:[#allocation7 + $0x40c] ss:$16 sps:$4 sm:$0xff]   ;;  %v6185_v11 = vld [vmem:[#allocation7 + $0x400] ss:$16 sps:$4 sm:$0xff]  }
 0x1d2   :  { %1553 = vmatprep.subr.bf16.mxu0 %v6103_v12  ;;  %1676 = vmatprep.subr.bf16.mxu1 %v6106_v13  ;;  %v7370_v12 = vpack.c.bf16 %v324_v9, %v324_v9  ;;  %v6188_v13 = vld [vmem:[#allocation7 + $0x408] ss:$16 sps:$4 sm:$0xff]   ;;  %v6269_v9 = vld [vmem:[#allocation7 + $0x5c0] ss:$16 sps:$4 sm:$0xff]  }
 0x1d5   :  { %1554 = vmatpush1.bf16.msra.mxu0 %v6101_v14  ;;  %1677 = vmatpush1.bf16.msra.mxu1 %v6104_v15  ;;  %v6193_v14 = vld [vmem:[#allocation7 + $0x424] ss:$16 sps:$4 sm:$0xff]   ;;  %v6196_v15 = vld [vmem:[#allocation7 + $0x42c] ss:$16 sps:$4 sm:$0xff]  }
 0x1d6   :  { %1555 = vmatprep.subr.bf16.mxu0 %v6109_v16  ;;  %1678 = vmatprep.subr.bf16.mxu1 %v6112_v17  ;;  %v327_v16 = vld [vmem:[#allocation2 + $0x28] sm:$0xff] }
 0x1d7   :  { %v7372_v17 = vpack.c.bf16 %v327_v16, %v327_v16  ;;  %v1806_v16 = vld [vmem:[#allocation11 + $0x180] sm:$0xff] }
 0x1d9   :  { %1556 = vmatpush1.bf16.msra.mxu0 %v6107_v18  ;;  %1679 = vmatpush1.bf16.msra.mxu1 %v6110_v19  ;;  %v6191_v18 = vld [vmem:[#allocation7 + $0x420] ss:$16 sps:$4 sm:$0xff]   ;;  %v6194_v19 = vld [vmem:[#allocation7 + $0x428] ss:$16 sps:$4 sm:$0xff]  }
 0x1da   :  { %1557 = vmatprep.subr.bf16.mxu0 %v6115_v20  ;;  %1680 = vmatprep.subr.bf16.mxu1 %v6118_v21  ;;  %v6199_v20 = vld [vmem:[#allocation7 + $0x444] ss:$16 sps:$4 sm:$0xff]   ;;  %v6202_v21 = vld [vmem:[#allocation7 + $0x44c] ss:$16 sps:$4 sm:$0xff]  }
 0x1dd   :  { %1558 = vmatpush1.bf16.msra.mxu0 %v6113_v22  ;;  %1681 = vmatpush1.bf16.msra.mxu1 %v6116_v23  ;;  %v6197_v22 = vld [vmem:[#allocation7 + $0x440] ss:$16 sps:$4 sm:$0xff]   ;;  %v6200_v23 = vld [vmem:[#allocation7 + $0x448] ss:$16 sps:$4 sm:$0xff]  }
 0x1de   :  { %1559 = vmatprep.subr.bf16.mxu0 %v6121_v24  ;;  %1682 = vmatprep.subr.bf16.mxu1 %v6124_v25  ;;  %v6205_v24 = vld [vmem:[#allocation7 + $0x464] ss:$16 sps:$4 sm:$0xff]   ;;  %v6208_v25 = vld [vmem:[#allocation7 + $0x46c] ss:$16 sps:$4 sm:$0xff]  }
 0x1e1   :  { %1560 = vmatpush1.bf16.msra.mxu0 %v6119_v26  ;;  %1683 = vmatpush1.bf16.msra.mxu1 %v6122_v27  ;;  %v6203_v26 = vld [vmem:[#allocation7 + $0x460] ss:$16 sps:$4 sm:$0xff]   ;;  %v6206_v27 = vld [vmem:[#allocation7 + $0x468] ss:$16 sps:$4 sm:$0xff]  }
 0x1e2   :  { %1561 = vmatprep.subr.bf16.mxu0 %v6127_v28  ;;  %1684 = vmatprep.subr.bf16.mxu1 %v6130_v29  ;;  %v6211_v28 = vld [vmem:[#allocation7 + $0x484] ss:$16 sps:$4 sm:$0xff]   ;;  %v6214_v29 = vld [vmem:[#allocation7 + $0x48c] ss:$16 sps:$4 sm:$0xff]  }
 0x1e5   :  { %1562 = vmatpush1.bf16.msra.mxu0 %v6125_v31  ;;  %1685 = vmatpush1.bf16.msra.mxu1 %v6128_v33  ;;  %v6212_v31 = vld [vmem:[#allocation7 + $0x488] ss:$16 sps:$4 sm:$0xff]   ;;  %v6217_v33 = vld [vmem:[#allocation7 + $0x4a4] ss:$16 sps:$4 sm:$0xff]  }
 0x1e6   :  { %1563 = vmatprep.subr.bf16.mxu0 %v6133_v34  ;;  %1686 = vmatprep.subr.bf16.mxu1 %v6136_v35  ;;  %v6220_v34 = vld [vmem:[#allocation7 + $0x4ac] ss:$16 sps:$4 sm:$0xff]   ;;  %v6215_v35 = vld [vmem:[#allocation7 + $0x4a0] ss:$16 sps:$4 sm:$0xff]  }
 0x1e9   :  { %1564 = vmatpush1.bf16.msra.mxu0 %v6131_v36  ;;  %1687 = vmatpush1.bf16.msra.mxu1 %v6134_v37  ;;  %v6218_v36 = vld [vmem:[#allocation7 + $0x4a8] ss:$16 sps:$4 sm:$0xff]   ;;  %v6223_v37 = vld [vmem:[#allocation7 + $0x4c4] ss:$16 sps:$4 sm:$0xff]  }
 0x1ea   :  { %1565 = vmatprep.subr.bf16.mxu0 %v6139_v38  ;;  %1688 = vmatprep.subr.bf16.mxu1 %v6142_v39  ;;  %v6226_v38 = vld [vmem:[#allocation7 + $0x4cc] ss:$16 sps:$4 sm:$0xff]   ;;  %v6221_v39 = vld [vmem:[#allocation7 + $0x4c0] ss:$16 sps:$4 sm:$0xff]  }
 0x1ed   :  { %1566 = vmatpush1.bf16.msra.mxu0 %v6137_v40  ;;  %1689 = vmatpush1.bf16.msra.mxu1 %v6140_v41  ;;  %v6224_v40 = vld [vmem:[#allocation7 + $0x4c8] ss:$16 sps:$4 sm:$0xff]   ;;  %v6229_v41 = vld [vmem:[#allocation7 + $0x4e4] ss:$16 sps:$4 sm:$0xff]  }
 0x1ee   :  { %1567 = vmatprep.subr.bf16.mxu0 %v6145_v42  ;;  %1690 = vmatprep.subr.bf16.mxu1 %v6148_v43  ;;  %v6232_v42 = vld [vmem:[#allocation7 + $0x4ec] ss:$16 sps:$4 sm:$0xff]   ;;  %v6227_v43 = vld [vmem:[#allocation7 + $0x4e0] ss:$16 sps:$4 sm:$0xff]  }
 0x1f1   :  { %1568 = vmatpush1.bf16.msra.mxu0 %v6143_v44  ;;  %1691 = vmatpush1.bf16.msra.mxu1 %v6146_v45  ;;  %v6230_v44 = vld [vmem:[#allocation7 + $0x4e8] ss:$16 sps:$4 sm:$0xff]   ;;  %v6235_v45 = vld [vmem:[#allocation7 + $0x504] ss:$16 sps:$4 sm:$0xff]  }
 0x1f2   :  { %1569 = vmatprep.subr.bf16.mxu0 %v6151_v46  ;;  %1692 = vmatprep.subr.bf16.mxu1 %v6154_v47  ;;  %v6238_v46 = vld [vmem:[#allocation7 + $0x50c] ss:$16 sps:$4 sm:$0xff]   ;;  %v6233_v47 = vld [vmem:[#allocation7 + $0x500] ss:$16 sps:$4 sm:$0xff]  }
 0x1f5   :  { %1570 = vmatpush1.bf16.msra.mxu0 %v6149_v49  ;;  %1693 = vmatpush1.bf16.msra.mxu1 %v6152_v50  ;;  %v6236_v49 = vld [vmem:[#allocation7 + $0x508] ss:$16 sps:$4 sm:$0xff]   ;;  %v6241_v50 = vld [vmem:[#allocation7 + $0x524] ss:$16 sps:$4 sm:$0xff]  }
 0x1f6   :  { %1571 = vmatprep.subr.bf16.mxu0 %v6157_v51  ;;  %1694 = vmatprep.subr.bf16.mxu1 %v6160_v52  ;;  %v6244_v51 = vld [vmem:[#allocation7 + $0x52c] ss:$16 sps:$4 sm:$0xff]   ;;  %v6239_v52 = vld [vmem:[#allocation7 + $0x520] ss:$16 sps:$4 sm:$0xff]  }
 0x1f9   :  { %1572 = vmatpush1.bf16.msra.mxu0 %v6155_v53  ;;  %1695 = vmatpush1.bf16.msra.mxu1 %v6158_v54  ;;  %v6242_v53 = vld [vmem:[#allocation7 + $0x528] ss:$16 sps:$4 sm:$0xff]   ;;  %v6247_v54 = vld [vmem:[#allocation7 + $0x544] ss:$16 sps:$4 sm:$0xff]  }
 0x1fa   :  { %1573 = vmatprep.subr.bf16.mxu0 %v6163_v55  ;;  %1696 = vmatprep.subr.bf16.mxu1 %v6166_v56  ;;  %v6250_v55 = vld [vmem:[#allocation7 + $0x54c] ss:$16 sps:$4 sm:$0xff]   ;;  %v6245_v56 = vld [vmem:[#allocation7 + $0x540] ss:$16 sps:$4 sm:$0xff]  }
 0x1fd   :  { %1574 = vmatpush1.bf16.msra.mxu0 %v6161_v57  ;;  %1697 = vmatpush1.bf16.msra.mxu1 %v6164_v58  ;;  %v6248_v57 = vld [vmem:[#allocation7 + $0x548] ss:$16 sps:$4 sm:$0xff]   ;;  %v6253_v58 = vld [vmem:[#allocation7 + $0x564] ss:$16 sps:$4 sm:$0xff]  }
 0x1fe   :  { %1575 = vmatprep.subr.bf16.mxu0 %v6169_v59  ;;  %1698 = vmatprep.subr.bf16.mxu1 %v6172_v60  ;;  %v6256_v59 = vld [vmem:[#allocation7 + $0x56c] ss:$16 sps:$4 sm:$0xff]   ;;  %v6251_v60 = vld [vmem:[#allocation7 + $0x560] ss:$16 sps:$4 sm:$0xff]  }
 0x201   :  { %1576 = vmatpush1.bf16.msra.mxu0 %v6167_v61  ;;  %1699 = vmatpush1.bf16.msra.mxu1 %v6170_v62  ;;  %v6254_v61 = vld [vmem:[#allocation7 + $0x568] ss:$16 sps:$4 sm:$0xff]   ;;  %v6259_v62 = vld [vmem:[#allocation7 + $0x584] ss:$16 sps:$4 sm:$0xff]  }
 0x202   :  { %1577 = vmatprep.subr.bf16.mxu0 %v6175_v63  ;;  %1700 = vmatprep.subr.bf16.mxu1 %v6178_v0  ;;  %v6262_v63 = vld [vmem:[#allocation7 + $0x58c] ss:$16 sps:$4 sm:$0xff]   ;;  %v6257_v0 = vld [vmem:[#allocation7 + $0x580] ss:$16 sps:$4 sm:$0xff]  }
 0x205   :  { %1578 = vmatpush1.bf16.msra.mxu0 %v6173_v1  ;;  %1701 = vmatpush1.bf16.msra.mxu1 %v6176_v2  ;;  %v6260_v1 = vld [vmem:[#allocation7 + $0x588] ss:$16 sps:$4 sm:$0xff]   ;;  %v6265_v2 = vld [vmem:[#allocation7 + $0x5a4] ss:$16 sps:$4 sm:$0xff]  }
 0x206   :  { %1579 = vmatprep.subr.bf16.mxu0 %v6181_v3  ;;  %1702 = vmatprep.subr.bf16.mxu1 %v6184_v4  ;;  %v6268_v3 = vld [vmem:[#allocation7 + $0x5ac] ss:$16 sps:$4 sm:$0xff]   ;;  %v6263_v4 = vld [vmem:[#allocation7 + $0x5a0] ss:$16 sps:$4 sm:$0xff]  }
 0x209   :  { %1580 = vmatpush1.bf16.msra.mxu0 %v6179_v6  ;;  %1703 = vmatpush1.bf16.msra.mxu1 %v6182_v7  ;;  %v6266_v6 = vld [vmem:[#allocation7 + $0x5a8] ss:$16 sps:$4 sm:$0xff]   ;;  %v6271_v7 = vld [vmem:[#allocation7 + $0x5c4] ss:$16 sps:$4 sm:$0xff]  }
 0x20a   :  { %1590 = vmatprep.subr.bf16.mxu0 %v6187_v8  ;;  %1713 = vmatprep.subr.bf16.mxu1 %v6190_v10  ;;  %v6274_v8 = vld [vmem:[#allocation7 + $0x5cc] ss:$16 sps:$4 sm:$0xff]   ;;  %v6272_v10 = vld [vmem:[#allocation7 + $0x5c8] ss:$16 sps:$4 sm:$0xff]  }
 0x20c   :  { %1582 = vmatmul.mubr.bf16.vlgmr.msra.gmra.mrb[0].mxu0 %v7370_v12  ;;  %1705 = vmatmul.mubr.bf16.vlgmr.msra.gmra.mrb[0].mxu1 %v7370_v12 }
 0x20d   :  { %1591 = vmatpush1.bf16.msra.mxu0 %v6185_v11  ;;  %1714 = vmatpush1.bf16.msra.mxu1 %v6188_v13  ;;  %v6277_v11 = vld [vmem:[#allocation7 + $0x5e4] ss:$16 sps:$4 sm:$0xff]   ;;  %v6280_v13 = vld [vmem:[#allocation7 + $0x5ec] ss:$16 sps:$4 sm:$0xff]  }
 0x20e   :  { %1592 = vmatprep.subr.bf16.mxu0 %v6193_v14  ;;  %1715 = vmatprep.subr.bf16.mxu1 %v6196_v15  ;;  %v1774_v14 = vld [vmem:[#allocation11 + $0x80] sm:$0xff]  ;;  %v1775_v15 = vld [vmem:[#allocation11 + $0x88] sm:$0xff] }
 0x20f   :  { %1622 = vmatprep.mubr.bf16.mxu0 %v7372_v17  ;;  %1745 = vmatprep.mubr.bf16.mxu1 %v7372_v17 }
 0x211   :  { %1593 = vmatpush1.bf16.msra.mxu0 %v6191_v18  ;;  %1716 = vmatpush1.bf16.msra.mxu1 %v6194_v19  ;;  %v1807_v18 = vld [vmem:[#allocation11 + $0x188] sm:$0xff] }
 0x212   :  { %1594 = vmatprep.subr.bf16.mxu0 %v6199_v20  ;;  %1717 = vmatprep.subr.bf16.mxu1 %v6202_v21  ;;  %v6275_v19 = vld [vmem:[#allocation7 + $0x5e0] ss:$16 sps:$4 sm:$0xff]   ;;  %v6278_v20 = vld [vmem:[#allocation7 + $0x5e8] ss:$16 sps:$4 sm:$0xff]  }
 0x213   :  { %v326_v21 = vld [vmem:[#allocation2 + $0x20] sm:$0xff] }
 0x215   :  { %1595 = vmatpush1.bf16.msra.mxu0 %v6197_v22  ;;  %1718 = vmatpush1.bf16.msra.mxu1 %v6200_v23  ;;  %v1758_v22 = vld [vmem:[#allocation11] sm:$0xff]  ;;  %v1759_v23 = vld [vmem:[#allocation11 + $0x8] sm:$0xff] }
 0x216   :  { %1596 = vmatprep.subr.bf16.mxu0 %v6205_v24  ;;  %1719 = vmatprep.subr.bf16.mxu1 %v6208_v25  ;;  %v1790_v24 = vld [vmem:[#allocation11 + $0x100] sm:$0xff]  ;;  %v1791_v25 = vld [vmem:[#allocation11 + $0x108] sm:$0xff] }
 0x219   :  { %1597 = vmatpush1.bf16.msra.mxu0 %v6203_v26  ;;  %1720 = vmatpush1.bf16.msra.mxu1 %v6206_v27  ;;  %v1776_v26 = vld [vmem:[#allocation11 + $0x90] sm:$0xff]  ;;  %v1777_v27 = vld [vmem:[#allocation11 + $0x98] sm:$0xff] }
 0x21a   :  { %1598 = vmatprep.subr.bf16.mxu0 %v6211_v28  ;;  %1721 = vmatprep.subr.bf16.mxu1 %v6214_v29  ;;  %v1808_v28 = vld [vmem:[#allocation11 + $0x190] sm:$0xff]  ;;  %v1809_v29 = vld [vmem:[#allocation11 + $0x198] sm:$0xff] }
 0x21d   :  { %1599 = vmatpush1.bf16.msra.mxu0 %v6209_v30  ;;  %1722 = vmatpush1.bf16.msra.mxu1 %v6212_v31  ;;  %v7378_v30 = vpack.c.bf16 %v1775_v15, %v1774_v14  ;;  %v7380_v31 = vpack.c.bf16 %v1807_v18, %v1806_v16  ;;  %v1784_v15 = vld [vmem:[#allocation11 + $0xd0] sm:$0xff]  ;;  %v1785_v16 = vld [vmem:[#allocation11 + $0xd8] sm:$0xff] }
 0x21e   :  { %1600 = vmatprep.subr.bf16.mxu0 %v6217_v33  ;;  %1723 = vmatprep.subr.bf16.mxu1 %v6220_v34  ;;  %v7382_v33 = vpack.c.bf16 %v326_v21, %v326_v21  ;;  %v1760_v34 = vld [vmem:[#allocation11 + $0x10] sm:$0xff] }
 0x21f   :  { %v1816_v18 = vld [vmem:[#allocation11 + $0x1d0] sm:$0xff] }
 0x221   :  { %1601 = vmatpush1.bf16.msra.mxu0 %v6215_v35  ;;  %1724 = vmatpush1.bf16.msra.mxu1 %v6218_v36  ;;  %v1761_v35 = vld [vmem:[#allocation11 + $0x18] sm:$0xff]  ;;  %v1792_v36 = vld [vmem:[#allocation11 + $0x110] sm:$0xff] }
 0x222   :  { %1602 = vmatprep.subr.bf16.mxu0 %v6223_v37  ;;  %1725 = vmatprep.subr.bf16.mxu1 %v6226_v38  ;;  %v1793_v37 = vld [vmem:[#allocation11 + $0x118] sm:$0xff]  ;;  %v7384_v38 = vpack.c.bf16 %v1759_v23, %v1758_v22  ;;  %v1768_v22 = vld [vmem:[#allocation11 + $0x50] sm:$0xff] }
 0x223   :  { %v1769_v23 = vld [vmem:[#allocation11 + $0x58] sm:$0xff] }
 0x225   :  { %1603 = vmatpush1.bf16.msra.mxu0 %v6221_v39  ;;  %1726 = vmatpush1.bf16.msra.mxu1 %v6224_v40  ;;  %v7386_v39 = vpack.c.bf16 %v1791_v25, %v1790_v24  ;;  %v1778_v40 = vld [vmem:[#allocation11 + $0xa0] sm:$0xff]  ;;  %v1800_v24 = vld [vmem:[#allocation11 + $0x150] sm:$0xff]  ;;  %v1801_v25 = vld [vmem:[#allocation11 + $0x158] sm:$0xff] }
 0x226   :  { %1604 = vmatprep.subr.bf16.mxu0 %v6229_v41  ;;  %1727 = vmatprep.subr.bf16.mxu1 %v6232_v42  ;;  %v1779_v41 = vld [vmem:[#allocation11 + $0xa8] sm:$0xff]  ;;  %v1810_v42 = vld [vmem:[#allocation11 + $0x1a0] sm:$0xff] }
 0x229   :  { %1605 = vmatpush1.bf16.msra.mxu0 %v6227_v43  ;;  %1728 = vmatpush1.bf16.msra.mxu1 %v6230_v44  ;;  %v1811_v43 = vld [vmem:[#allocation11 + $0x1a8] sm:$0xff]  ;;  %v7390_v44 = vpack.c.bf16 %v1777_v27, %v1776_v26 }
 0x22a   :  { %1606 = vmatprep.subr.bf16.mxu0 %v6235_v45  ;;  %1729 = vmatprep.subr.bf16.mxu1 %v6238_v46  ;;  %v7392_v45 = vpack.c.bf16 %v1809_v29, %v1808_v28  ;;  %v1762_v46 = vld [vmem:[#allocation11 + $0x20] sm:$0xff]  ;;  %v1787_v29 = vld [vmem:[#allocation11 + $0xe8] sm:$0xff] }
 0x22b   :  { %v1786_v28 = vld [vmem:[#allocation11 + $0xe0] sm:$0xff] }
 0x22d   :  { %1607 = vmatpush1.bf16.msra.mxu0 %v6233_v47  ;;  %1730 = vmatpush1.bf16.msra.mxu1 %v6236_v49  ;;  %v1763_v47 = vld [vmem:[#allocation11 + $0x28] sm:$0xff]  ;;  %v1794_v49 = vld [vmem:[#allocation11 + $0x120] sm:$0xff] }
 0x22e   :  { %1608 = vmatprep.subr.bf16.mxu0 %v6241_v50  ;;  %1731 = vmatprep.subr.bf16.mxu1 %v6244_v51  ;;  %v1795_v50 = vld [vmem:[#allocation11 + $0x128] sm:$0xff]  ;;  %v7398_v51 = vpack.c.bf16 %v1761_v35, %v1760_v34  ;;  %v1818_v34 = vld [vmem:[#allocation11 + $0x1e0] sm:$0xff] }
 0x22f   :  { %v1819_v35 = vld [vmem:[#allocation11 + $0x1e8] sm:$0xff] }
 0x231   :  { %1609 = vmatpush1.bf16.msra.mxu0 %v6239_v52  ;;  %1732 = vmatpush1.bf16.msra.mxu1 %v6242_v53  ;;  %v7400_v52 = vpack.c.bf16 %v1793_v37, %v1792_v36  ;;  %v1780_v53 = vld [vmem:[#allocation11 + $0xb0] sm:$0xff]  ;;  %v7440_v36 = vpack.c.bf16 %v1785_v16, %v1784_v15 }
 0x232   :  { %1610 = vmatprep.subr.bf16.mxu0 %v6247_v54  ;;  %1733 = vmatprep.subr.bf16.mxu1 %v6250_v55  ;;  %v1781_v54 = vld [vmem:[#allocation11 + $0xb8] sm:$0xff]  ;;  %v1812_v55 = vld [vmem:[#allocation11 + $0x1b0] sm:$0xff] }
 0x235   :  { %1611 = vmatpush1.bf16.msra.mxu0 %v6245_v56  ;;  %1734 = vmatpush1.bf16.msra.mxu1 %v6248_v57  ;;  %v1813_v56 = vld [vmem:[#allocation11 + $0x1b8] sm:$0xff]  ;;  %v7404_v57 = vpack.c.bf16 %v1779_v41, %v1778_v40  ;;  %v1770_v40 = vld [vmem:[#allocation11 + $0x60] sm:$0xff]  ;;  %v1771_v41 = vld [vmem:[#allocation11 + $0x68] sm:$0xff] }
 0x236   :  { %1612 = vmatprep.subr.bf16.mxu0 %v6253_v58  ;;  %1735 = vmatprep.subr.bf16.mxu1 %v6256_v59  ;;  %v7406_v58 = vpack.c.bf16 %v1811_v43, %v1810_v42  ;;  %v1764_v59 = vld [vmem:[#allocation11 + $0x30] sm:$0xff]  ;;  %v1802_v42 = vld [vmem:[#allocation11 + $0x160] sm:$0xff]  ;;  %v1803_v43 = vld [vmem:[#allocation11 + $0x168] sm:$0xff] }
 0x239   :  { %1613 = vmatpush1.bf16.msra.mxu0 %v6251_v60  ;;  %1736 = vmatpush1.bf16.msra.mxu1 %v6254_v61  ;;  %v1765_v60 = vld [vmem:[#allocation11 + $0x38] sm:$0xff]  ;;  %v1796_v61 = vld [vmem:[#allocation11 + $0x130] sm:$0xff] }
 0x23a   :  { %1614 = vmatprep.subr.bf16.mxu0 %v6259_v62  ;;  %1737 = vmatprep.subr.bf16.mxu1 %v6262_v63  ;;  %v1797_v62 = vld [vmem:[#allocation11 + $0x138] sm:$0xff]  ;;  %v7410_v63 = vpack.c.bf16 %v1763_v47, %v1762_v46  ;;  %v7446_v46 = vpack.c.bf16 %v1769_v23, %v1768_v22  ;;  %v7448_v47 = vpack.c.bf16 %v1801_v25, %v1800_v24 }
 0x23b   :  { %v7424_v14 = vpack.c.bf16 %v1797_v62, %v1796_v61  ;;  %v1821_v61 = vld [vmem:[#allocation11 + $0x1f8] sm:$0xff]  ;;  %v1772_v62 = vld [vmem:[#allocation11 + $0x70] sm:$0xff] }
 0x23d   :  { %1615 = vmatpush1.bf16.msra.mxu0 %v6257_v0  ;;  %1738 = vmatpush1.bf16.msra.mxu1 %v6260_v1  ;;  %v7412_v0 = vpack.c.bf16 %v1795_v50, %v1794_v49  ;;  %v1782_v1 = vld [vmem:[#allocation11 + $0xc0] sm:$0xff]  ;;  %v7452_v49 = vpack.c.bf16 %v1787_v29, %v1786_v28  ;;  %v7454_v50 = vpack.c.bf16 %v1819_v35, %v1818_v34 }
 0x23e   :  { %1616 = vmatprep.subr.bf16.mxu0 %v6265_v2  ;;  %1739 = vmatprep.subr.bf16.mxu1 %v6268_v3  ;;  %v1783_v2 = vld [vmem:[#allocation11 + $0xc8] sm:$0xff]  ;;  %v1814_v3 = vld [vmem:[#allocation11 + $0x1c0] sm:$0xff] }
 0x241   :  { %1617 = vmatpush1.bf16.msra.mxu0 %v6263_v4  ;;  %1740 = vmatpush1.bf16.msra.mxu1 %v6266_v6  ;;  %v1815_v4 = vld [vmem:[#allocation11 + $0x1c8] sm:$0xff]  ;;  %v7416_v6 = vpack.c.bf16 %v1781_v54, %v1780_v53  ;;  %v7458_v53 = vpack.c.bf16 %v1771_v41, %v1770_v40  ;;  %v5717_v54 = vpack.c.bf16 %v1803_v43, %v1802_v42 }
 0x242   :  { %1618 = vmatprep.subr.bf16.mxu0 %v6271_v7  ;;  %1741 = vmatprep.subr.bf16.mxu1 %v6274_v8  ;;  %v7418_v7 = vpack.c.bf16 %v1813_v56, %v1812_v55  ;;  %v1766_v8 = vld [vmem:[#allocation11 + $0x40] sm:$0xff]  ;;  %v7430_v21 = vpack.c.bf16 %v1815_v4, %v1814_v3  ;;  %v1788_v55 = vld [vmem:[#allocation11 + $0xf0] sm:$0xff]  ;;  %v1789_v56 = vld [vmem:[#allocation11 + $0xf8] sm:$0xff] }
 0x243   :  { %v1804_v4 = vld [vmem:[#allocation11 + $0x170] sm:$0xff] }
 0x245   :  { %1619 = vmatpush1.bf16.msra.mxu0 %v6269_v9  ;;  %1742 = vmatpush1.bf16.msra.mxu1 %v6272_v10  ;;  %v1767_v9 = vld [vmem:[#allocation11 + $0x48] sm:$0xff]  ;;  %v1798_v10 = vld [vmem:[#allocation11 + $0x140] sm:$0xff] }
 0x246   :  { %1620 = vmatprep.subr.bf16.mxu0 %v6277_v11  ;;  %1743 = vmatprep.subr.bf16.mxu1 %v6280_v13  ;;  %v1799_v11 = vld [vmem:[#allocation11 + $0x148] sm:$0xff]  ;;  %v7422_v13 = vpack.c.bf16 %v1765_v60, %v1764_v59  ;;  %v7434_v26 = vpack.c.bf16 %v1767_v9, %v1766_v8  ;;  %v1820_v59 = vld [vmem:[#allocation11 + $0x1f0] sm:$0xff]  ;;  %v7463_v60 = vpack.c.bf16 %v1789_v56, %v1788_v55  ;;  %v1805_v8 = vld [vmem:[#allocation11 + $0x178] sm:$0xff] }
 0x247   :  { %v7436_v27 = vpack.c.bf16 %v1799_v11, %v1798_v10  ;;  %v5721_v9 = vpack.c.bf16 %v1805_v8, %v1804_v4  ;;  %v528_v10 = vlaneseq }
 0x249   :  { %1621 = vmatpush1.bf16.msra.mxu0 %v6275_v19  ;;  %1744 = vmatpush1.bf16.msra.mxu1 %v6278_v20  ;;  %v1817_v19 = vld [vmem:[#allocation11 + $0x1d8] sm:$0xff]  ;;  %v7428_v20 = vpack.c.bf16 %v1783_v2, %v1782_v1  ;;  %v5719_v2 = vpack.c.bf16 %v1821_v61, %v1820_v59  ;;  %v7470_v11 = vshrl.u32 %v528_v10, 7  ;;  %v6281_v10 = vld [vmem:[#allocation13] ss:$8 sps:$4 sm:$0xff]  }
 0x24a   :  { %5660 = vmatprep.subr.bf16.mxu0 %v7378_v30  ;;  %5692 = vmatprep.subr.bf16.mxu1 %v7380_v31  ;;  %v7442_v37 = vpack.c.bf16 %v1817_v19, %v1816_v18  ;;  %v1773_v1 = vld [vmem:[#allocation11 + $0x78] sm:$0xff] }
 0x24b   :  { %v7465_v3 = vpack.c.bf16 %v1773_v1, %v1772_v62  ;;  %v534_v15 = vsub.s32 1, %v7470_v11  ;;  %v542_v16 = vsub.s32 3, %v7470_v11  ;;  %v526_v18 = vld [vmem:[#allocation8] sm:$0xf]  ;;  %v530_v19 = vsub.s32 0, %v7470_v11 }
 0x24c   :  { %1623 = vmatmul.mubr.bf16.vlgmr.msra.gmra.mrb[0].mxu0 %v7382_v33  ;;  %1746 = vmatmul.mubr.bf16.vlgmr.msra.gmra.mrb[0].mxu1 %v7382_v33  ;;  %v538_v22 = vsub.s32 2, %v7470_v11 }
 0x24d   :  { %5662 = vmatpush3.bf16.msra.mxu0 %v7384_v38  ;;  %5694 = vmatpush3.bf16.msra.mxu1 %v7386_v39  ;;  %v535_v23 = vrot.slane %v526_v18, %v534_v15  ;;  %v543_v24 = vrot.slane %v526_v18, %v542_v16  ;;  %v531_v25 = vrot.slane %v526_v18, %v530_v19  ;;  %v6286_v16 = vld [vmem:[#allocation13 + $0x14] ss:$8 sps:$4 sm:$0xff]  }
 0x24e   :  { %5664 = vmatprep.subr.bf16.mxu0 %v7390_v44  ;;  %5696 = vmatprep.subr.bf16.mxu1 %v7392_v45 }
 0x251   :  { %5666 = vmatpush3.bf16.msra.mxu0 %v7398_v51  ;;  %5698 = vmatpush3.bf16.msra.mxu1 %v7400_v52 }
 0x252   :  { %5668 = vmatprep.subr.bf16.mxu0 %v7404_v57  ;;  %5700 = vmatprep.subr.bf16.mxu1 %v7406_v58 }
 0x255   :  { %5670 = vmatpush3.bf16.msra.mxu0 %v7410_v63  ;;  %5702 = vmatpush3.bf16.msra.mxu1 %v7412_v0 }
 0x256   :  { %5672 = vmatprep.subr.bf16.mxu0 %v7416_v6  ;;  %5704 = vmatprep.subr.bf16.mxu1 %v7418_v7 }
 0x259   :  { %5674 = vmatpush3.bf16.msra.mxu0 %v7422_v13  ;;  %5706 = vmatpush3.bf16.msra.mxu1 %v7424_v14 }
 0x25a   :  { %5676 = vmatprep.subr.bf16.mxu0 %v7428_v20  ;;  %5708 = vmatprep.subr.bf16.mxu1 %v7430_v21 }
 0x25d   :  { %5678 = vmatpush3.bf16.msra.mxu0 %v7434_v26  ;;  %5710 = vmatpush3.bf16.msra.mxu1 %v7436_v27 }
 0x25e   :  { %5680 = vmatprep.subr.bf16.mxu0 %v7440_v36  ;;  %5712 = vmatprep.subr.bf16.mxu1 %v7442_v37 }
 0x261   :  { %5682 = vmatpush3.bf16.msra.mxu0 %v7446_v46  ;;  %5714 = vmatpush3.bf16.msra.mxu1 %v7448_v47 }
 0x262   :  { %5684 = vmatprep.subr.bf16.mxu0 %v7452_v49  ;;  %5716 = vmatprep.subr.bf16.mxu1 %v7454_v50 }
 0x265   :  { %5686 = vmatpush3.bf16.msra.mxu0 %v7458_v53  ;;  %5718 = vmatpush3.bf16.msra.mxu1 %v5717_v54 }
 0x266   :  { %5688 = vmatprep.subr.bf16.mxu0 %v7463_v60  ;;  %5720 = vmatprep.subr.bf16.mxu1 %v5719_v2 }
 0x269   :  { %5690 = vmatpush3.bf16.msra.mxu0 %v7465_v3  ;;  %5722 = vmatpush3.bf16.msra.mxu1 %v5721_v9 }
 0x26a   :  { %5756 = vmatprep.subr.bf16.mxu1 %v7380_v31  ;;  %v539_v31 = vrot.slane %v526_v18, %v538_v22  ;;  %v6284_v22 = vld [vmem:[#allocation13 + $0x10] ss:$8 sps:$4 sm:$0xff]  }
 0x31f   :  { %v1624_v28 = vpop.f32.mrb[0].mxu0  ;;  %v1747_v29 = vpop.f32.mrb[0].mxu1 }
 0x320   :  { %v1626_v34 = vpop.f32.mrb[1].mxu0  ;;  %v1749_v35 = vpop.f32.mrb[1].mxu1  ;;  %v7484_v55 = vadd.f32 %v1624_v28, %v531_v25  ;;  %v7486_v56 = vadd.f32 %v1747_v29, %v539_v31  ;;  %v6292_v25 = vld [vmem:[#allocation13 + $0x34] ss:$8 sps:$4 sm:$0xff]   ;;  %v6290_v31 = vld [vmem:[#allocation13 + $0x30] ss:$8 sps:$4 sm:$0xff]  }
 0x321   :  { %v7480_v40 = vadd.f32 %v1626_v34, %v535_v23  ;;  %v7482_v41 = vadd.f32 %v1749_v35, %v543_v24  ;;  %v1628_v42 = vpop.f32.mrb[2].mxu0  ;;  %v1751_v43 = vpop.f32.mrb[2].mxu1  ;;  %v6289_v23 = vld [vmem:[#allocation13 + $0x24] ss:$8 sps:$4 sm:$0xff]   ;;  %v6287_v24 = vld [vmem:[#allocation13 + $0x20] ss:$8 sps:$4 sm:$0xff]  }
 0x322   :  { %v1629_v59 = vpop.f32.mrb[3].mxu0  ;;  %v1752_v61 = vpop.f32.mrb[3].mxu1  ;;  %v6295_v28 = vld [vmem:[#allocation13 + $0x44] ss:$8 sps:$4 sm:$0xff]   ;;  %v6293_v29 = vld [vmem:[#allocation13 + $0x40] ss:$8 sps:$4 sm:$0xff]  }
 0x323   :  { %1886 = vmatprep.mubr.f32.mxu0 %v7480_v40  ;;  %1956 = vmatprep.mubr.f32.mxu1 %v7482_v41  ;;  %v6298_v34 = vld [vmem:[#allocation13 + $0x54] ss:$8 sps:$4 sm:$0xff]   ;;  %v6296_v35 = vld [vmem:[#allocation13 + $0x50] ss:$8 sps:$4 sm:$0xff]  }
 0x324   :  { %1887 = vmatmul.mubr.f32.vlgmr.msra.gmra.mrb[4].mxu0 %v7484_v55  ;;  %1957 = vmatmul.mubr.f32.vlgmr.msra.gmra.mrb[4].mxu1 %v7486_v56  ;;  %v6304_v42 = vld [vmem:[#allocation13 + $0x74] ss:$8 sps:$4 sm:$0xff]   ;;  %v6302_v43 = vld [vmem:[#allocation13 + $0x70] ss:$8 sps:$4 sm:$0xff]  }
 0x325   :  { %5758 = vmatpush3.bf16.msra.mxu1 %v7386_v39  ;;  %v1755_v39 = vld [vmem:[#allocation10 + $0x8] sm:$0xff]  ;;  %v6310_v59 = vld [vmem:[#allocation13 + $0x94] ss:$8 sps:$4 sm:$0xff]   ;;  %v6308_v61 = vld [vmem:[#allocation13 + $0x90] ss:$8 sps:$4 sm:$0xff]  }
 0x326   :  { %5760 = vmatprep.subr.bf16.mxu1 %v7392_v45  ;;  %1967 = vmatprep.subr.mxu0 %v1755_v39  ;;  %v1754_v45 = vld [vmem:[#allocation10] sm:$0xff] }
 0x327   :  { %1968 = vmatpush1.msra.mxu0 %v1754_v45 }
 0x329   :  { %5762 = vmatpush3.bf16.msra.mxu1 %v7400_v52  ;;  %v1757_v52 = vld [vmem:[#allocation10 + $0x18] sm:$0xff] }
 0x32a   :  { %5764 = vmatprep.subr.bf16.mxu1 %v7406_v58  ;;  %v6973_v58 = vmov 0.0   ;;  %2038 = vmatprep.subr.mxu0 %v1757_v52 }
 0x32b   :  { %2031 = vmatprep.mubr.f32.mxu0 %v6973_v58 }
 0x32d   :  { %5766 = vmatpush3.bf16.msra.mxu1 %v7412_v0 }
 0x32e   :  { %5768 = vmatprep.subr.bf16.mxu1 %v7418_v7 }
 0x331   :  { %5770 = vmatpush3.bf16.msra.mxu1 %v7424_v14 }
 0x332   :  { %5772 = vmatprep.subr.bf16.mxu1 %v7430_v21 }
 0x335   :  { %5774 = vmatpush3.bf16.msra.mxu1 %v7436_v27 }
 0x336   :  { %5776 = vmatprep.subr.bf16.mxu1 %v7442_v37 }
 0x339   :  { %5778 = vmatpush3.bf16.msra.mxu1 %v7448_v47 }
 0x33a   :  { %5780 = vmatprep.subr.bf16.mxu1 %v7454_v50 }
 0x33d   :  { %5782 = vmatpush3.bf16.msra.mxu1 %v5717_v54  ;;  %v1756_v54 = vld [vmem:[#allocation10 + $0x10] sm:$0xff] }
 0x33e   :  { %5784 = vmatprep.subr.bf16.mxu1 %v5719_v2 }
 0x341   :  { %5786 = vmatpush3.bf16.msra.mxu1 %v5721_v9 }
 0x342   :  { %2334 = vmatprep.subr.mxu1 %v1757_v52  ;;  %v6316_v52 = vld [vmem:[#allocation13 + $0xb4] ss:$8 sps:$4 sm:$0xff]  }
 0x3f7   :  { %v5153_v0 = vpop.f32.mrb[4].mxu0  ;;  %v5188_v7 = vpop.f32.mrb[4].mxu1 }
 0x3f8   :  { %v5154_v14 = vpop.f32.mrb[5].mxu0  ;;  %v5189_v21 = vpop.f32.mrb[5].mxu1 }
 0x3f9   :  { %v5155_v27 = vadd.f32 %v5154_v14, %v5153_v0  ;;  %v5190_v37 = vadd.f32 %v5189_v21, %v5188_v7  ;;  %v6314_v0 = vld [vmem:[#allocation13 + $0xb0] ss:$8 sps:$4 sm:$0xff]   ;;  %v6319_v7 = vld [vmem:[#allocation13 + $0xc4] ss:$8 sps:$4 sm:$0xff]   ;;  %v6317_v14 = vld [vmem:[#allocation13 + $0xc0] ss:$8 sps:$4 sm:$0xff]  }
 0x3fa   :  { %v6322_v21 = vld [vmem:[#allocation13 + $0xd4] ss:$8 sps:$4 sm:$0xff]  }
 0x3fb   :  { %v1959_v47 = vadd.f32 %v5190_v37, %v5155_v27  ;;  %v6320_v27 = vld [vmem:[#allocation13 + $0xd0] ss:$8 sps:$4 sm:$0xff]   ;;  %v6325_v37 = vld [vmem:[#allocation13 + $0xe4] ss:$8 sps:$4 sm:$0xff]  }
 0x3fd   :  { %v1962_v50 = vmul.f32 0.015625, %v1959_v47  ;;  %v6323_v47 = vld [vmem:[#allocation13 + $0xe0] ss:$8 sps:$4 sm:$0xff]  }
 0x3ff   :  { %4965 = vmatmul.mubr.msk.f32.vlgmr.msra.gmra.mrb[6].mxu0 %vm1963_vm0, %v1962_v50 }
 0x400   :  { %2039 = vmatpush1.msra.mxu0 %v1756_v54  ;;  %2102 = vmatprep.mubr.f32.mxu0 %v6973_v58 }
 0x401   :  { %5724 = vmatprep.subr.bf16.mxu0 %v7378_v30 }
 0x403   :  { %4966 = vmatmul.mubr.msk.f32.vlgmr.msra.gmra.mrb[8].mxu0 %vm1963_vm0, %v1962_v50  ;;  %v6328_v50 = vld [vmem:[#allocation13 + $0xf4] ss:$8 sps:$4 sm:$0xff]  }
 0x404   :  { %5726 = vmatpush3.bf16.msra.mxu0 %v7384_v38 }
 0x405   :  { %5728 = vmatprep.subr.bf16.mxu0 %v7390_v44 }
 0x408   :  { %5730 = vmatpush3.bf16.msra.mxu0 %v7398_v51 }
 0x409   :  { %5732 = vmatprep.subr.bf16.mxu0 %v7404_v57 }
 0x40c   :  { %5734 = vmatpush3.bf16.msra.mxu0 %v7410_v63 }
 0x40d   :  { %5736 = vmatprep.subr.bf16.mxu0 %v7416_v6 }
 0x410   :  { %5738 = vmatpush3.bf16.msra.mxu0 %v7422_v13 }
 0x411   :  { %5740 = vmatprep.subr.bf16.mxu0 %v7428_v20 }
 0x414   :  { %5742 = vmatpush3.bf16.msra.mxu0 %v7434_v26 }
 0x415   :  { %5744 = vmatprep.subr.bf16.mxu0 %v7440_v36 }
 0x418   :  { %5746 = vmatpush3.bf16.msra.mxu0 %v7446_v46 }
 0x419   :  { %5748 = vmatprep.subr.bf16.mxu0 %v7452_v49  ;;  %v6283_v49 = vld [vmem:[#allocation13 + $0x4] ss:$8 sps:$4 sm:$0xff]  }
 0x41c   :  { %5750 = vmatpush3.bf16.msra.mxu0 %v7458_v53 }
 0x41d   :  { %5752 = vmatprep.subr.bf16.mxu0 %v7463_v60 }
 0x420   :  { %5754 = vmatpush3.bf16.msra.mxu0 %v7465_v3 }
 0x421   :  { %2263 = vmatprep.subr.mxu0 %v1755_v39  ;;  %v6313_v39 = vld [vmem:[#allocation13 + $0xa4] ss:$8 sps:$4 sm:$0xff]  }
 0x4d2   :  { %v2033_v30 = vpop.f32.mrb[6].mxu0 }
 0x4d3   :  { %v7525_v38 = vsub.f32 %v7484_v55, %v2033_v30  ;;  %v2035_v44 = vpop.f32.mrb[7].mxu0  ;;  %v6307_v55 = vld [vmem:[#allocation13 + $0x84] ss:$8 sps:$4 sm:$0xff]  }
 0x4d4   :  { %v7528_v51 = vsub.f32 %v7480_v40, %v2035_v44  ;;  %v6301_v40 = vld [vmem:[#allocation13 + $0x64] ss:$8 sps:$4 sm:$0xff]  }
 0x4d5   :  { %v2113_v6 = vmul.f32 %v7525_v38, %v7525_v38  ;;  %v6331_v30 = vld [vmem:[#allocation13 + $0x104] ss:$8 sps:$4 sm:$0xff]  }
 0x4d6   :  { %v2114_v57 = vmul.f32 %v7528_v51, %v7528_v51  ;;  %v2104_v63 = vpop.f32.mrb[8].mxu0  ;;  %v2923_v44 = vld [vmem:[#allocation17 + $0x80] sm:$0xff] }
 0x4d7   :  { %v7535_v13 = vsub.f32 %v7486_v56, %v2104_v63  ;;  %v2106_v20 = vpop.f32.mrb[9].mxu0  ;;  %v6305_v56 = vld [vmem:[#allocation13 + $0x80] ss:$8 sps:$4 sm:$0xff]  }
 0x4d8   :  { %v7538_v26 = vsub.f32 %v7482_v41, %v2106_v20  ;;  %2181 = vmatprep.mubr.f32.mxu0 %v2114_v57  ;;  %v6299_v41 = vld [vmem:[#allocation13 + $0x60] ss:$8 sps:$4 sm:$0xff]  }
 0x4d9   :  { %2182 = vmatmul.mubr.f32.vlgmr.msra.gmra.mrb[10].mxu0 %v2113_v6  ;;  %v2115_v46 = vmul.f32 %v7535_v13, %v7535_v13  ;;  %v2924_v57 = vld [vmem:[#allocation17 + $0x88] sm:$0xff]  ;;  %v2907_v63 = vld [vmem:[#allocation17] sm:$0xff] }
 0x4da   :  { %v2116_v36 = vmul.f32 %v7538_v26, %v7538_v26  ;;  %2264 = vmatpush1.msra.mxu0 %v1754_v45  ;;  %2327 = vmatprep.mubr.f32.mxu0 %v6973_v58  ;;  %v6311_v45 = vld [vmem:[#allocation13 + $0xa0] ss:$8 sps:$4 sm:$0xff]   ;;  %v7548_v6 = vpack.c.bf16 %v2924_v57, %v2923_v44 }
 0x4db   :  { %2821 = vmatprep.subr.bf16.mxu0 %v6283_v49  ;;  %v2908_v20 = vld [vmem:[#allocation17 + $0x8] sm:$0xff] }
 0x4dc   :  { %2251 = vmatprep.mubr.f32.mxu1 %v2116_v36  ;;  %v2925_v36 = vld [vmem:[#allocation17 + $0x90] sm:$0xff]  ;;  %v7550_v49 = vpack.c.bf16 %v2908_v20, %v2907_v63 }
 0x4dd   :  { %2252 = vmatmul.mubr.f32.vlgmr.msra.gmra.mrb[6].mxu1 %v2115_v46  ;;  %v2926_v46 = vld [vmem:[#allocation17 + $0x98] sm:$0xff] }
 0x4de   :  { %2335 = vmatpush1.msra.mxu1 %v1756_v54  ;;  %2398 = vmatprep.mubr.f32.mxu1 %v6973_v58  ;;  %v6326_v54 = vld [vmem:[#allocation13 + $0xf0] ss:$8 sps:$4 sm:$0xff]  }
 0x4df   :  { %5788 = vmatprep.subr.bf16.mxu1 %v7548_v6 }
 0x5ac   :  { %v5223_v53 = vpop.f32.mrb[10].mxu0 }
 0x5ad   :  { %v5224_v60 = vpop.f32.mrb[11].mxu0 }
 0x5ae   :  { %v5225_v62 = vadd.f32 %v5224_v60, %v5223_v53  ;;  %v7552_v53 = vpack.c.bf16 %v2926_v46, %v2925_v36  ;;  %v2909_v60 = vld [vmem:[#allocation17 + $0x10] sm:$0xff] }
 0x5b0   :  { %v5258_v1 = vpop.f32.mrb[6].mxu1 }
 0x5b1   :  { %v5259_v2 = vpop.f32.mrb[7].mxu1 }
 0x5b2   :  { %v5260_v3 = vadd.f32 %v5259_v2, %v5258_v1  ;;  %v2927_v1 = vld [vmem:[#allocation17 + $0xa0] sm:$0xff]  ;;  %v2928_v2 = vld [vmem:[#allocation17 + $0xa8] sm:$0xff] }
 0x5b4   :  { %v2254_v4 = vadd.f32 %v5260_v3, %v5225_v62  ;;  %v2910_v62 = vld [vmem:[#allocation17 + $0x18] sm:$0xff] }
 0x5b5   :  { %v7556_v3 = vpack.c.bf16 %v2910_v62, %v2909_v60  ;;  %v6329_v60 = vld [vmem:[#allocation13 + $0x100] ss:$8 sps:$4 sm:$0xff]  }
 0x5b6   :  { %v2257_v8 = vmul.f32 0.015625, %v2254_v4  ;;  %v7559_v4 = vpack.c.bf16 %v2928_v2, %v2927_v1  ;;  %v6334_v1 = vld [vmem:[#allocation13 + $0x114] ss:$8 sps:$4 sm:$0xff]   ;;  %v6335_v2 = vld [vmem:[#allocation13 + $0x120] ss:$8 sps:$4 sm:$0xff]  }
 0x5b8   :  { %v2258_v9 = vadd.f32 1e-05, %v2257_v8  ;;  %v2911_v8 = vld [vmem:[#allocation17 + $0x20] sm:$0xff] }
 0x5ba   :  { %6453 = vrsqrt.f32 %v2258_v9  ;;  %v2912_v9 = vld [vmem:[#allocation17 + $0x28] sm:$0xff] }
 0x5c4   :  { %v6454_v18 = vpop.eup %6453 }
 0x5c5   :  { %4967 = vmatmul.mubr.msk.f32.vlgmr.msra.gmra.mrb[12].mxu0 %vm1963_vm0, %v6454_v18  ;;  %4968 = vmatmul.mubr.msk.f32.vlgmr.msra.gmra.mrb[8].mxu1 %vm1963_vm0, %v6454_v18  ;;  %v7562_v18 = vpack.c.bf16 %v2912_v9, %v2911_v8  ;;  %v6340_v8 = vld [vmem:[#allocation13 + $0x134] ss:$8 sps:$4 sm:$0xff]   ;;  %v6338_v9 = vld [vmem:[#allocation13 + $0x130] ss:$8 sps:$4 sm:$0xff]  }
 0x5c6   :  { %2822 = vmatpush1.bf16.msra.mxu0 %v6281_v10  ;;  %5790 = vmatpush3.bf16.msra.mxu1 %v7550_v49  ;;  %v2929_v10 = vld [vmem:[#allocation17 + $0xb0] sm:$0xff] }
 0x5c7   :  { %2823 = vmatprep.subr.bf16.mxu0 %v6286_v16  ;;  %5792 = vmatprep.subr.bf16.mxu1 %v7552_v53  ;;  %v2930_v16 = vld [vmem:[#allocation17 + $0xb8] sm:$0xff] }
 0x5ca   :  { %2824 = vmatpush1.bf16.msra.mxu0 %v6284_v22  ;;  %5794 = vmatpush3.bf16.msra.mxu1 %v7556_v3  ;;  %v7565_v22 = vpack.c.bf16 %v2930_v16, %v2929_v10  ;;  %v6343_v10 = vld [vmem:[#allocation13 + $0x144] ss:$8 sps:$4 sm:$0xff]   ;;  %v6341_v16 = vld [vmem:[#allocation13 + $0x140] ss:$8 sps:$4 sm:$0xff]  }
 0x5cb   :  { %2825 = vmatprep.subr.bf16.mxu0 %v6289_v23  ;;  %5796 = vmatprep.subr.bf16.mxu1 %v7559_v4  ;;  %v2913_v23 = vld [vmem:[#allocation17 + $0x30] sm:$0xff] }
 0x5ce   :  { %2826 = vmatpush1.bf16.msra.mxu0 %v6287_v24  ;;  %v2914_v24 = vld [vmem:[#allocation17 + $0x38] sm:$0xff]  ;;  %5798 = vmatpush3.bf16.msra.mxu1 %v7562_v18 }
 0x5cf   :  { %2827 = vmatprep.subr.bf16.mxu0 %v6292_v25  ;;  %v2931_v25 = vld [vmem:[#allocation17 + $0xc0] sm:$0xff]  ;;  %5800 = vmatprep.subr.bf16.mxu1 %v7565_v22 }
 0x5d2   :  { %2828 = vmatpush1.bf16.msra.mxu0 %v6290_v31  ;;  %v2932_v31 = vld [vmem:[#allocation17 + $0xc8] sm:$0xff] }
 0x5d3   :  { %2829 = vmatprep.subr.bf16.mxu0 %v6295_v28  ;;  %v7568_v28 = vpack.c.bf16 %v2914_v24, %v2913_v23  ;;  %v6346_v23 = vld [vmem:[#allocation13 + $0x154] ss:$8 sps:$4 sm:$0xff]   ;;  %v6344_v24 = vld [vmem:[#allocation13 + $0x150] ss:$8 sps:$4 sm:$0xff]  }
 0x5d5   :  { %5802 = vmatpush3.bf16.msra.mxu1 %v7568_v28 }
 0x5d6   :  { %2830 = vmatpush1.bf16.msra.mxu0 %v6293_v29  ;;  %v7571_v29 = vpack.c.bf16 %v2932_v31, %v2931_v25  ;;  %v6349_v25 = vld [vmem:[#allocation13 + $0x164] ss:$8 sps:$4 sm:$0xff]   ;;  %v6347_v31 = vld [vmem:[#allocation13 + $0x160] ss:$8 sps:$4 sm:$0xff]  }
 0x5d7   :  { %2831 = vmatprep.subr.bf16.mxu0 %v6298_v34  ;;  %v2915_v34 = vld [vmem:[#allocation17 + $0x40] sm:$0xff] }
 0x5d8   :  { %5804 = vmatprep.subr.bf16.mxu1 %v7571_v29 }
 0x5da   :  { %2832 = vmatpush1.bf16.msra.mxu0 %v6296_v35  ;;  %v2916_v35 = vld [vmem:[#allocation17 + $0x48] sm:$0xff] }
 0x5db   :  { %2833 = vmatprep.subr.bf16.mxu0 %v6301_v40  ;;  %v2933_v40 = vld [vmem:[#allocation17 + $0xd0] sm:$0xff] }
 0x5de   :  { %2834 = vmatpush1.bf16.msra.mxu0 %v6299_v41  ;;  %v2934_v41 = vld [vmem:[#allocation17 + $0xd8] sm:$0xff] }
 0x5df   :  { %2835 = vmatprep.subr.bf16.mxu0 %v6304_v42  ;;  %v7574_v42 = vpack.c.bf16 %v2916_v35, %v2915_v34  ;;  %v6352_v34 = vld [vmem:[#allocation13 + $0x174] ss:$8 sps:$4 sm:$0xff]   ;;  %v6350_v35 = vld [vmem:[#allocation13 + $0x170] ss:$8 sps:$4 sm:$0xff]  }
 0x5e1   :  { %5806 = vmatpush3.bf16.msra.mxu1 %v7574_v42 }
 0x5e2   :  { %2836 = vmatpush1.bf16.msra.mxu0 %v6302_v43  ;;  %v7577_v43 = vpack.c.bf16 %v2934_v41, %v2933_v40  ;;  %v6355_v40 = vld [vmem:[#allocation13 + $0x184] ss:$8 sps:$4 sm:$0xff]   ;;  %v6353_v41 = vld [vmem:[#allocation13 + $0x180] ss:$8 sps:$4 sm:$0xff]  }
 0x5e3   :  { %2837 = vmatprep.subr.bf16.mxu0 %v6307_v55  ;;  %v2917_v55 = vld [vmem:[#allocation17 + $0x50] sm:$0xff] }
 0x5e4   :  { %5808 = vmatprep.subr.bf16.mxu1 %v7577_v43 }
 0x5e6   :  { %2838 = vmatpush1.bf16.msra.mxu0 %v6305_v56  ;;  %v2918_v56 = vld [vmem:[#allocation17 + $0x58] sm:$0xff] }
 0x5e7   :  { %2839 = vmatprep.subr.bf16.mxu0 %v6310_v59  ;;  %v2935_v59 = vld [vmem:[#allocation17 + $0xe0] sm:$0xff] }
 0x5ea   :  { %2840 = vmatpush1.bf16.msra.mxu0 %v6308_v61  ;;  %v2936_v61 = vld [vmem:[#allocation17 + $0xe8] sm:$0xff] }
 0x5eb   :  { %2841 = vmatprep.subr.bf16.mxu0 %v6313_v39  ;;  %v7580_v39 = vpack.c.bf16 %v2918_v56, %v2917_v55  ;;  %v6358_v55 = vld [vmem:[#allocation13 + $0x194] ss:$8 sps:$4 sm:$0xff]   ;;  %v6356_v56 = vld [vmem:[#allocation13 + $0x190] ss:$8 sps:$4 sm:$0xff]  }
 0x5ed   :  { %5810 = vmatpush3.bf16.msra.mxu1 %v7580_v39 }
 0x5ee   :  { %2842 = vmatpush1.bf16.msra.mxu0 %v6311_v45  ;;  %v7583_v45 = vpack.c.bf16 %v2936_v61, %v2935_v59  ;;  %v6361_v59 = vld [vmem:[#allocation13 + $0x1a4] ss:$8 sps:$4 sm:$0xff]   ;;  %v6359_v61 = vld [vmem:[#allocation13 + $0x1a0] ss:$8 sps:$4 sm:$0xff]  }
 0x5ef   :  { %2843 = vmatprep.subr.bf16.mxu0 %v6316_v52  ;;  %v2919_v52 = vld [vmem:[#allocation17 + $0x60] sm:$0xff] }
 0x5f0   :  { %5812 = vmatprep.subr.bf16.mxu1 %v7583_v45 }
 0x5f2   :  { %2844 = vmatpush1.bf16.msra.mxu0 %v6314_v0  ;;  %v2920_v0 = vld [vmem:[#allocation17 + $0x68] sm:$0xff] }
 0x5f3   :  { %2845 = vmatprep.subr.bf16.mxu0 %v6319_v7  ;;  %v7586_v7 = vpack.c.bf16 %v2920_v0, %v2919_v52  ;;  %v6364_v52 = vld [vmem:[#allocation13 + $0x1b4] ss:$8 sps:$4 sm:$0xff]   ;;  %v6362_v0 = vld [vmem:[#allocation13 + $0x1b0] ss:$8 sps:$4 sm:$0xff]  }
 0x5f5   :  { %5814 = vmatpush3.bf16.msra.mxu1 %v7586_v7 }
 0x5f6   :  { %2846 = vmatpush1.bf16.msra.mxu0 %v6317_v14 }
 0x5f7   :  { %2847 = vmatprep.subr.bf16.mxu0 %v6322_v21 }
 0x5fa   :  { %2848 = vmatpush1.bf16.msra.mxu0 %v6320_v27 }
 0x5fb   :  { %2849 = vmatprep.subr.bf16.mxu0 %v6325_v37 }
 0x5fe   :  { %2850 = vmatpush1.bf16.msra.mxu0 %v6323_v47 }
 0x5ff   :  { %2851 = vmatprep.subr.bf16.mxu0 %v6328_v50 }
 0x602   :  { %2852 = vmatpush1.bf16.msra.mxu0 %v6326_v54 }
 0x603   :  { %2862 = vmatprep.subr.bf16.mxu0 %v6331_v30 }
 0x698   :  { %v2329_v14 = vpop.f32.mrb[12].mxu0  ;;  %v7590_v21 = vpop.f32.mrb[8].mxu1 }
 0x699   :  { %v2405_v27 = vmul.f32 %v2329_v14, %v7525_v38  ;;  %v2331_v37 = vpop.f32.mrb[13].mxu0  ;;  %v2402_v47 = vpop.f32.mrb[9].mxu1  ;;  %v6367_v14 = vld [vmem:[#allocation13 + $0x1c4] ss:$8 sps:$4 sm:$0xff]  }
 0x69a   :  { %v2406_v50 = vmul.f32 %v2331_v37, %v7528_v51  ;;  %v2408_v54 = vmul.f32 %v2402_v47, %v7538_v26  ;;  %v6332_v51 = vld [vmem:[#allocation13 + $0x110] ss:$8 sps:$4 sm:$0xff]   ;;  %v6337_v26 = vld [vmem:[#allocation13 + $0x124] ss:$8 sps:$4 sm:$0xff]   ;;  %v6370_v37 = vld [vmem:[#allocation13 + $0x1d4] ss:$8 sps:$4 sm:$0xff]  }
 0x69b   :  { %vm2409_vm1 = vcmp.gt.f32.partialorder %v2405_v27, 0.0  ;;  %v2413_v30 = vmul.f32 0.2, %v2405_v27  ;;  %v6368_v47 = vld [vmem:[#allocation13 + $0x1d0] ss:$8 sps:$4 sm:$0xff]  }
 0x69c   :  { %vm2410_vm2 = vcmp.gt.f32.partialorder %v2406_v50, 0.0  ;;  %v2414_v44 = vmul.f32 0.2, %v2406_v50  ;;  %vm2412_vm3 = vcmp.gt.f32.partialorder %v2408_v54, 0.0  ;;  %v2416_v57 = vmul.f32 0.2, %v2408_v54 }
 0x69d   :  { %v2417_v63 = vsel %vm2409_vm1, %v2405_v27, %v2413_v30  ;;  %v6365_v27 = vld [vmem:[#allocation13 + $0x1c0] ss:$8 sps:$4 sm:$0xff]  }
 0x69e   :  { %v2418_v20 = vsel %vm2410_vm2, %v2406_v50, %v2414_v44  ;;  %v2420_v36 = vsel %vm2412_vm3, %v2408_v54, %v2416_v57  ;;  %v2421_v62 = vpack.c.bf16 %v2417_v63, %v2417_v63  ;;  %v6373_v50 = vld [vmem:[#allocation13 + $0x1e4] ss:$8 sps:$4 sm:$0xff]   ;;  %v2407_v54 = vmul.f32 %v7590_v21, %v7535_v13  ;;  %v6371_v30 = vld [vmem:[#allocation13 + $0x1e0] ss:$8 sps:$4 sm:$0xff]   ;;  %v6376_v44 = vld [vmem:[#allocation13 + $0x1f4] ss:$8 sps:$4 sm:$0xff]  }
 0x69f   :  { %v2422_v46 = vpack.c.bf16 %v2418_v20, %v2418_v20  ;;  %v2424_v38 = vpack.c.bf16 %v2420_v36, %v2420_v36  ;;  %v6374_v63 = vld [vmem:[#allocation13 + $0x1f0] ss:$8 sps:$4 sm:$0xff]  }
 0x6a0   :  { %v2415_v57 = vmul.f32 0.2, %v2407_v54  ;;  %vm2411_vm4 = vcmp.gt.f32.partialorder %v2407_v54, 0.0  ;;  %v2922_v13 = vld [vmem:[#allocation17 + $0x78] sm:$0xff] }
 0x6a1   :  { %2853 = vmatprep.mubr.bf16.mxu0 %v2422_v46  ;;  %v2937_v46 = vld [vmem:[#allocation17 + $0xf0] sm:$0xff] }
 0x6a2   :  { %2854 = vmatmul.mubr.bf16.vlgmr.msra.gmra.mrb[16].mxu0 %v2421_v62  ;;  %v2419_v20 = vsel %vm2411_vm4, %v2407_v54, %v2415_v57  ;;  %v6379_v57 = vld [vmem:[#allocation20 + $0x48] sm:$0xff]  }
 0x6a3   :  { %2863 = vmatpush1.bf16.msra.mxu0 %v6329_v60  ;;  %2894 = vmatprep.mubr.bf16.mxu0 %v2424_v38  ;;  %v2423_v36 = vpack.c.bf16 %v2419_v20, %v2419_v20  ;;  %v2938_v60 = vld [vmem:[#allocation17 + $0xf8] sm:$0xff]  ;;  %v6380_v20 = vld [vmem:[#allocation20 + $0x8] sm:$0xff]  }
 0x6a4   :  { %2864 = vmatprep.subr.bf16.mxu0 %v6334_v1  ;;  %v5815_v62 = vpack.c.bf16 %v2938_v60, %v2937_v46  ;;  %v2921_v1 = vld [vmem:[#allocation17 + $0x70] sm:$0xff]  ;;  %v2489_v38 = vld [vmem:[#allocation14] sm:$0x3] }
 0x6a5   :  { %v5817_v21 = vpack.c.bf16 %v2922_v13, %v2921_v1  ;;  %v6382_v46 = vld [vmem:[#allocation20 + $0x10] sm:$0xff]   ;;  %v6384_v60 = vld [vmem:[#allocation20 + $0x18] sm:$0xff]   ;;  %v6386_v1 = vld [vmem:[#allocation20 + $0x20] sm:$0xff]  }
 0x6a6   :  { %5816 = vmatprep.subr.bf16.mxu1 %v5815_v62  ;;  %v6387_v13 = vld [vmem:[#allocation20 + $0x68] sm:$0xff]  }
 0x6a7   :  { %2865 = vmatpush1.bf16.msra.mxu0 %v6332_v51  ;;  %5818 = vmatpush3.bf16.msra.mxu1 %v5817_v21  ;;  %v2498_v51 = vrot.slane %v2489_v38, %v534_v15 }
 0x6a8   :  { %2866 = vmatprep.subr.bf16.mxu0 %v6337_v26  ;;  %v2494_v26 = vrot.slane %v2489_v38, %v530_v19  ;;  %v6389_v38 = vld [vmem:[#allocation20 + $0x70] sm:$0xff]  }
 0x6ab   :  { %2867 = vmatpush1.bf16.msra.mxu0 %v6335_v2 }
 0x6ac   :  { %2868 = vmatprep.subr.bf16.mxu0 %v6340_v8 }
 0x6af   :  { %2869 = vmatpush1.bf16.msra.mxu0 %v6338_v9 }
 0x6b0   :  { %2870 = vmatprep.subr.bf16.mxu0 %v6343_v10 }
 0x6b3   :  { %2871 = vmatpush1.bf16.msra.mxu0 %v6341_v16 }
 0x6b4   :  { %2872 = vmatprep.subr.bf16.mxu0 %v6346_v23  ;;  %v2904_v23 = vld [vmem:[#allocation16 + $0x8] sm:$0xff] }
 0x6b7   :  { %2873 = vmatpush1.bf16.msra.mxu0 %v6344_v24  ;;  %v2906_v24 = vld [vmem:[#allocation16 + $0x18] sm:$0xff] }
 0x6b8   :  { %2874 = vmatprep.subr.bf16.mxu0 %v6349_v25  ;;  %v5819_v25 = vpack.c.bf16 %v2906_v24, %v2904_v23  ;;  %v6406_v23 = vld [vmem:[#allocation20 + $0xd8] sm:$0xff]  }
 0x6b9   :  { %v6408_v24 = vld [vmem:[#allocation20 + $0x98] sm:$0xff]  }
 0x6ba   :  { %5820 = vmatprep.subr.bf16.mxu1 %v5819_v25 }
 0x6bb   :  { %2875 = vmatpush1.bf16.msra.mxu0 %v6347_v31  ;;  %v2903_v31 = vld [vmem:[#allocation16] sm:$0xff] }
 0x6bc   :  { %2876 = vmatprep.subr.bf16.mxu0 %v6352_v34  ;;  %v2905_v34 = vld [vmem:[#allocation16 + $0x10] sm:$0xff] }
 0x6bf   :  { %2877 = vmatpush1.bf16.msra.mxu0 %v6350_v35  ;;  %v5821_v35 = vpack.c.bf16 %v2905_v34, %v2903_v31  ;;  %v6412_v31 = vld [vmem:[#allocation20 + $0xa0] sm:$0xff]   ;;  %v6414_v34 = vld [vmem:[#allocation20 + $0xe8] sm:$0xff]  }
 0x6c0   :  { %2878 = vmatprep.subr.bf16.mxu0 %v6355_v40 }
 0x6c3   :  { %2879 = vmatpush1.bf16.msra.mxu0 %v6353_v41  ;;  %v6407_v41 = vld [vmem:[#allocation20 + $0x118] sm:$0xff]  }
 0x6c4   :  { %2880 = vmatprep.subr.bf16.mxu0 %v6358_v55  ;;  %v6409_v55 = vld [vmem:[#allocation20 + $0x160] sm:$0xff]  }
 0x6c7   :  { %2881 = vmatpush1.bf16.msra.mxu0 %v6356_v56  ;;  %v6411_v56 = vld [vmem:[#allocation20 + $0x120] sm:$0xff]  }
 0x6c8   :  { %2882 = vmatprep.subr.bf16.mxu0 %v6361_v59  ;;  %v6413_v59 = vld [vmem:[#allocation20 + $0x168] sm:$0xff]  }
 0x6cb   :  { %2883 = vmatpush1.bf16.msra.mxu0 %v6359_v61  ;;  %v6415_v61 = vld [vmem:[#allocation20 + $0x128] sm:$0xff]  }
 0x6cc   :  { %2884 = vmatprep.subr.bf16.mxu0 %v6364_v52  ;;  %v6417_v52 = vld [vmem:[#allocation20 + $0x170] sm:$0xff]  }
 0x6cf   :  { %2885 = vmatpush1.bf16.msra.mxu0 %v6362_v0  ;;  %v6419_v0 = vld [vmem:[#allocation20 + $0x130] sm:$0xff]  }
 0x6d0   :  { %2886 = vmatprep.subr.bf16.mxu0 %v6367_v14  ;;  %v6421_v14 = vld [vmem:[#allocation20 + $0x178] sm:$0xff]  }
 0x6d3   :  { %2887 = vmatpush1.bf16.msra.mxu0 %v6365_v27  ;;  %v6423_v27 = vld [vmem:[#allocation20 + $0x138] sm:$0xff]  }
 0x6d4   :  { %2888 = vmatprep.subr.bf16.mxu0 %v6370_v37 }
 0x6d7   :  { %2889 = vmatpush1.bf16.msra.mxu0 %v6368_v47 }
 0x6d8   :  { %2890 = vmatprep.subr.bf16.mxu0 %v6373_v50 }
 0x6db   :  { %2891 = vmatpush1.bf16.msra.mxu0 %v6371_v30 }
 0x6dc   :  { %2892 = vmatprep.subr.bf16.mxu0 %v6376_v44  ;;  %v6378_v44 = vld [vmem:[#allocation20] sm:$0xff]  }
 0x6df   :  { %2893 = vmatpush1.bf16.msra.mxu0 %v6374_v63 }
 0x6e2   :  { %2895 = vmatmul.mubr.bf16.vlgmr.msra.gmra.mrb[16].mxu0 %v2423_v36  ;;  %v6381_v36 = vld [vmem:[#allocation20 + $0x50] sm:$0xff]  }
 0x6e3   :  { %3781 = vmatprep.mubr.bf16.mxu0 %v7372_v17 }
 0x7b5   :  { %v2896_v2 = vpop.f32.mrb[16].mxu0 }
 0x7b6   :  { %v2898_v8 = vpop.f32.mrb[17].mxu0  ;;  %v5941_v17 = vadd.f32 %v2896_v2, %v2494_v26  ;;  %v6392_v26 = vld [vmem:[#allocation20 + $0x38] sm:$0xff]   ;;  %v6394_v2 = vld [vmem:[#allocation20 + $0xc0] sm:$0xff]  }
 0x7b7   :  { %v5942_v9 = vadd.f32 %v2898_v8, %v2498_v51  ;;  %v2900_v10 = vpop.f32.mrb[18].mxu0  ;;  %v6391_v51 = vld [vmem:[#allocation20 + $0x78] sm:$0xff]   ;;  %v6396_v8 = vld [vmem:[#allocation20 + $0x80] sm:$0xff]  }
 0x7b8   :  { %v2901_v16 = vpop.f32.mrb[19].mxu0  ;;  %v6400_v10 = vld [vmem:[#allocation20 + $0x88] sm:$0xff]  }
 0x7b9   :  { %3003 = vmatprep.mubr.f32.mxu1 %v5942_v9  ;;  %v6404_v16 = vld [vmem:[#allocation20 + $0x90] sm:$0xff]  }
 0x7ba   :  { %3004 = vmatmul.mubr.f32.vlgmr.msra.gmra.mrb[10].mxu1 %v5941_v17 }
 0x7bb   :  { %3078 = vmatprep.mubr.f32.mxu1 %v6973_v58  ;;  %5822 = vmatpush1.bf16.msra.mxu1 %v5821_v35 }
 0x7bc   :  { %5824 = vmatprep.subr.bf16.mxu1 %v7548_v6 }
 0x88d   :  { %v5293_v11 = vpop.f32.mrb[10].mxu1 }
 0x88e   :  { %v5294_v15 = vpop.f32.mrb[11].mxu1 }
 0x88f   :  { %v5295_v19 = vadd.f32 %v5294_v15, %v5293_v11  ;;  %v6422_v11 = vld [vmem:[#allocation20 + $0xf8] sm:$0xff]  }
 0x890   :  { %v6424_v15 = vld [vmem:[#allocation20 + $0xb8] sm:$0xff]  }
 0x891   :  { %v3009_v40 = vmul.f32 0.0625, %v5295_v19  ;;  %v3790_v19 = vld [vmem:[#allocation25] sm:$0xff] }
 0x893   :  { %5033 = vmatmul.mubr.msk.f32.vlgmr.msra.gmra.mrb[12].mxu1 %vm3010_vm5, %v3009_v40  ;;  %v3791_v40 = vld [vmem:[#allocation25 + $0x8] sm:$0xff] }
 0x894   :  { %5826 = vmatpush3.bf16.msra.mxu1 %v7550_v49 }
 0x895   :  { %5828 = vmatprep.subr.bf16.mxu1 %v7552_v53 }
 0x898   :  { %5830 = vmatpush3.bf16.msra.mxu1 %v7556_v3 }
 0x899   :  { %5832 = vmatprep.subr.bf16.mxu1 %v7559_v4 }
 0x89c   :  { %5834 = vmatpush3.bf16.msra.mxu1 %v7562_v18 }
 0x89d   :  { %5836 = vmatprep.subr.bf16.mxu1 %v7565_v22  ;;  %v6377_v22 = vld [vmem:[#allocation20 + $0x40] sm:$0xff]  }
 0x8a0   :  { %5838 = vmatpush3.bf16.msra.mxu1 %v7568_v28  ;;  %v6393_v28 = vld [vmem:[#allocation20 + $0x140] sm:$0xff]  }
 0x8a1   :  { %5840 = vmatprep.subr.bf16.mxu1 %v7571_v29  ;;  %v6395_v29 = vld [vmem:[#allocation20 + $0x100] sm:$0xff]   ;;  %5375 = vmatprep.subr.bf16.mxu0 %v6393_v28  ;;  %v3794_v28 = vld [vmem:[#allocation25 + $0x20] sm:$0xff] }
 0x8a2   :  { %5376 = vmatpush3.bf16.msra.mxu0 %v6395_v29  ;;  %v3795_v29 = vld [vmem:[#allocation25 + $0x28] sm:$0xff] }
 0x8a4   :  { %5842 = vmatpush3.bf16.msra.mxu1 %v7574_v42  ;;  %v6397_v42 = vld [vmem:[#allocation20 + $0x148] sm:$0xff]  }
 0x8a5   :  { %5844 = vmatprep.subr.bf16.mxu1 %v7577_v43  ;;  %v6399_v43 = vld [vmem:[#allocation20 + $0x108] sm:$0xff]   ;;  %5377 = vmatprep.subr.bf16.mxu0 %v6397_v42  ;;  %v3796_v42 = vld [vmem:[#allocation25 + $0x30] sm:$0xff] }
 0x8a6   :  { %5378 = vmatpush3.bf16.msra.mxu0 %v6399_v43  ;;  %v3797_v43 = vld [vmem:[#allocation25 + $0x38] sm:$0xff] }
 0x8a8   :  { %5846 = vmatpush3.bf16.msra.mxu1 %v7580_v39  ;;  %v6401_v39 = vld [vmem:[#allocation20 + $0x150] sm:$0xff]  }
 0x8a9   :  { %5848 = vmatprep.subr.bf16.mxu1 %v7583_v45  ;;  %v6403_v45 = vld [vmem:[#allocation20 + $0x110] sm:$0xff]   ;;  %5379 = vmatprep.subr.bf16.mxu0 %v6401_v39  ;;  %v7646_v39 = vpack.c.bf16 %v3797_v43, %v3796_v42 }
 0x8aa   :  { %5380 = vmatpush3.bf16.msra.mxu0 %v6403_v45  ;;  %v3798_v45 = vld [vmem:[#allocation25 + $0x40] sm:$0xff]  ;;  %v4219_v43 = vld [vmem:[#allocation31 + $0x18] sm:$0xff] }
 0x8ac   :  { %5850 = vmatpush3.bf16.msra.mxu1 %v7586_v7  ;;  %v6405_v7 = vld [vmem:[#allocation20 + $0x158] sm:$0xff]  }
 0x8ad   :  { %5852 = vmatprep.subr.bf16.mxu1 %v5815_v62  ;;  %5381 = vmatprep.subr.bf16.mxu0 %v6405_v7  ;;  %v6385_v62 = vld [vmem:[#allocation20 + $0x60] sm:$0xff]   ;;  %v3799_v7 = vld [vmem:[#allocation25 + $0x48] sm:$0xff] }
 0x8ae   :  { %5382 = vmatpush3.bf16.msra.mxu0 %v6407_v41  ;;  %v5872_v41 = vpack.c.bf16 %v3799_v7, %v3798_v45  ;;  %v4220_v45 = vld [vmem:[#allocation31 + $0x20] sm:$0xff]  ;;  %v4221_v7 = vld [vmem:[#allocation31 + $0x28] sm:$0xff] }
 0x8af   :  { %5383 = vmatprep.subr.bf16.mxu0 %v6409_v55  ;;  %v3800_v55 = vld [vmem:[#allocation25 + $0x50] sm:$0xff] }
 0x8b0   :  { %5854 = vmatpush3.bf16.msra.mxu1 %v5817_v21  ;;  %v6388_v21 = vld [vmem:[#allocation20 + $0x28] sm:$0xff]  }
 0x8b1   :  { %5856 = vmatprep.subr.bf16.mxu1 %v5819_v25  ;;  %v6410_v25 = vld [vmem:[#allocation20 + $0xe0] sm:$0xff]  }
 0x8b2   :  { %5384 = vmatpush3.bf16.msra.mxu0 %v6411_v56  ;;  %v3801_v56 = vld [vmem:[#allocation25 + $0x58] sm:$0xff] }
 0x8b3   :  { %5385 = vmatprep.subr.bf16.mxu0 %v6413_v59  ;;  %v5875_v59 = vpack.c.bf16 %v3801_v56, %v3800_v55 }
 0x8b6   :  { %5386 = vmatpush3.bf16.msra.mxu0 %v6415_v61  ;;  %v3802_v61 = vld [vmem:[#allocation25 + $0x60] sm:$0xff] }
 0x8b7   :  { %5387 = vmatprep.subr.bf16.mxu0 %v6417_v52  ;;  %v3803_v52 = vld [vmem:[#allocation25 + $0x68] sm:$0xff] }
 0x8ba   :  { %5388 = vmatpush3.bf16.msra.mxu0 %v6419_v0 }
 0x8bb   :  { %5389 = vmatprep.subr.bf16.mxu0 %v6421_v14  ;;  %v5878_v14 = vpack.c.bf16 %v3803_v52, %v3802_v61 }
 0x8be   :  { %5390 = vmatpush3.bf16.msra.mxu0 %v6423_v27 }
 0x8bf   :  { %5530 = vmatprep.subr.mxu0 %v6973_v58 }
 0x8c1   :  { %3782 = vmatmul.mubr.bf16.vlgmr.msra.gmra.mrb[20].mxu0 %v7382_v33  ;;  %v6383_v33 = vld [vmem:[#allocation20 + $0x58] sm:$0xff]  }
 0x8c2   :  { %5532 = vmatprep.mubr.msk.f32.mxu0 %vm6975_vm6, %v6973_v58 }
 0x966   :  { %v3080_v6 = vpop.f32.mrb[12].mxu1 }
 0x967   :  { %v7618_v49 = vsub.f32 %v5941_v17, %v3080_v6  ;;  %v3082_v53 = vpop.f32.mrb[13].mxu1  ;;  %v6402_v17 = vld [vmem:[#allocation20 + $0xd0] sm:$0xff]   ;;  %v3792_v6 = vld [vmem:[#allocation25 + $0x10] sm:$0xff] }
 0x968   :  { %v7620_v3 = vsub.f32 %v5942_v9, %v3082_v53  ;;  %v6398_v9 = vld [vmem:[#allocation20 + $0xc8] sm:$0xff]   ;;  %v6974_v53 = vmov 0.0|0.0  }
 0x969   :  { %v3087_v18 = vmul.f32 %v7618_v49, %v7618_v49 }
 0x96a   :  { %v3088_v4 = vmul.f32 %v7620_v3, %v7620_v3 }
 0x96c   :  { %3153 = vmatprep.mubr.f32.mxu1 %v3088_v4  ;;  %v7635_v4 = vpack.c.bf16 %v3791_v40, %v3790_v19  ;;  %v6427_v19 = vld [vmem:[#allocation26 + $0x10] sm:$0xff]   ;;  %v6428_v40 = vld [vmem:[#allocation26 + $0x18] sm:$0xff]  }
 0x96d   :  { %3154 = vmatmul.mubr.f32.vlgmr.msra.gmra.mrb[14].mxu1 %v3087_v18  ;;  %v3793_v18 = vld [vmem:[#allocation25 + $0x18] sm:$0xff] }
 0x96e   :  { %5858 = vmatpush1.bf16.msra.mxu1 %v5821_v35  ;;  %3229 = vmatprep.mubr.f32.mxu1 %v6973_v58  ;;  %v6418_v35 = vld [vmem:[#allocation20 + $0xf0] sm:$0xff]  }
 0x96f   :  { %5331 = vmatprep.subr.bf16.mxu1 %v6377_v22  ;;  %v7638_v22 = vpack.c.bf16 %v3793_v18, %v3792_v6  ;;  %v6429_v6 = vld [vmem:[#allocation26 + $0x20] sm:$0xff]   ;;  %v6431_v18 = vld [vmem:[#allocation26 + $0x30] sm:$0xff]  }
 0x994   :  { %v5391_v0 = vpop.f32.mrb[20].mxu0 }
 0x995   :  { %v5392_v27 = vpop.f32.mrb[21].mxu0 }
 0xa40   :  { %v5328_v37 = vpop.f32.mrb[14].mxu1 }
 0xa41   :  { %v5329_v47 = vpop.f32.mrb[15].mxu1 }
 0xa42   :  { %v5330_v50 = vadd.f32 %v5329_v47, %v5328_v37  ;;  %v5393_v37 = vadd.f32 %v5392_v27, %v5391_v0  ;;  %v5394_v47 = vpop.f32.mrb[22].mxu0  ;;  %v4223_v27 = vld [vmem:[#allocation31 + $0x38] sm:$0xff] }
 0xa43   :  { %v4214_v47 = vld [vmem:[#allocation29] sm:$0xff] }
 0xa44   :  { %v3159_v54 = vmul.f32 0.0625, %v5330_v50  ;;  %v5395_v50 = vpop.f32.mrb[23].mxu0 }
 0xa45   :  { %v4215_v50 = vld [vmem:[#allocation29 + $0x8] sm:$0xff] }
 0xa46   :  { %v3160_v30 = vadd.f32 1e-05, %v3159_v54  ;;  %v3804_v54 = vld [vmem:[#allocation25 + $0x70] sm:$0xff] }
 0xa48   :  { %6455 = vrsqrt.f32 %v3160_v30  ;;  %v3805_v30 = vld [vmem:[#allocation25 + $0x78] sm:$0xff] }
 0xa52   :  { %v6456_v63 = vpop.eup %6455 }
 0xa53   :  { %5034 = vmatmul.mubr.msk.f32.vlgmr.msra.gmra.mrb[16].mxu1 %vm3010_vm5, %v6456_v63 }
 0xa54   :  { %5332 = vmatpush3.bf16.msra.mxu1 %v6378_v44  ;;  %3701 = vmatprep.mubr.bf16.mxu1 %v7358_v48  ;;  %v6390_v48 = vld [vmem:[#allocation20 + $0x30] sm:$0xff]   ;;  %v5881_v44 = vpack.c.bf16 %v3805_v30, %v3804_v54  ;;  %v5086_v54 = vld [vmem:[#allocation28] ss:$0 sm:$0xff] }
 0xa55   :  { %5333 = vmatprep.subr.bf16.mxu1 %v6379_v57  ;;  %v3789_v57 = vld [vmem:[#allocation23] sm:$0xff] }
 0xa56   :  { %5531 = vmatpush3.msra.mxu0 %v3789_v57 }
 0xa57   :  { %5883 = vmatprep.subr.bf16.mxu0 %v6974_v53 }
 0xa58   :  { %5334 = vmatpush3.bf16.msra.mxu1 %v6380_v20 }
 0xa59   :  { %5335 = vmatprep.subr.bf16.mxu1 %v6381_v36 }
 0xa5c   :  { %5336 = vmatpush3.bf16.msra.mxu1 %v6382_v46 }
 0xa5d   :  { %5337 = vmatprep.subr.bf16.mxu1 %v6383_v33 }
 0xa60   :  { %5338 = vmatpush3.bf16.msra.mxu1 %v6384_v60 }
 0xa61   :  { %5339 = vmatprep.subr.bf16.mxu1 %v6385_v62 }
 0xa64   :  { %5340 = vmatpush3.bf16.msra.mxu1 %v6386_v1  ;;  %v5035_v1 = vld [vmem:[#allocation22] ss:$0 sm:$0xff] }
 0xa65   :  { %5341 = vmatprep.subr.bf16.mxu1 %v6387_v13 }
 0xa68   :  { %5342 = vmatpush3.bf16.msra.mxu1 %v6388_v21 }
 0xa69   :  { %5343 = vmatprep.subr.bf16.mxu1 %v6389_v38 }
 0xa6c   :  { %5344 = vmatpush3.bf16.msra.mxu1 %v6390_v48 }
 0xa6d   :  { %5345 = vmatprep.subr.bf16.mxu1 %v6391_v51 }
 0xa70   :  { %5346 = vmatpush3.bf16.msra.mxu1 %v6392_v26 }
 0xa71   :  { %5353 = vmatprep.subr.bf16.mxu1 %v6394_v2 }
 0xa73   :  { %3702 = vmatmul.mubr.bf16.vlgmr.msra.gmra.mrb[20].mxu1 %v7362_v5  ;;  %v6416_v5 = vld [vmem:[#allocation20 + $0xa8] sm:$0xff]  }
 0xa74   :  { %5354 = vmatpush3.bf16.msra.mxu1 %v6396_v8  ;;  %3741 = vmatprep.mubr.bf16.mxu1 %v7366_v32  ;;  %v6420_v32 = vld [vmem:[#allocation20 + $0xb0] sm:$0xff]  }
 0xa75   :  { %5355 = vmatprep.subr.bf16.mxu1 %v6398_v9 }
 0xa78   :  { %5356 = vmatpush3.bf16.msra.mxu1 %v6400_v10 }
 0xa79   :  { %5357 = vmatprep.subr.bf16.mxu1 %v6402_v17 }
 0xa7c   :  { %5358 = vmatpush3.bf16.msra.mxu1 %v6404_v16 }
 0xa7d   :  { %5359 = vmatprep.subr.bf16.mxu1 %v6406_v23 }
 0xa80   :  { %5360 = vmatpush3.bf16.msra.mxu1 %v6408_v24 }
 0xa81   :  { %5361 = vmatprep.subr.bf16.mxu1 %v6410_v25 }
 0xa84   :  { %5362 = vmatpush3.bf16.msra.mxu1 %v6412_v31 }
 0xa85   :  { %5363 = vmatprep.subr.bf16.mxu1 %v6414_v34 }
 0xa88   :  { %5364 = vmatpush3.bf16.msra.mxu1 %v6416_v5 }
 0xa89   :  { %5365 = vmatprep.subr.bf16.mxu1 %v6418_v35 }
 0xa8c   :  { %5366 = vmatpush3.bf16.msra.mxu1 %v6420_v32  ;;  %v6425_v32 = vld [vmem:[#allocation26] sm:$0xff]  }
 0xa8d   :  { %5367 = vmatprep.subr.bf16.mxu1 %v6422_v11 }
 0xa90   :  { %5368 = vmatpush3.bf16.msra.mxu1 %v6424_v15  ;;  %v6426_v15 = vld [vmem:[#allocation26 + $0x8] sm:$0xff]  }
 0xa91   :  { %5859 = vmatprep.subr.bf16.mxu1 %v6974_v53 }
 0xa93   :  { %3742 = vmatmul.mubr.bf16.vlgmr.msra.gmra.mrb[24].mxu1 %v7370_v12  ;;  %v7642_v12 = vpack.c.bf16 %v3795_v29, %v3794_v28  ;;  %v4216_v28 = vld [vmem:[#allocation31] sm:$0xff]  ;;  %v4217_v29 = vld [vmem:[#allocation31 + $0x8] sm:$0xff] }
 0xa94   :  { %5861 = vmatpush3.bf16.msra.mxu1 %v7635_v4  ;;  %5527 = vmatprep.mubr.msk.f32.mxu1 %vm6975_vm6, %v6973_v58  ;;  %v5908_v42 = vpack.c.bf16 %v4217_v29, %v4216_v28  ;;  %v6449_v29 = vld [vmem:[#allocation32] sm:$0xff]  }
 0xa95   :  { %5862 = vmatprep.subr.bf16.mxu1 %v6974_v53 }
 0xa98   :  { %5864 = vmatpush3.bf16.msra.mxu1 %v7638_v22 }
 0xa99   :  { %5865 = vmatprep.subr.bf16.mxu1 %v6974_v53 }
 0xa9c   :  { %5867 = vmatpush3.bf16.msra.mxu1 %v7642_v12 }
 0xa9d   :  { %5868 = vmatprep.subr.bf16.mxu1 %v6974_v53 }
 0xaa0   :  { %5870 = vmatpush3.bf16.msra.mxu1 %v7646_v39 }
 0xaa1   :  { %5871 = vmatprep.subr.bf16.mxu1 %v6974_v53 }
 0xaa4   :  { %5873 = vmatpush3.bf16.msra.mxu1 %v5872_v41 }
 0xaa5   :  { %5874 = vmatprep.subr.bf16.mxu1 %v6974_v53 }
 0xaa8   :  { %5876 = vmatpush3.bf16.msra.mxu1 %v5875_v59 }
 0xaa9   :  { %5877 = vmatprep.subr.bf16.mxu1 %v6974_v53 }
 0xaac   :  { %5879 = vmatpush3.bf16.msra.mxu1 %v5878_v14 }
 0xaad   :  { %5880 = vmatprep.subr.bf16.mxu1 %v6974_v53 }
 0xab0   :  { %5882 = vmatpush3.bf16.msra.mxu1 %v5881_v44 }
 0xab1   :  { %5570 = vmatprep.subr.mxu1 %v6973_v58 }
 0xb26   :  { %v7660_v63 = vpop.f32.mrb[16].mxu1 }
 0xb27   :  { %v7662_v20 = vpop.f32.mrb[17].mxu1 }
 0xb46   :  { %v5347_v36 = vpop.f32.mrb[20].mxu1 }
 0xb47   :  { %v5348_v46 = vpop.f32.mrb[21].mxu1 }
 0xb48   :  { %v5349_v33 = vadd.f32 %v5348_v46, %v5347_v36  ;;  %v5350_v60 = vpop.f32.mrb[22].mxu1 }
 0xb49   :  { %v5351_v62 = vpop.f32.mrb[23].mxu1 }
 0xb4a   :  { %v3704_v38 = vadd.f32 %v5349_v33, %v5035_v1 }
 0xb66   :  { %v5369_v13 = vpop.f32.mrb[24].mxu1 }
 0xb67   :  { %v5370_v21 = vpop.f32.mrb[25].mxu1 }
 0xb68   :  { %v5371_v48 = vadd.f32 %v5370_v21, %v5369_v13  ;;  %v5372_v51 = vpop.f32.mrb[26].mxu1  ;;  %v6433_v13 = vld [vmem:[#allocation19 + $0x40] sm:$0xff]   ;;  %v3237_v21 = vmul.f32 %v7662_v20, %v7620_v3  ;;  %v6437_v3 = vld [vmem:[#allocation19 + $0x50] sm:$0xff]  }
 0xb69   :  { %v5373_v26 = vpop.f32.mrb[27].mxu1  ;;  %v6438_v20 = vld [vmem:[#allocation19 + $0x10] sm:$0xff]  }
 0xb6a   :  { %v3744_v2 = vadd.f32 %v5371_v48, %v3704_v38  ;;  %v3241_v38 = vmul.f32 0.2, %v3237_v21  ;;  %vm3239_vm9 = vcmp.gt.f32.partialorder %v3237_v21, 0.0 }
 0xb6c   :  { %v3784_v8 = vadd.f32 %v5393_v37, %v3744_v2  ;;  %v3243_v26 = vsel %vm3239_vm9, %v3237_v21, %v3241_v38  ;;  %v6434_v2 = vld [vmem:[#allocation19] sm:$0xff]  }
 0xb6e   :  { %5528 = vmatmul.mubr.f32.vlgmr.msra.gmra.mrb[18].mxu1 %v3784_v8 }
 0xb6f   :  { %5571 = vmatpush3.msra.mxu1 %v3789_v57  ;;  %5572 = vmatprep.mubr.msk.f32.mxu1 %vm6975_vm6, %v6973_v58 }
 0xb70   :  { %5575 = vmatprep.subr.bf16.mxu1 %v6973_v58 }
 0xc41   :  { %v3872_v9 = vpop.f32.mrb[18].mxu1 }
 0xc42   :  { %v3876_v10 = vmul.f32 0.0625, %v3872_v9  ;;  %v5529_v17 = vpop.f32.mrb[19].mxu1  ;;  %v6435_v9 = vld [vmem:[#allocation19 + $0x48] sm:$0xff]  }
 0xc43   :  { %v6436_v17 = vld [vmem:[#allocation19 + $0x8] sm:$0xff]  }
 0xc44   :  { %5533 = vmatmul.mubr.msk.f32.vlgmr.msra.gmra.mrb[14].mxu0 %vm1963_vm0, %v3876_v10  ;;  %v3245_v10 = vpack.c.bf16 %v3243_v26, %v3243_v26 }
 0xc45   :  { %5885 = vmatpush3.bf16.msra.mxu0 %v7635_v4  ;;  %5567 = vmatprep.mubr.msk.f32.mxu0 %vm6975_vm6, %v6973_v58  ;;  %v6430_v4 = vld [vmem:[#allocation26 + $0x28] sm:$0xff]  }
 0xc46   :  { %5886 = vmatprep.subr.bf16.mxu0 %v6974_v53 }
 0xc49   :  { %5888 = vmatpush3.bf16.msra.mxu0 %v7638_v22  ;;  %v6432_v22 = vld [vmem:[#allocation26 + $0x38] sm:$0xff]  }
 0xc4a   :  { %5889 = vmatprep.subr.bf16.mxu0 %v6974_v53 }
 0xc4d   :  { %5891 = vmatpush3.bf16.msra.mxu0 %v7642_v12  ;;  %v4218_v12 = vld [vmem:[#allocation31 + $0x10] sm:$0xff] }
 0xc4e   :  { %5892 = vmatprep.subr.bf16.mxu0 %v6974_v53 }
 0xc51   :  { %5894 = vmatpush3.bf16.msra.mxu0 %v7646_v39  ;;  %v5911_v39 = vpack.c.bf16 %v4219_v43, %v4218_v12 }
 0xc52   :  { %5895 = vmatprep.subr.bf16.mxu0 %v6974_v53 }
 0xc55   :  { %5897 = vmatpush3.bf16.msra.mxu0 %v5872_v41  ;;  %v5914_v41 = vpack.c.bf16 %v4221_v7, %v4220_v45  ;;  %v6451_v7 = vld [vmem:[#allocation32 + $0x10] sm:$0xff]  }
 0xc56   :  { %5898 = vmatprep.subr.bf16.mxu0 %v6974_v53 }
 0xc59   :  { %5900 = vmatpush3.bf16.msra.mxu0 %v5875_v59 }
 0xc5a   :  { %5901 = vmatprep.subr.bf16.mxu0 %v6974_v53 }
 0xc5d   :  { %5903 = vmatpush3.bf16.msra.mxu0 %v5878_v14  ;;  %v4222_v14 = vld [vmem:[#allocation31 + $0x30] sm:$0xff] }
 0xc5e   :  { %5904 = vmatprep.subr.bf16.mxu0 %v6974_v53  ;;  %v5917_v37 = vpack.c.bf16 %v4223_v27, %v4222_v14  ;;  %v5120_v27 = vld [vmem:[#allocation5] ss:$0 sm:$0xff] }
 0xc61   :  { %5906 = vmatpush3.bf16.msra.mxu0 %v5881_v44  ;;  %v5920_v44 = vpack.c.bf16 %v4215_v50, %v4214_v47 }
 0xc62   :  { %5907 = vmatprep.subr.bf16.mxu0 %v6974_v53 }
 0xd17   :  { %v3946_v16 = vpop.f32.mrb[14].mxu0 }
 0xd18   :  { %v3950_v23 = vsub.f32 %v3784_v8, %v3946_v16  ;;  %v5534_v24 = vpop.f32.mrb[15].mxu0  ;;  %v6439_v16 = vld [vmem:[#allocation19 + $0x58] sm:$0xff]  }
 0xd19   :  { %v6441_v24 = vld [vmem:[#allocation19 + $0x60] sm:$0xff]  }
 0xd1a   :  { %v3951_v25 = vmul.f32 %v3950_v23, %v3950_v23 }
 0xd1c   :  { %5568 = vmatmul.mubr.f32.vlgmr.msra.gmra.mrb[24].mxu0 %v3951_v25  ;;  %v6442_v25 = vld [vmem:[#allocation19 + $0x20] sm:$0xff]  }
 0xd1d   :  { %5611 = vmatprep.mubr.msk.f32.mxu0 %vm6975_vm6, %v6973_v58  ;;  %5909 = vmatpush3.bf16.msra.mxu0 %v5908_v42 }
 0xd1e   :  { %5910 = vmatprep.subr.bf16.mxu0 %v6974_v53 }
 0xd21   :  { %5912 = vmatpush3.bf16.msra.mxu0 %v5911_v39 }
 0xd22   :  { %5913 = vmatprep.subr.bf16.mxu0 %v6974_v53 }
 0xd25   :  { %5915 = vmatpush3.bf16.msra.mxu0 %v5914_v41 }
 0xd26   :  { %5916 = vmatprep.subr.bf16.mxu0 %v6974_v53 }
 0xd29   :  { %5918 = vmatpush3.bf16.msra.mxu0 %v5917_v37 }
 0xd2a   :  { %5919 = vmatprep.subr.bf16.mxu0 %v6974_v53 }
 0xdef   :  { %v4018_v31 = vpop.f32.mrb[24].mxu0 }
 0xdf0   :  { %v4022_v34 = vmul.f32 0.0625, %v4018_v31  ;;  %v5569_v5 = vpop.f32.mrb[25].mxu0  ;;  %v6443_v31 = vld [vmem:[#allocation19 + $0x68] sm:$0xff]  }
 0xdf1   :  { %v6445_v5 = vld [vmem:[#allocation19 + $0x70] sm:$0xff]  }
 0xdf2   :  { %v4023_v35 = vadd.f32 1e-05, %v4022_v34  ;;  %v6444_v34 = vld [vmem:[#allocation19 + $0x28] sm:$0xff]  }
 0xdf4   :  { %6457 = vrsqrt.f32 %v4023_v35  ;;  %v3236_v35 = vmul.f32 %v7660_v63, %v7618_v49  ;;  %v6450_v63 = vld [vmem:[#allocation32 + $0x8] sm:$0xff]  }
 0xdf6   :  { %vm3238_vm10 = vcmp.gt.f32.partialorder %v3236_v35, 0.0 }
 0xdfe   :  { %v6458_v11 = vpop.eup %6457 }
 0xdff   :  { %5573 = vmatmul.mubr.msk.f32.vlgmr.msra.gmra.mrb[28].mxu1 %vm1963_vm0, %v6458_v11  ;;  %v6447_v11 = vld [vmem:[#allocation19 + $0x78] sm:$0xff]  }
 0xe00   :  { %5576 = vmatpush3.bf16.msra.mxu1 %v6425_v32  ;;  %5591 = vmatprep.mubr.msk.bf16.mxu1 %vm6975_vm6, %v6973_v58  ;;  %v6446_v32 = vld [vmem:[#allocation19 + $0x30] sm:$0xff]  }
 0xe01   :  { %5577 = vmatprep.subr.bf16.mxu1 %v6973_v58 }
 0xe04   :  { %5578 = vmatpush3.bf16.msra.mxu1 %v6426_v15  ;;  %v3240_v15 = vmul.f32 0.2, %v3236_v35 }
 0xe05   :  { %5579 = vmatprep.subr.bf16.mxu1 %v6973_v58 }
 0xe08   :  { %5580 = vmatpush3.bf16.msra.mxu1 %v6427_v19  ;;  %v6448_v19 = vld [vmem:[#allocation19 + $0x38] sm:$0xff]  }
 0xe09   :  { %5581 = vmatprep.subr.bf16.mxu1 %v6973_v58 }
 0xe0c   :  { %5582 = vmatpush3.bf16.msra.mxu1 %v6428_v40  ;;  %v3242_v40 = vsel %vm3238_vm10, %v3236_v35, %v3240_v15 }
 0xe0d   :  { %5583 = vmatprep.subr.bf16.mxu1 %v6973_v58 }
 0xe10   :  { %5584 = vmatpush3.bf16.msra.mxu1 %v6429_v6  ;;  %v3244_v6 = vpack.c.bf16 %v3242_v40, %v3242_v40 }
 0xe11   :  { %5585 = vmatprep.subr.bf16.mxu1 %v6973_v58 }
 0xe14   :  { %5586 = vmatpush3.bf16.msra.mxu1 %v6430_v4 }
 0xe15   :  { %5587 = vmatprep.subr.bf16.mxu1 %v6973_v58 }
 0xe18   :  { %5588 = vmatpush3.bf16.msra.mxu1 %v6431_v18 }
 0xe19   :  { %5589 = vmatprep.subr.bf16.mxu1 %v6973_v58 }
 0xe1c   :  { %5590 = vmatpush3.bf16.msra.mxu1 %v6432_v22 }
 0xe1d   :  { %5922 = vmatprep.subr.bf16.mxu1 %v6974_v53 }
 0xed2   :  { %v4094_v55 = vpop.f32.mrb[28].mxu1 }
 0xed3   :  { %v4098_v56 = vmul.f32 %v4094_v55, %v3950_v23  ;;  %v5574_v59 = vpop.f32.mrb[29].mxu1  ;;  %v6440_v23 = vld [vmem:[#allocation19 + $0x18] sm:$0xff]  }
 0xed5   :  { %vm4099_vm7 = vcmp.gt.f32.partialorder %v4098_v56, 0.0  ;;  %v4100_v61 = vmul.f32 0.2, %v4098_v56 }
 0xed7   :  { %v4101_v52 = vsel %vm4099_vm7, %v4098_v56, %v4100_v61 }
 0xed8   :  { %v4102_v0 = vpack.c.bf16 %v4101_v52, %v4101_v52 }
 0xeda   :  { %5592 = vmatmul.mubr.bf16.vlgmr.msra.gmra.mrb[32].mxu1 %v4102_v0 }
 0xedb   :  { %5924 = vmatpush3.bf16.msra.mxu1 %v5908_v42  ;;  %5637 = vmatprep.mubr.msk.f32.mxu1 %vm6975_vm6, %v6973_v58 }
 0xedc   :  { %5925 = vmatprep.subr.bf16.mxu1 %v6974_v53 }
 0xedf   :  { %5927 = vmatpush3.bf16.msra.mxu1 %v5911_v39 }
 0xee0   :  { %5928 = vmatprep.subr.bf16.mxu1 %v6974_v53 }
 0xee3   :  { %5930 = vmatpush3.bf16.msra.mxu1 %v5914_v41  ;;  %v6452_v41 = vld [vmem:[#allocation32 + $0x18] sm:$0xff]  }
 0xee4   :  { %5931 = vmatprep.subr.bf16.mxu1 %v6974_v53 }
 0xee7   :  { %5933 = vmatpush3.bf16.msra.mxu1 %v5917_v37 }
 0xee8   :  { %5473 = vmatprep.subr.bf16.mxu1 %v6433_v13 }
 0xfad   :  { %v4208_v30 = vpop.f32.mrb[32].mxu1 }
 0xfae   :  { %v4209_v57 = vadd.f32 %v5086_v54, %v4208_v30  ;;  %v5593_v36 = vpop.f32.mrb[33].mxu1 }
 0xfaf   :  { %v4211_v46 = vpop.f32.mrb[34].mxu1 }
 0xfb0   :  { %v5594_v33 = vpop.f32.mrb[35].mxu1  ;;  %5612 = vmatmul.mubr.msk.f32.vlgmr.msra.gmra.mrb[26].mxu0 %vm4224_vm8, %v4209_v57 }
 0xfb1   :  { %5921 = vmatpush3.bf16.msra.mxu0 %v5920_v44  ;;  %5618 = vmatprep.mubr.msk.f32.mxu0 %vm6975_vm6, %v6973_v58 }
 0xfb2   :  { %5934 = vmatprep.subr.bf16.mxu0 %v6974_v53 }
0x1083   :  { %v4294_v60 = vpop.f32.mrb[26].mxu0 }
0x1084   :  { %v4298_v62 = vmul.f32 0.25, %v4294_v60  ;;  %v5613_v1 = vpop.f32.mrb[27].mxu0 }
0x1086   :  { %5619 = vmatmul.mubr.msk.f32.vlgmr.msra.gmra.mrb[28].mxu0 %vm3010_vm5, %v4298_v62 }
0x1087   :  { %5936 = vmatpush3.bf16.msra.mxu0 %v5920_v44  ;;  %5644 = vmatprep.mubr.msk.f32.mxu0 %vm6975_vm6, %v6973_v58 }
0x1088   :  { %5647 = vmatprep.subr.bf16.mxu0 %v6973_v58 }
0x1159   :  { %v4368_v48 = vpop.f32.mrb[28].mxu0 }
0x115a   :  { %v7714_v53 = vsub.f32 %v4209_v57, %v4368_v48  ;;  %v5620_v51 = vpop.f32.mrb[29].mxu0 }
0x115c   :  { %v4373_v8 = vmul.f32 %v7714_v53, %v7714_v53 }
0x115e   :  { %5638 = vmatmul.mubr.msk.f32.vlgmr.msra.gmra.mrb[30].mxu1 %vm4224_vm8, %v4373_v8 }
0x115f   :  { %5474 = vmatpush3.bf16.msra.mxu1 %v6434_v2  ;;  %4731 = vmatprep.mubr.bf16.mxu1 %v3245_v10 }
0x1160   :  { %5475 = vmatprep.subr.bf16.mxu1 %v6435_v9 }
0x1163   :  { %5476 = vmatpush3.bf16.msra.mxu1 %v6436_v17 }
0x1164   :  { %5477 = vmatprep.subr.bf16.mxu1 %v6437_v3 }
0x1167   :  { %5478 = vmatpush3.bf16.msra.mxu1 %v6438_v20 }
0x1168   :  { %5479 = vmatprep.subr.bf16.mxu1 %v6439_v16 }
0x116b   :  { %5480 = vmatpush3.bf16.msra.mxu1 %v6440_v23 }
0x116c   :  { %5481 = vmatprep.subr.bf16.mxu1 %v6441_v24 }
0x116f   :  { %5482 = vmatpush3.bf16.msra.mxu1 %v6442_v25 }
0x1170   :  { %5483 = vmatprep.subr.bf16.mxu1 %v6443_v31 }
0x1173   :  { %5484 = vmatpush3.bf16.msra.mxu1 %v6444_v34 }
0x1174   :  { %5485 = vmatprep.subr.bf16.mxu1 %v6445_v5 }
0x1177   :  { %5486 = vmatpush3.bf16.msra.mxu1 %v6446_v32 }
0x1178   :  { %5487 = vmatprep.subr.bf16.mxu1 %v6447_v11 }
0x117b   :  { %5488 = vmatpush3.bf16.msra.mxu1 %v6448_v19 }
0x117e   :  { %4732 = vmatmul.mubr.bf16.vlgmr.msra.gmra.mrb[36].mxu1 %v3244_v6 }
0x1231   :  { %v4443_v4 = vpop.f32.mrb[30].mxu1 }
0x1232   :  { %v4447_v18 = vmul.f32 0.25, %v4443_v4  ;;  %v5639_v22 = vpop.f32.mrb[31].mxu1 }
0x1234   :  { %v4448_v28 = vadd.f32 1e-05, %v4447_v18 }
0x1236   :  { %6459 = vrsqrt.f32 %v4448_v28 }
0x1240   :  { %v6460_v49 = vpop.eup %6459 }
0x1241   :  { %5645 = vmatmul.mubr.msk.f32.vlgmr.msra.gmra.mrb[30].mxu0 %vm3010_vm5, %v6460_v49 }
0x1242   :  { %5648 = vmatpush3.bf16.msra.mxu0 %v6449_v29  ;;  %5655 = vmatprep.mubr.msk.bf16.mxu0 %vm6975_vm6, %v6973_v58 }
0x1243   :  { %5649 = vmatprep.subr.bf16.mxu0 %v6973_v58 }
0x1246   :  { %5650 = vmatpush3.bf16.msra.mxu0 %v6450_v63 }
0x1247   :  { %5651 = vmatprep.subr.bf16.mxu0 %v6973_v58 }
0x124a   :  { %5652 = vmatpush3.bf16.msra.mxu0 %v6451_v7 }
0x124b   :  { %5653 = vmatprep.subr.bf16.mxu0 %v6973_v58 }
0x124e   :  { %5654 = vmatpush3.bf16.msra.mxu0 %v6452_v41 }
0x1251   :  { %v5489_v12 = vpop.f32.mrb[36].mxu1 }
0x1252   :  { %v5490_v42 = vpop.f32.mrb[37].mxu1 }
0x1253   :  { %v5491_v43 = vadd.f32 %v5490_v42, %v5489_v12  ;;  %v5492_v39 = vpop.f32.mrb[38].mxu1 }
0x1254   :  { %v5493_v45 = vpop.f32.mrb[39].mxu1 }
0x1314   :  { %v4519_v55 = vpop.f32.mrb[30].mxu0 }
0x1315   :  { %v4523_v56 = vmul.f32 %v4519_v55, %v7714_v53  ;;  %v5646_v59 = vpop.f32.mrb[31].mxu0 }
0x1317   :  { %vm4524_vm11 = vcmp.gt.f32.partialorder %v4523_v56, 0.0  ;;  %v4525_v61 = vmul.f32 0.2, %v4523_v56 }
0x1319   :  { %v4526_v52 = vsel %vm4524_vm11, %v4523_v56, %v4525_v61 }
0x131a   :  { %v4527_v0 = vpack.c.bf16 %v4526_v52, %v4526_v52 }
0x131c   :  { %5656 = vmatmul.mubr.msk.bf16.vlgmr.msra.gmra.mrb[32].mxu0 %vm4224_vm8, %v4527_v0 }
0x13ef   :  { %v4597_v14 = vpop.f32.mrb[32].mxu0 }
0x13f0   :  { %v4734_v37 = vadd.f32 %v5491_v43, %v4597_v14  ;;  %v5657_v47 = vpop.f32.mrb[33].mxu0 }
0x13f1   :  { %v4600_v50 = vpop.f32.mrb[34].mxu0 }
0x13f2   :  { %v4746_v58 = vadd.f32 %v5120_v27, %v4734_v37  ;;  %v5658_v54 = vpop.f32.mrb[35].mxu0 }
0x13f4   :  { %4747 = vst [vmem:[#allocation34] sm:$0xff] %v4746_v58 }
0x13f5   :  { %6912 = shalt.err (!%p6909_p10)
}
0x13f6   :  { %s7779_s14 = sld [smem:[#allocation52_spill]] }
0x13fc   :  { %s6913_s29 = scalar_lea.hbm %s7779_s14, 128 }
0x13fd   :  { %p6914_p11 = scmp.ne.s32.totalorder %s7779_s14, %s6913_s29  ;;  %p6917_p12 = scmp.lt.u32.totalorder %s6913_s29, %s7779_s14 }
0x13ff   :  { %p6919_p13 = pnand %p6917_p12, %p6914_p11 }
0x1401   :  { %6922 = shalt.err (!%p6919_p13)
}
0x1402   :  { %4757 = dma.vmem_to_hbm [thread:$0]  %s4755_s25, 128, %s7779_s14, [#allocation4]  }
0x1403   :  { %6945 = dma.done.wait [#allocation4], 128  }
0x1404   :  { %6946 = vsyncadd [#allocation4], 4294967168 }
0x1405   :  { %4761 = vsyncpa [#allocation3], 1 }
0x1406   :  { %4762 = vsyncpa [#allocation6], 1 }
0x1407   :  { %4763 = vsyncpa [#allocation9], 1 }
0x1408   :  { %4764 = vsyncpa [#allocation12], 1 }
0x1409   :  { %4765 = vsyncpa [#allocation15], 1 }
0x140a   :  { %4766 = vsyncpa [#allocation18], 1 }
0x140b   :  { %4767 = vsyncpa [#allocation21], 1 }
0x140c   :  { %4768 = vsyncpa [#allocation24], 1 }
0x140d   :  { %4769 = vsyncpa [#allocation27], 1 }
0x140e   :  { %4770 = vsyncpa [#allocation30], 1 }
0x140f   :  { %4771 = vsyncpa [#allocation33], 1 }
0x1410   :  { %4772 = vsyncpa [#allocation4], 1 }

</bundles_post_ra>
